<compile_context>
chip_gen: v7x
topology: tpu7x:2x2x1
jax: 0.10.0
libtpu: 0.0.40
codegen_flags: <defaults>
</compile_context>

<pallas_src>
import functools

import jax
import jax.numpy as jnp
import numpy as np
from jax import lax
from jax.experimental import pallas as pl
from jax.experimental.pallas import tpu as pltpu

# ----------------------- config (mirrors config.TextRCNN / config.embedding) ---
EMB_DIM = 16          # config.embedding.dimension
HIDDEN = 16           # config.TextRCNN.hidden_dimension
BIDIRECTIONAL = True  # config.TextRCNN.bidirectional
KERNEL_SIZES = (2, 3) # config.TextRCNN.kernel_sizes
NUM_KERNELS = 8       # config.TextRCNN.num_kernels
TOP_K = 2             # config.TextRCNN.top_k_max_pooling
# TODO(synk): only num_layers=1 and rnn_type=GRU are implemented here.


# ------------------------------ fused forward kernel ----------------------------
def _textrcnn_kernel(x_ref, lens_ref, wih_ref, bih_ref, whh_ref, bhh_ref,
                     *rest, T, B, H, Cout, top_k, ksizes, kmax):
    """Whole TextRCNN forward in one kernel invocation (everything VMEM-resident).

    x_ref    : (T*B, E)   time-major flattened embeddings
    lens_ref : (B, 1)     int32 sequence lengths
    wih_ref  : (E, 6H)    fused+transposed input->gate weights  [fwd r|z|n | bwd r|z|n]
    bih_ref  : (1, 6H)
    whh_ref  : (2H, 6H)   block-diagonal hidden->gate weights (fwd block | bwd block)
    bhh_ref  : (1, 6H)
    rest     : (conv_w, conv_b) per kernel size, perm, out_ref, pad scratch
    """
    nk = len(ksizes)
    conv_w_refs = rest[0:2 * nk:2]
    conv_b_refs = rest[1:2 * nk:2]
    perm_ref = rest[2 * nk]
    out_ref = rest[2 * nk + 1]
    pad_ref = rest[2 * nk + 2]          # (B, T + 2*(kmax-1), 2H) VMEM scratch

    C = 2 * H
    G = 3 * H
    pmax = kmax - 1

    # zero the padded activation buffer (covers the convs' zero padding).
    pad_ref[...] = jnp.zeros_like(pad_ref)

    # ---- input-side gate projections for all timesteps & both directions -------
    gi = jnp.dot(x_ref[...], wih_ref[...],
                 preferred_element_type=jnp.float32) + bih_ref[...]   # (T*B, 6H)

    whh = whh_ref[...]
    bhh = bhh_ref[...]
    lens = lens_ref[...]                                              # (B, 1) int32

    def gru_gates(gi3, gh3, h_prev):
        r = jax.nn.sigmoid(gi3[:, :H] + gh3[:, :H])
        z = jax.nn.sigmoid(gi3[:, H:2 * H] + gh3[:, H:2 * H])
        n = jnp.tanh(gi3[:, 2 * H:] + r * gh3[:, 2 * H:])
        return (1.0 - z) * n + z * h_prev

    # ---- serial recurrence, fully unrolled (T is small & static) ---------------
    h_cat = jnp.zeros((B, C), jnp.float32)        # [h_fwd | h_bwd]
    for t in range(T):
        tb = T - 1 - t                            # time index consumed by bwd dir
        gh = jnp.dot(h_cat, whh, preferred_element_type=jnp.float32) + bhh   # (B,6H)
        h_f = gru_gates(gi[t * B:(t + 1) * B, :G], gh[:, :G], h_cat[:, :H])
        h_b = gru_gates(gi[tb * B:(tb + 1) * B, G:], gh[:, G:], h_cat[:, H:])
        h_cat = jnp.concatenate([h_f, h_b], axis=-1)

        # pad_packed_sequence semantics: zero outputs beyond each sequence length.
        # TODO(synk): for variable lengths the backward direction should start at
        # length-1 per row (pack_padded_sequence); exact only when lengths == T.
        mask_f = (lens > t).astype(jnp.float32)
        mask_b = (lens > tb).astype(jnp.float32)
        pad_ref[:, pmax + t, :H] = h_f * mask_f
        pad_ref[:, pmax + tb, H:] = h_b * mask_b

    # ---- Conv1d(padding=k-1) + ReLU + top-k pooling per kernel size ------------
    pooled_cols = []
    for ki, k in enumerate(ksizes):
        lout = T + k - 1
        off = kmax - k
        # im2col: (B, lout, k*C) -> single matmul per kernel size.
        taps = [pad_ref[:, off + tap: off + tap + lout, :] for tap in range(k)]
        cols = jnp.concatenate(taps, axis=-1)
        conv = jnp.einsum('blf,fo->blo', cols, conv_w_refs[ki][...],
                          preferred_element_type=jnp.float32)
        conv = jnp.maximum(conv + conv_b_refs[ki][...], 0.0)          # (B, lout, Cout)

        # iterative top-k along the time axis (matches torch.topk values, incl. ties).
        iota_t = lax.broadcasted_iota(jnp.int32, conv.shape, 1)
        vals = conv
        for j in range(top_k):
            m = jnp.max(vals, axis=1)                                  # (B, Cout)
            pooled_cols.append(m)
            if j + 1 < top_k:
                first = jnp.min(jnp.where(vals == m[:, None, :], iota_t, lout),
                                axis=1, keepdims=True)
                vals = jnp.where(iota_t == first, -jnp.inf, vals)

    # single lane-dense store in torch .view()/cat ordering (constant permutation).
    flat = jnp.concatenate(pooled_cols, axis=-1)                       # (B, nk*top_k*Cout)
    out_ref[...] = jnp.dot(flat, perm_ref[...], preferred_element_type=jnp.float32)


# --------------------------------- full forward ---------------------------------
def textrcnn_forward(kparams, embedding, input_lengths):
    """embedding: (B, T, E) batch-first, like the PyTorch module."""
    B, T, E = embedding.shape
    x_flat = jnp.transpose(embedding, (1, 0, 2)).reshape(T * B, E).astype(jnp.float32)
    lens = input_lengths.reshape(B, 1).astype(jnp.int32)
    nk = len(KERNEL_SIZES)
    kmax = max(KERNEL_SIZES)
    out_dim = nk * NUM_KERNELS * TOP_K

    kern = functools.partial(_textrcnn_kernel, T=T, B=B, H=HIDDEN,
                             Cout=NUM_KERNELS, top_k=TOP_K,
                             ksizes=KERNEL_SIZES, kmax=kmax)
    conv_args = []
    for i in range(nk):
        conv_args += [kparams[f'conv_w_{i}'], kparams[f'conv_b_{i}']]

    return pl.pallas_call(
        kern,
        out_shape=jax.ShapeDtypeStruct((B, out_dim), jnp.float32),
        scratch_shapes=[pltpu.VMEM((B, T + 2 * (kmax - 1), 2 * HIDDEN), jnp.float32)],
    )(x_flat, lens, kparams['wih'], kparams['bih'], kparams['whh_bd'],
      kparams['bhh'], *conv_args, kparams['perm'])


# -------------------------------- parameter init --------------------------------
def init_params(key):
    """Raw (torch-like) parameters: GRU gate order (r, z, n)."""
    H, E, C = HIDDEN, EMB_DIM, 2 * HIDDEN
    keys = jax.random.split(key, 8 + 2 * len(KERNEL_SIZES))

    def u(k, shape, scale):
        return jax.random.uniform(k, shape, jnp.float32, -scale, scale)

    s = 1.0 / np.sqrt(H)
    p = {
        'w_ih_f': u(keys[0], (3, H, E), s), 'w_hh_f': u(keys[1], (3, H, H), s),
        'b_ih_f': u(keys[2], (3, 1, H), s), 'b_hh_f': u(keys[3], (3, 1, H), s),
        'w_ih_b': u(keys[4], (3, H, E), s), 'w_hh_b': u(keys[5], (3, H, H), s),
        'b_ih_b': u(keys[6], (3, 1, H), s), 'b_hh_b': u(keys[7], (3, 1, H), s),
    }
    for i, k in enumerate(KERNEL_SIZES):
        sc = 1.0 / np.sqrt(C * k)
        p[f'conv_w_{i}'] = u(keys[8 + 2 * i], (k, C, NUM_KERNELS), sc)
        p[f'conv_b_{i}'] = u(keys[9 + 2 * i], (NUM_KERNELS,), sc)
    return p


def prepare_kernel_params(p):
    """One-time host-side repacking into the fused/pre-transposed kernel layout."""
    H, C = HIDDEN, 2 * HIDDEN

    def gate_mat(w):      # (3, H, D) -> (D, 3H), columns ordered [r | z | n]
        return jnp.transpose(w, (2, 0, 1)).reshape(w.shape[2], 3 * H)

    def gate_bias(b):     # (3, 1, H) -> (1, 3H)
        return jnp.transpose(b, (1, 0, 2)).reshape(1, 3 * H)

    wih = jnp.concatenate([gate_mat(p['w_ih_f']), gate_mat(p['w_ih_b'])], axis=1)
    bih = jnp.concatenate([gate_bias(p['b_ih_f']), gate_bias(p['b_ih_b'])], axis=1)
    whh_f, whh_b = gate_mat(p['w_hh_f']), gate_mat(p['w_hh_b'])
    z = jnp.zeros((H, 3 * H), jnp.float32)
    whh_bd = jnp.concatenate([jnp.concatenate([whh_f, z], axis=1),
                              jnp.concatenate([z, whh_b], axis=1)], axis=0)   # (2H, 6H)
    bhh = jnp.concatenate([gate_bias(p['b_hh_f']), gate_bias(p['b_hh_b'])], axis=1)

    kp = {'wih': wih, 'bih': bih, 'whh_bd': whh_bd, 'bhh': bhh}
    for i, k in enumerate(KERNEL_SIZES):
        kp[f'conv_w_{i}'] = p[f'conv_w_{i}'].reshape(k * C, NUM_KERNELS)      # im2col layout
        kp[f'conv_b_{i}'] = p[f'conv_b_{i}'].reshape(1, 1, NUM_KERNELS)

    # permutation taking [ki-major, rank-major, channel-minor] -> torch's
    # [ki-major, channel-major, rank-minor] ordering of the final (B, 32) output.
    nk, D = len(KERNEL_SIZES), len(KERNEL_SIZES) * NUM_KERNELS * TOP_K
    perm = np.zeros((D, D), np.float32)
    for ki in range(nk):
        for j in range(TOP_K):
            for c in range(NUM_KERNELS):
                s = ki * TOP_K * NUM_KERNELS + j * NUM_KERNELS + c
                d = ki * TOP_K * NUM_KERNELS + c * TOP_K + j
                perm[s, d] = 1.0
    kp['perm'] = jnp.asarray(perm)
    return kp


# ------------------------------ pure-JAX reference -------------------------------
def _gru_ref(x_tbe, w_ih, w_hh, b_ih, b_hh):
    H = w_ih.shape[1]
    B = x_tbe.shape[1]

    def step(h, x):
        gi_r = x @ w_ih[0].T + b_ih[0]
        gi_z = x @ w_ih[1].T + b_ih[1]
        gi_n = x @ w_ih[2].T + b_ih[2]
        gh_r = h @ w_hh[0].T + b_hh[0]
        gh_z = h @ w_hh[1].T + b_hh[1]
        gh_n = h @ w_hh[2].T + b_hh[2]
        r = jax.nn.sigmoid(gi_r + gh_r)
        z = jax.nn.sigmoid(gi_z + gh_z)
        n = jnp.tanh(gi_n + r * gh_n)
        h_new = (1 - z) * n + z * h
        return h_new, h_new

    _, out = lax.scan(step, jnp.zeros((B, H), jnp.float32), x_tbe)
    return out


def _forward_ref(params, embedding, input_lengths):
    B, T, _ = embedding.shape
    x_tbe = jnp.transpose(embedding, (1, 0, 2)).astype(jnp.float32)
    of = _gru_ref(x_tbe, params['w_ih_f'], params['w_hh_f'],
                  params['b_ih_f'], params['b_hh_f'])
    ob = jnp.flip(_gru_ref(jnp.flip(x_tbe, 0), params['w_ih_b'], params['w_hh_b'],
                           params['b_ih_b'], params['b_hh_b']), 0)
    rnn_out = jnp.transpose(jnp.concatenate([of, ob], -1), (1, 0, 2))   # (B, T, 2H)
    mask = (jnp.arange(T)[None, :] < input_lengths[:, None]).astype(rnn_out.dtype)
    rnn_out = rnn_out * mask[:, :, None]

    pooled = []
    for i, k in enumerate(KERNEL_SIZES):
        w, b = params[f'conv_w_{i}'], params[f'conv_b_{i}']     # (k, 2H, Cout), (Cout,)
        pad = k - 1
        xp = jnp.pad(rnn_out, ((0, 0), (pad, pad), (0, 0)))
        lout = T + k - 1
        conv = sum(jnp.einsum('blc,co->blo', xp[:, t:t + lout, :], w[t])
                   for t in range(k)) + b[None, None, :]
        conv = jnp.maximum(conv, 0.0)
        vals = lax.top_k(jnp.transpose(conv, (0, 2, 1)), TOP_K)[0]      # (B, Cout, top_k)
        pooled.append(vals.reshape(B, -1))
    return jnp.concatenate(pooled, 1)


# ------------------------------------- main --------------------------------------
if __name__ == "__main__":
    key = jax.random.PRNGKey(0)
    kp_key, kx = jax.random.split(key)
    params = init_params(kp_key)
    kparams = prepare_kernel_params(params)          # one-time repack, amortized

    B, T = 2, 8
    embedding = jax.random.normal(kx, (B, T, EMB_DIM), jnp.float32)
    input_lengths = jnp.full((B,), T, dtype=jnp.int32)

    out = textrcnn_forward(kparams, embedding, input_lengths)
    out = jax.block_until_ready(out)

    assert out.shape == (B, len(KERNEL_SIZES) * NUM_KERNELS * TOP_K), out.shape
    ref = _forward_ref(params, embedding, input_lengths)
    np.testing.assert_allclose(np.asarray(out), np.asarray(ref), rtol=2e-2, atol=2e-2)
    print("KERNEL_OK")
</pallas_src>

<mosaic_0001>
module attributes {stable_mosaic.version = 11 : i64} {
  func.func @_textrcnn_kernel(%arg0: memref<16x16xf32, #tpu.memory_space<vmem>>, %arg1: memref<2x1xi32, #tpu.memory_space<vmem>>, %arg2: memref<16x96xf32, #tpu.memory_space<vmem>>, %arg3: memref<1x96xf32, #tpu.memory_space<vmem>>, %arg4: memref<32x96xf32, #tpu.memory_space<vmem>>, %arg5: memref<1x96xf32, #tpu.memory_space<vmem>>, %arg6: memref<64x8xf32, #tpu.memory_space<vmem>>, %arg7: memref<1x1x8xf32, #tpu.memory_space<vmem>>, %arg8: memref<96x8xf32, #tpu.memory_space<vmem>>, %arg9: memref<1x1x8xf32, #tpu.memory_space<vmem>>, %arg10: memref<32x32xf32, #tpu.memory_space<vmem>>, %arg11: memref<2x32xf32, #tpu.memory_space<vmem>>, %arg12: memref<2x12x32xf32, #tpu.memory_space<vmem>>) attributes {dimension_semantics = [], scalar_prefetch = 0 : i64, scratch_operands = 1 : i64, tpu.core_type = #tpu.core_type<tc>} {
    %cst = arith.constant 0.000000e+00 : f32
    %0 = vector.broadcast %cst : f32 to vector<2x12x32xf32>
    %c0 = arith.constant 0 : index
    %c0_0 = arith.constant 0 : index
    %c0_1 = arith.constant 0 : index
    %1 = vector.load %arg12[%c0, %c0_0, %c0_1] : memref<2x12x32xf32, #tpu.memory_space<vmem>>, vector<2x12x32xf32>
    tpu.vector_store %arg12[%c0, %c0_0, %c0_1], %0 {strides = array<i32>} : memref<2x12x32xf32, #tpu.memory_space<vmem>>, vector<2x12x32xf32>,
    %c0_2 = arith.constant 0 : index
    %c0_3 = arith.constant 0 : index
    %2 = vector.load %arg0[%c0_2, %c0_3] : memref<16x16xf32, #tpu.memory_space<vmem>>, vector<16x16xf32>
    %c0_4 = arith.constant 0 : index
    %c0_5 = arith.constant 0 : index
    %3 = vector.load %arg2[%c0_4, %c0_5] : memref<16x96xf32, #tpu.memory_space<vmem>>, vector<16x96xf32>
    %cst_6 = arith.constant dense<0.000000e+00> : vector<16x96xf32>
    %4 = tpu.matmul %2, %3, %cst_6 {dimension_numbers = #tpu.dot_dimension_numbers<[1], [0], [0], [1], [0, 0, 1, 1], [], []>} : vector<16x16xf32>, vector<16x96xf32>, vector<16x96xf32> -> vector<16x96xf32>
    %c0_7 = arith.constant 0 : index
    %c0_8 = arith.constant 0 : index
    %5 = vector.load %arg3[%c0_7, %c0_8] : memref<1x96xf32, #tpu.memory_space<vmem>>, vector<1x96xf32>
    %6 = vector.broadcast %5 : vector<1x96xf32> to vector<16x96xf32>
    %7 = arith.addf %4, %6 : vector<16x96xf32>
    %c0_9 = arith.constant 0 : index
    %c0_10 = arith.constant 0 : index
    %8 = vector.load %arg4[%c0_9, %c0_10] : memref<32x96xf32, #tpu.memory_space<vmem>>, vector<32x96xf32>
    %c0_11 = arith.constant 0 : index
    %c0_12 = arith.constant 0 : index
    %9 = vector.load %arg5[%c0_11, %c0_12] : memref<1x96xf32, #tpu.memory_space<vmem>>, vector<1x96xf32>
    %c0_13 = arith.constant 0 : index
    %c0_14 = arith.constant 0 : index
    %10 = vector.load %arg1[%c0_13, %c0_14] : memref<2x1xi32, #tpu.memory_space<vmem>>, vector<2x1xi32>
    %cst_15 = arith.constant 0.000000e+00 : f32
    %11 = vector.broadcast %cst_15 : f32 to vector<2x32xf32>
    %cst_16 = arith.constant dense<0.000000e+00> : vector<2x96xf32>
    %12 = tpu.matmul %11, %8, %cst_16 {dimension_numbers = #tpu.dot_dimension_numbers<[1], [0], [0], [1], [0, 0, 1, 1], [], []>} : vector<2x32xf32>, vector<32x96xf32>, vector<2x96xf32> -> vector<2x96xf32>
    %13 = vector.broadcast %9 : vector<1x96xf32> to vector<2x96xf32>
    %14 = arith.addf %12, %13 : vector<2x96xf32>
    %15 = vector.extract_strided_slice %7 {offsets = [0, 0], sizes = [2, 48], strides = [1, 1]} : vector<16x96xf32> to vector<2x48xf32>
    %16 = vector.extract_strided_slice %14 {offsets = [0, 0], sizes = [2, 48], strides = [1, 1]} : vector<2x96xf32> to vector<2x48xf32>
    %17 = vector.extract_strided_slice %11 {offsets = [0, 0], sizes = [2, 16], strides = [1, 1]} : vector<2x32xf32> to vector<2x16xf32>
    %18 = vector.extract_strided_slice %15 {offsets = [0, 0], sizes = [2, 16], strides = [1, 1]} : vector<2x48xf32> to vector<2x16xf32>
    %19 = vector.extract_strided_slice %16 {offsets = [0, 0], sizes = [2, 16], strides = [1, 1]} : vector<2x48xf32> to vector<2x16xf32>
    %20 = arith.addf %18, %19 : vector<2x16xf32>
    %21 = arith.negf %20 : vector<2x16xf32>
    %22 = math.exp %21 : vector<2x16xf32>
    %cst_17 = arith.constant 1.000000e+00 : f32
    %23 = vector.broadcast %cst_17 : f32 to vector<2x16xf32>
    %24 = arith.addf %23, %22 : vector<2x16xf32>
    %25 = arith.divf %23, %24 : vector<2x16xf32>
    %26 = vector.extract_strided_slice %15 {offsets = [0, 16], sizes = [2, 16], strides = [1, 1]} : vector<2x48xf32> to vector<2x16xf32>
    %27 = vector.extract_strided_slice %16 {offsets = [0, 16], sizes = [2, 16], strides = [1, 1]} : vector<2x48xf32> to vector<2x16xf32>
    %28 = arith.addf %26, %27 : vector<2x16xf32>
    %29 = arith.negf %28 : vector<2x16xf32>
    %30 = math.exp %29 : vector<2x16xf32>
    %cst_18 = arith.constant 1.000000e+00 : f32
    %31 = vector.broadcast %cst_18 : f32 to vector<2x16xf32>
    %32 = arith.addf %31, %30 : vector<2x16xf32>
    %33 = arith.divf %31, %32 : vector<2x16xf32>
    %34 = vector.extract_strided_slice %15 {offsets = [0, 32], sizes = [2, 16], strides = [1, 1]} : vector<2x48xf32> to vector<2x16xf32>
    %35 = vector.extract_strided_slice %16 {offsets = [0, 32], sizes = [2, 16], strides = [1, 1]} : vector<2x48xf32> to vector<2x16xf32>
    %36 = arith.mulf %25, %35 : vector<2x16xf32>
    %37 = arith.addf %34, %36 : vector<2x16xf32>
    %38 = math.tanh %37 : vector<2x16xf32>
    %cst_19 = arith.constant 1.000000e+00 : f32
    %39 = vector.broadcast %cst_19 : f32 to vector<2x16xf32>
    %40 = arith.subf %39, %33 : vector<2x16xf32>
    %41 = arith.mulf %40, %38 : vector<2x16xf32>
    %42 = arith.mulf %33, %17 : vector<2x16xf32>
    %43 = arith.addf %41, %42 : vector<2x16xf32>
    %44 = vector.extract_strided_slice %7 {offsets = [14, 48], sizes = [2, 48], strides = [1, 1]} : vector<16x96xf32> to vector<2x48xf32>
    %45 = vector.extract_strided_slice %14 {offsets = [0, 48], sizes = [2, 48], strides = [1, 1]} : vector<2x96xf32> to vector<2x48xf32>
    %46 = vector.extract_strided_slice %11 {offsets = [0, 16], sizes = [2, 16], strides = [1, 1]} : vector<2x32xf32> to vector<2x16xf32>
    %47 = vector.extract_strided_slice %44 {offsets = [0, 0], sizes = [2, 16], strides = [1, 1]} : vector<2x48xf32> to vector<2x16xf32>
    %48 = vector.extract_strided_slice %45 {offsets = [0, 0], sizes = [2, 16], strides = [1, 1]} : vector<2x48xf32> to vector<2x16xf32>
    %49 = arith.addf %47, %48 : vector<2x16xf32>
    %50 = arith.negf %49 : vector<2x16xf32>
    %51 = math.exp %50 : vector<2x16xf32>
    %cst_20 = arith.constant 1.000000e+00 : f32
    %52 = vector.broadcast %cst_20 : f32 to vector<2x16xf32>
    %53 = arith.addf %52, %51 : vector<2x16xf32>
    %54 = arith.divf %52, %53 : vector<2x16xf32>
    %55 = vector.extract_strided_slice %44 {offsets = [0, 16], sizes = [2, 16], strides = [1, 1]} : vector<2x48xf32> to vector<2x16xf32>
    %56 = vector.extract_strided_slice %45 {offsets = [0, 16], sizes = [2, 16], strides = [1, 1]} : vector<2x48xf32> to vector<2x16xf32>
    %57 = arith.addf %55, %56 : vector<2x16xf32>
    %58 = arith.negf %57 : vector<2x16xf32>
    %59 = math.exp %58 : vector<2x16xf32>
    %cst_21 = arith.constant 1.000000e+00 : f32
    %60 = vector.broadcast %cst_21 : f32 to vector<2x16xf32>
    %61 = arith.addf %60, %59 : vector<2x16xf32>
    %62 = arith.divf %60, %61 : vector<2x16xf32>
    %63 = vector.extract_strided_slice %44 {offsets = [0, 32], sizes = [2, 16], strides = [1, 1]} : vector<2x48xf32> to vector<2x16xf32>
    %64 = vector.extract_strided_slice %45 {offsets = [0, 32], sizes = [2, 16], strides = [1, 1]} : vector<2x48xf32> to vector<2x16xf32>
    %65 = arith.mulf %54, %64 : vector<2x16xf32>
    %66 = arith.addf %63, %65 : vector<2x16xf32>
    %67 = math.tanh %66 : vector<2x16xf32>
    %cst_22 = arith.constant 1.000000e+00 : f32
    %68 = vector.broadcast %cst_22 : f32 to vector<2x16xf32>
    %69 = arith.subf %68, %62 : vector<2x16xf32>
    %70 = arith.mulf %69, %67 : vector<2x16xf32>
    %71 = arith.mulf %62, %46 : vector<2x16xf32>
    %72 = arith.addf %70, %71 : vector<2x16xf32>
    %73 = tpu.concatenate %43, %72 in 1 : vector<2x16xf32>, vector<2x16xf32> -> vector<2x32xf32>
    %c0_i32 = arith.constant 0 : i32
    %74 = vector.broadcast %c0_i32 : i32 to vector<2x1xi32>
    %75 = arith.cmpi sgt, %10, %74 : vector<2x1xi32>
    %76 = arith.extui %75 : vector<2x1xi1> to vector<2x1xi32>
    %77 = arith.sitofp %76 : vector<2x1xi32> to vector<2x1xf32>
    %c7_i32 = arith.constant 7 : i32
    %78 = vector.broadcast %c7_i32 : i32 to vector<2x1xi32>
    %79 = arith.cmpi sgt, %10, %78 : vector<2x1xi32>
    %80 = arith.extui %79 : vector<2x1xi1> to vector<2x1xi32>
    %81 = arith.sitofp %80 : vector<2x1xi32> to vector<2x1xf32>
    %82 = vector.broadcast %77 : vector<2x1xf32> to vector<2x16xf32>
    %83 = arith.mulf %43, %82 : vector<2x16xf32>
    %c0_23 = arith.constant 0 : index
    %c2 = arith.constant 2 : index
    %c0_24 = arith.constant 0 : index
    %84 = vector.load %arg12[%c0_23, %c2, %c0_24] : memref<2x12x32xf32, #tpu.memory_space<vmem>>, vector<2x1x16xf32>
    %85 = vector.shape_cast %84 : vector<2x1x16xf32> to vector<2x16xf32>
    %86 = vector.shape_cast %83 : vector<2x16xf32> to vector<2x1x16xf32>
    tpu.vector_store %arg12[%c0_23, %c2, %c0_24], %86 {strides = array<i32>} : memref<2x12x32xf32, #tpu.memory_space<vmem>>, vector<2x1x16xf32>,
    %87 = vector.broadcast %81 : vector<2x1xf32> to vector<2x16xf32>
    %88 = arith.mulf %72, %87 : vector<2x16xf32>
    %c0_25 = arith.constant 0 : index
    %c9 = arith.constant 9 : index
    %c16 = arith.constant 16 : index
    %89 = vector.load %arg12[%c0_25, %c9, %c16] : memref<2x12x32xf32, #tpu.memory_space<vmem>>, vector<2x1x16xf32>
    %90 = vector.shape_cast %89 : vector<2x1x16xf32> to vector<2x16xf32>
    %91 = vector.shape_cast %88 : vector<2x16xf32> to vector<2x1x16xf32>
    tpu.vector_store %arg12[%c0_25, %c9, %c16], %91 {strides = array<i32>} : memref<2x12x32xf32, #tpu.memory_space<vmem>>, vector<2x1x16xf32>,
    %cst_26 = arith.constant dense<0.000000e+00> : vector<2x96xf32>
    %92 = tpu.matmul %73, %8, %cst_26 {dimension_numbers = #tpu.dot_dimension_numbers<[1], [0], [0], [1], [0, 0, 1, 1], [], []>} : vector<2x32xf32>, vector<32x96xf32>, vector<2x96xf32> -> vector<2x96xf32>
    %93 = vector.broadcast %9 : vector<1x96xf32> to vector<2x96xf32>
    %94 = arith.addf %92, %93 : vector<2x96xf32>
    %95 = vector.extract_strided_slice %7 {offsets = [2, 0], sizes = [2, 48], strides = [1, 1]} : vector<16x96xf32> to vector<2x48xf32>
    %96 = vector.extract_strided_slice %94 {offsets = [0, 0], sizes = [2, 48], strides = [1, 1]} : vector<2x96xf32> to vector<2x48xf32>
    %97 = vector.extract_strided_slice %73 {offsets = [0, 0], sizes = [2, 16], strides = [1, 1]} : vector<2x32xf32> to vector<2x16xf32>
    %98 = vector.extract_strided_slice %95 {offsets = [0, 0], sizes = [2, 16], strides = [1, 1]} : vector<2x48xf32> to vector<2x16xf32>
    %99 = vector.extract_strided_slice %96 {offsets = [0, 0], sizes = [2, 16], strides = [1, 1]} : vector<2x48xf32> to vector<2x16xf32>
    %100 = arith.addf %98, %99 : vector<2x16xf32>
    %101 = arith.negf %100 : vector<2x16xf32>
    %102 = math.exp %101 : vector<2x16xf32>
    %cst_27 = arith.constant 1.000000e+00 : f32
    %103 = vector.broadcast %cst_27 : f32 to vector<2x16xf32>
    %104 = arith.addf %103, %102 : vector<2x16xf32>
    %105 = arith.divf %103, %104 : vector<2x16xf32>
    %106 = vector.extract_strided_slice %95 {offsets = [0, 16], sizes = [2, 16], strides = [1, 1]} : vector<2x48xf32> to vector<2x16xf32>
    %107 = vector.extract_strided_slice %96 {offsets = [0, 16], sizes = [2, 16], strides = [1, 1]} : vector<2x48xf32> to vector<2x16xf32>
    %108 = arith.addf %106, %107 : vector<2x16xf32>
    %109 = arith.negf %108 : vector<2x16xf32>
    %110 = math.exp %109 : vector<2x16xf32>
    %cst_28 = arith.constant 1.000000e+00 : f32
    %111 = vector.broadcast %cst_28 : f32 to vector<2x16xf32>
    %112 = arith.addf %111, %110 : vector<2x16xf32>
    %113 = arith.divf %111, %112 : vector<2x16xf32>
    %114 = vector.extract_strided_slice %95 {offsets = [0, 32], sizes = [2, 16], strides = [1, 1]} : vector<2x48xf32> to vector<2x16xf32>
    %115 = vector.extract_strided_slice %96 {offsets = [0, 32], sizes = [2, 16], strides = [1, 1]} : vector<2x48xf32> to vector<2x16xf32>
    %116 = arith.mulf %105, %115 : vector<2x16xf32>
    %117 = arith.addf %114, %116 : vector<2x16xf32>
    %118 = math.tanh %117 : vector<2x16xf32>
    %cst_29 = arith.constant 1.000000e+00 : f32
    %119 = vector.broadcast %cst_29 : f32 to vector<2x16xf32>
    %120 = arith.subf %119, %113 : vector<2x16xf32>
    %121 = arith.mulf %120, %118 : vector<2x16xf32>
    %122 = arith.mulf %113, %97 : vector<2x16xf32>
    %123 = arith.addf %121, %122 : vector<2x16xf32>
    %124 = vector.extract_strided_slice %7 {offsets = [12, 48], sizes = [2, 48], strides = [1, 1]} : vector<16x96xf32> to vector<2x48xf32>
    %125 = vector.extract_strided_slice %94 {offsets = [0, 48], sizes = [2, 48], strides = [1, 1]} : vector<2x96xf32> to vector<2x48xf32>
    %126 = vector.extract_strided_slice %73 {offsets = [0, 16], sizes = [2, 16], strides = [1, 1]} : vector<2x32xf32> to vector<2x16xf32>
    %127 = vector.extract_strided_slice %124 {offsets = [0, 0], sizes = [2, 16], strides = [1, 1]} : vector<2x48xf32> to vector<2x16xf32>
    %128 = vector.extract_strided_slice %125 {offsets = [0, 0], sizes = [2, 16], strides = [1, 1]} : vector<2x48xf32> to vector<2x16xf32>
    %129 = arith.addf %127, %128 : vector<2x16xf32>
    %130 = arith.negf %129 : vector<2x16xf32>
    %131 = math.exp %130 : vector<2x16xf32>
    %cst_30 = arith.constant 1.000000e+00 : f32
    %132 = vector.broadcast %cst_30 : f32 to vector<2x16xf32>
    %133 = arith.addf %132, %131 : vector<2x16xf32>
    %134 = arith.divf %132, %133 : vector<2x16xf32>
    %135 = vector.extract_strided_slice %124 {offsets = [0, 16], sizes = [2, 16], strides = [1, 1]} : vector<2x48xf32> to vector<2x16xf32>
    %136 = vector.extract_strided_slice %125 {offsets = [0, 16], sizes = [2, 16], strides = [1, 1]} : vector<2x48xf32> to vector<2x16xf32>
    %137 = arith.addf %135, %136 : vector<2x16xf32>
    %138 = arith.negf %137 : vector<2x16xf32>
    %139 = math.exp %138 : vector<2x16xf32>
    %cst_31 = arith.constant 1.000000e+00 : f32
    %140 = vector.broadcast %cst_31 : f32 to vector<2x16xf32>
    %141 = arith.addf %140, %139 : vector<2x16xf32>
    %142 = arith.divf %140, %141 : vector<2x16xf32>
    %143 = vector.extract_strided_slice %124 {offsets = [0, 32], sizes = [2, 16], strides = [1, 1]} : vector<2x48xf32> to vector<2x16xf32>
    %144 = vector.extract_strided_slice %125 {offsets = [0, 32], sizes = [2, 16], strides = [1, 1]} : vector<2x48xf32> to vector<2x16xf32>
    %145 = arith.mulf %134, %144 : vector<2x16xf32>
    %146 = arith.addf %143, %145 : vector<2x16xf32>
    %147 = math.tanh %146 : vector<2x16xf32>
    %cst_32 = arith.constant 1.000000e+00 : f32
    %148 = vector.broadcast %cst_32 : f32 to vector<2x16xf32>
    %149 = arith.subf %148, %142 : vector<2x16xf32>
    %150 = arith.mulf %149, %147 : vector<2x16xf32>
    %151 = arith.mulf %142, %126 : vector<2x16xf32>
    %152 = arith.addf %150, %151 : vector<2x16xf32>
    %153 = tpu.concatenate %123, %152 in 1 : vector<2x16xf32>, vector<2x16xf32> -> vector<2x32xf32>
    %c1_i32 = arith.constant 1 : i32
    %154 = vector.broadcast %c1_i32 : i32 to vector<2x1xi32>
    %155 = arith.cmpi sgt, %10, %154 : vector<2x1xi32>
    %156 = arith.extui %155 : vector<2x1xi1> to vector<2x1xi32>
    %157 = arith.sitofp %156 : vector<2x1xi32> to vector<2x1xf32>
    %c6_i32 = arith.constant 6 : i32
    %158 = vector.broadcast %c6_i32 : i32 to vector<2x1xi32>
    %159 = arith.cmpi sgt, %10, %158 : vector<2x1xi32>
    %160 = arith.extui %159 : vector<2x1xi1> to vector<2x1xi32>
    %161 = arith.sitofp %160 : vector<2x1xi32> to vector<2x1xf32>
    %162 = vector.broadcast %157 : vector<2x1xf32> to vector<2x16xf32>
    %163 = arith.mulf %123, %162 : vector<2x16xf32>
    %c0_33 = arith.constant 0 : index
    %c3 = arith.constant 3 : index
    %c0_34 = arith.constant 0 : index
    %164 = vector.load %arg12[%c0_33, %c3, %c0_34] : memref<2x12x32xf32, #tpu.memory_space<vmem>>, vector<2x1x16xf32>
    %165 = vector.shape_cast %164 : vector<2x1x16xf32> to vector<2x16xf32>
    %166 = vector.shape_cast %163 : vector<2x16xf32> to vector<2x1x16xf32>
    tpu.vector_store %arg12[%c0_33, %c3, %c0_34], %166 {strides = array<i32>} : memref<2x12x32xf32, #tpu.memory_space<vmem>>, vector<2x1x16xf32>,
    %167 = vector.broadcast %161 : vector<2x1xf32> to vector<2x16xf32>
    %168 = arith.mulf %152, %167 : vector<2x16xf32>
    %c0_35 = arith.constant 0 : index
    %c8 = arith.constant 8 : index
    %c16_36 = arith.constant 16 : index
    %169 = vector.load %arg12[%c0_35, %c8, %c16_36] : memref<2x12x32xf32, #tpu.memory_space<vmem>>, vector<2x1x16xf32>
    %170 = vector.shape_cast %169 : vector<2x1x16xf32> to vector<2x16xf32>
    %171 = vector.shape_cast %168 : vector<2x16xf32> to vector<2x1x16xf32>
    tpu.vector_store %arg12[%c0_35, %c8, %c16_36], %171 {strides = array<i32>} : memref<2x12x32xf32, #tpu.memory_space<vmem>>, vector<2x1x16xf32>,
    %cst_37 = arith.constant dense<0.000000e+00> : vector<2x96xf32>
    %172 = tpu.matmul %153, %8, %cst_37 {dimension_numbers = #tpu.dot_dimension_numbers<[1], [0], [0], [1], [0, 0, 1, 1], [], []>} : vector<2x32xf32>, vector<32x96xf32>, vector<2x96xf32> -> vector<2x96xf32>
    %173 = vector.broadcast %9 : vector<1x96xf32> to vector<2x96xf32>
    %174 = arith.addf %172, %173 : vector<2x96xf32>
    %175 = vector.extract_strided_slice %7 {offsets = [4, 0], sizes = [2, 48], strides = [1, 1]} : vector<16x96xf32> to vector<2x48xf32>
    %176 = vector.extract_strided_slice %174 {offsets = [0, 0], sizes = [2, 48], strides = [1, 1]} : vector<2x96xf32> to vector<2x48xf32>
    %177 = vector.extract_strided_slice %153 {offsets = [0, 0], sizes = [2, 16], strides = [1, 1]} : vector<2x32xf32> to vector<2x16xf32>
    %178 = vector.extract_strided_slice %175 {offsets = [0, 0], sizes = [2, 16], strides = [1, 1]} : vector<2x48xf32> to vector<2x16xf32>
    %179 = vector.extract_strided_slice %176 {offsets = [0, 0], sizes = [2, 16], strides = [1, 1]} : vector<2x48xf32> to vector<2x16xf32>
    %180 = arith.addf %178, %179 : vector<2x16xf32>
    %181 = arith.negf %180 : vector<2x16xf32>
    %182 = math.exp %181 : vector<2x16xf32>
    %cst_38 = arith.constant 1.000000e+00 : f32
    %183 = vector.broadcast %cst_38 : f32 to vector<2x16xf32>
    %184 = arith.addf %183, %182 : vector<2x16xf32>
    %185 = arith.divf %183, %184 : vector<2x16xf32>
    %186 = vector.extract_strided_slice %175 {offsets = [0, 16], sizes = [2, 16], strides = [1, 1]} : vector<2x48xf32> to vector<2x16xf32>
    %187 = vector.extract_strided_slice %176 {offsets = [0, 16], sizes = [2, 16], strides = [1, 1]} : vector<2x48xf32> to vector<2x16xf32>
    %188 = arith.addf %186, %187 : vector<2x16xf32>
    %189 = arith.negf %188 : vector<2x16xf32>
    %190 = math.exp %189 : vector<2x16xf32>
    %cst_39 = arith.constant 1.000000e+00 : f32
    %191 = vector.broadcast %cst_39 : f32 to vector<2x16xf32>
    %192 = arith.addf %191, %190 : vector<2x16xf32>
    %193 = arith.divf %191, %192 : vector<2x16xf32>
    %194 = vector.extract_strided_slice %175 {offsets = [0, 32], sizes = [2, 16], strides = [1, 1]} : vector<2x48xf32> to vector<2x16xf32>
    %195 = vector.extract_strided_slice %176 {offsets = [0, 32], sizes = [2, 16], strides = [1, 1]} : vector<2x48xf32> to vector<2x16xf32>
    %196 = arith.mulf %185, %195 : vector<2x16xf32>
    %197 = arith.addf %194, %196 : vector<2x16xf32>
    %198 = math.tanh %197 : vector<2x16xf32>
    %cst_40 = arith.constant 1.000000e+00 : f32
    %199 = vector.broadcast %cst_40 : f32 to vector<2x16xf32>
    %200 = arith.subf %199, %193 : vector<2x16xf32>
    %201 = arith.mulf %200, %198 : vector<2x16xf32>
    %202 = arith.mulf %193, %177 : vector<2x16xf32>
    %203 = arith.addf %201, %202 : vector<2x16xf32>
    %204 = vector.extract_strided_slice %7 {offsets = [10, 48], sizes = [2, 48], strides = [1, 1]} : vector<16x96xf32> to vector<2x48xf32>
    %205 = vector.extract_strided_slice %174 {offsets = [0, 48], sizes = [2, 48], strides = [1, 1]} : vector<2x96xf32> to vector<2x48xf32>
    %206 = vector.extract_strided_slice %153 {offsets = [0, 16], sizes = [2, 16], strides = [1, 1]} : vector<2x32xf32> to vector<2x16xf32>
    %207 = vector.extract_strided_slice %204 {offsets = [0, 0], sizes = [2, 16], strides = [1, 1]} : vector<2x48xf32> to vector<2x16xf32>
    %208 = vector.extract_strided_slice %205 {offsets = [0, 0], sizes = [2, 16], strides = [1, 1]} : vector<2x48xf32> to vector<2x16xf32>
    %209 = arith.addf %207, %208 : vector<2x16xf32>
    %210 = arith.negf %209 : vector<2x16xf32>
    %211 = math.exp %210 : vector<2x16xf32>
    %cst_41 = arith.constant 1.000000e+00 : f32
    %212 = vector.broadcast %cst_41 : f32 to vector<2x16xf32>
    %213 = arith.addf %212, %211 : vector<2x16xf32>
    %214 = arith.divf %212, %213 : vector<2x16xf32>
    %215 = vector.extract_strided_slice %204 {offsets = [0, 16], sizes = [2, 16], strides = [1, 1]} : vector<2x48xf32> to vector<2x16xf32>
    %216 = vector.extract_strided_slice %205 {offsets = [0, 16], sizes = [2, 16], strides = [1, 1]} : vector<2x48xf32> to vector<2x16xf32>
    %217 = arith.addf %215, %216 : vector<2x16xf32>
    %218 = arith.negf %217 : vector<2x16xf32>
    %219 = math.exp %218 : vector<2x16xf32>
    %cst_42 = arith.constant 1.000000e+00 : f32
    %220 = vector.broadcast %cst_42 : f32 to vector<2x16xf32>
    %221 = arith.addf %220, %219 : vector<2x16xf32>
    %222 = arith.divf %220, %221 : vector<2x16xf32>
    %223 = vector.extract_strided_slice %204 {offsets = [0, 32], sizes = [2, 16], strides = [1, 1]} : vector<2x48xf32> to vector<2x16xf32>
    %224 = vector.extract_strided_slice %205 {offsets = [0, 32], sizes = [2, 16], strides = [1, 1]} : vector<2x48xf32> to vector<2x16xf32>
    %225 = arith.mulf %214, %224 : vector<2x16xf32>
    %226 = arith.addf %223, %225 : vector<2x16xf32>
    %227 = math.tanh %226 : vector<2x16xf32>
    %cst_43 = arith.constant 1.000000e+00 : f32
    %228 = vector.broadcast %cst_43 : f32 to vector<2x16xf32>
    %229 = arith.subf %228, %222 : vector<2x16xf32>
    %230 = arith.mulf %229, %227 : vector<2x16xf32>
    %231 = arith.mulf %222, %206 : vector<2x16xf32>
    %232 = arith.addf %230, %231 : vector<2x16xf32>
    %233 = tpu.concatenate %203, %232 in 1 : vector<2x16xf32>, vector<2x16xf32> -> vector<2x32xf32>
    %c2_i32 = arith.constant 2 : i32
    %234 = vector.broadcast %c2_i32 : i32 to vector<2x1xi32>
    %235 = arith.cmpi sgt, %10, %234 : vector<2x1xi32>
    %236 = arith.extui %235 : vector<2x1xi1> to vector<2x1xi32>
    %237 = arith.sitofp %236 : vector<2x1xi32> to vector<2x1xf32>
    %c5_i32 = arith.constant 5 : i32
    %238 = vector.broadcast %c5_i32 : i32 to vector<2x1xi32>
    %239 = arith.cmpi sgt, %10, %238 : vector<2x1xi32>
    %240 = arith.extui %239 : vector<2x1xi1> to vector<2x1xi32>
    %241 = arith.sitofp %240 : vector<2x1xi32> to vector<2x1xf32>
    %242 = vector.broadcast %237 : vector<2x1xf32> to vector<2x16xf32>
    %243 = arith.mulf %203, %242 : vector<2x16xf32>
    %c0_44 = arith.constant 0 : index
    %c4 = arith.constant 4 : index
    %c0_45 = arith.constant 0 : index
    %244 = vector.load %arg12[%c0_44, %c4, %c0_45] : memref<2x12x32xf32, #tpu.memory_space<vmem>>, vector<2x1x16xf32>
    %245 = vector.shape_cast %244 : vector<2x1x16xf32> to vector<2x16xf32>
    %246 = vector.shape_cast %243 : vector<2x16xf32> to vector<2x1x16xf32>
    tpu.vector_store %arg12[%c0_44, %c4, %c0_45], %246 {strides = array<i32>} : memref<2x12x32xf32, #tpu.memory_space<vmem>>, vector<2x1x16xf32>,
    %247 = vector.broadcast %241 : vector<2x1xf32> to vector<2x16xf32>
    %248 = arith.mulf %232, %247 : vector<2x16xf32>
    %c0_46 = arith.constant 0 : index
    %c7 = arith.constant 7 : index
    %c16_47 = arith.constant 16 : index
    %249 = vector.load %arg12[%c0_46, %c7, %c16_47] : memref<2x12x32xf32, #tpu.memory_space<vmem>>, vector<2x1x16xf32>
    %250 = vector.shape_cast %249 : vector<2x1x16xf32> to vector<2x16xf32>
    %251 = vector.shape_cast %248 : vector<2x16xf32> to vector<2x1x16xf32>
    tpu.vector_store %arg12[%c0_46, %c7, %c16_47], %251 {strides = array<i32>} : memref<2x12x32xf32, #tpu.memory_space<vmem>>, vector<2x1x16xf32>,
    %cst_48 = arith.constant dense<0.000000e+00> : vector<2x96xf32>
    %252 = tpu.matmul %233, %8, %cst_48 {dimension_numbers = #tpu.dot_dimension_numbers<[1], [0], [0], [1], [0, 0, 1, 1], [], []>} : vector<2x32xf32>, vector<32x96xf32>, vector<2x96xf32> -> vector<2x96xf32>
    %253 = vector.broadcast %9 : vector<1x96xf32> to vector<2x96xf32>
    %254 = arith.addf %252, %253 : vector<2x96xf32>
    %255 = vector.extract_strided_slice %7 {offsets = [6, 0], sizes = [2, 48], strides = [1, 1]} : vector<16x96xf32> to vector<2x48xf32>
    %256 = vector.extract_strided_slice %254 {offsets = [0, 0], sizes = [2, 48], strides = [1, 1]} : vector<2x96xf32> to vector<2x48xf32>
    %257 = vector.extract_strided_slice %233 {offsets = [0, 0], sizes = [2, 16], strides = [1, 1]} : vector<2x32xf32> to vector<2x16xf32>
    %258 = vector.extract_strided_slice %255 {offsets = [0, 0], sizes = [2, 16], strides = [1, 1]} : vector<2x48xf32> to vector<2x16xf32>
    %259 = vector.extract_strided_slice %256 {offsets = [0, 0], sizes = [2, 16], strides = [1, 1]} : vector<2x48xf32> to vector<2x16xf32>
    %260 = arith.addf %258, %259 : vector<2x16xf32>
    %261 = arith.negf %260 : vector<2x16xf32>
    %262 = math.exp %261 : vector<2x16xf32>
    %cst_49 = arith.constant 1.000000e+00 : f32
    %263 = vector.broadcast %cst_49 : f32 to vector<2x16xf32>
    %264 = arith.addf %263, %262 : vector<2x16xf32>
    %265 = arith.divf %263, %264 : vector<2x16xf32>
    %266 = vector.extract_strided_slice %255 {offsets = [0, 16], sizes = [2, 16], strides = [1, 1]} : vector<2x48xf32> to vector<2x16xf32>
    %267 = vector.extract_strided_slice %256 {offsets = [0, 16], sizes = [2, 16], strides = [1, 1]} : vector<2x48xf32> to vector<2x16xf32>
    %268 = arith.addf %266, %267 : vector<2x16xf32>
    %269 = arith.negf %268 : vector<2x16xf32>
    %270 = math.exp %269 : vector<2x16xf32>
    %cst_50 = arith.constant 1.000000e+00 : f32
    %271 = vector.broadcast %cst_50 : f32 to vector<2x16xf32>
    %272 = arith.addf %271, %270 : vector<2x16xf32>
    %273 = arith.divf %271, %272 : vector<2x16xf32>
    %274 = vector.extract_strided_slice %255 {offsets = [0, 32], sizes = [2, 16], strides = [1, 1]} : vector<2x48xf32> to vector<2x16xf32>
    %275 = vector.extract_strided_slice %256 {offsets = [0, 32], sizes = [2, 16], strides = [1, 1]} : vector<2x48xf32> to vector<2x16xf32>
    %276 = arith.mulf %265, %275 : vector<2x16xf32>
    %277 = arith.addf %274, %276 : vector<2x16xf32>
    %278 = math.tanh %277 : vector<2x16xf32>
    %cst_51 = arith.constant 1.000000e+00 : f32
    %279 = vector.broadcast %cst_51 : f32 to vector<2x16xf32>
    %280 = arith.subf %279, %273 : vector<2x16xf32>
    %281 = arith.mulf %280, %278 : vector<2x16xf32>
    %282 = arith.mulf %273, %257 : vector<2x16xf32>
    %283 = arith.addf %281, %282 : vector<2x16xf32>
    %284 = vector.extract_strided_slice %7 {offsets = [8, 48], sizes = [2, 48], strides = [1, 1]} : vector<16x96xf32> to vector<2x48xf32>
    %285 = vector.extract_strided_slice %254 {offsets = [0, 48], sizes = [2, 48], strides = [1, 1]} : vector<2x96xf32> to vector<2x48xf32>
    %286 = vector.extract_strided_slice %233 {offsets = [0, 16], sizes = [2, 16], strides = [1, 1]} : vector<2x32xf32> to vector<2x16xf32>
    %287 = vector.extract_strided_slice %284 {offsets = [0, 0], sizes = [2, 16], strides = [1, 1]} : vector<2x48xf32> to vector<2x16xf32>
    %288 = vector.extract_strided_slice %285 {offsets = [0, 0], sizes = [2, 16], strides = [1, 1]} : vector<2x48xf32> to vector<2x16xf32>
    %289 = arith.addf %287, %288 : vector<2x16xf32>
    %290 = arith.negf %289 : vector<2x16xf32>
    %291 = math.exp %290 : vector<2x16xf32>
    %cst_52 = arith.constant 1.000000e+00 : f32
    %292 = vector.broadcast %cst_52 : f32 to vector<2x16xf32>
    %293 = arith.addf %292, %291 : vector<2x16xf32>
    %294 = arith.divf %292, %293 : vector<2x16xf32>
    %295 = vector.extract_strided_slice %284 {offsets = [0, 16], sizes = [2, 16], strides = [1, 1]} : vector<2x48xf32> to vector<2x16xf32>
    %296 = vector.extract_strided_slice %285 {offsets = [0, 16], sizes = [2, 16], strides = [1, 1]} : vector<2x48xf32> to vector<2x16xf32>
    %297 = arith.addf %295, %296 : vector<2x16xf32>
    %298 = arith.negf %297 : vector<2x16xf32>
    %299 = math.exp %298 : vector<2x16xf32>
    %cst_53 = arith.constant 1.000000e+00 : f32
    %300 = vector.broadcast %cst_53 : f32 to vector<2x16xf32>
    %301 = arith.addf %300, %299 : vector<2x16xf32>
    %302 = arith.divf %300, %301 : vector<2x16xf32>
    %303 = vector.extract_strided_slice %284 {offsets = [0, 32], sizes = [2, 16], strides = [1, 1]} : vector<2x48xf32> to vector<2x16xf32>
    %304 = vector.extract_strided_slice %285 {offsets = [0, 32], sizes = [2, 16], strides = [1, 1]} : vector<2x48xf32> to vector<2x16xf32>
    %305 = arith.mulf %294, %304 : vector<2x16xf32>
    %306 = arith.addf %303, %305 : vector<2x16xf32>
    %307 = math.tanh %306 : vector<2x16xf32>
    %cst_54 = arith.constant 1.000000e+00 : f32
    %308 = vector.broadcast %cst_54 : f32 to vector<2x16xf32>
    %309 = arith.subf %308, %302 : vector<2x16xf32>
    %310 = arith.mulf %309, %307 : vector<2x16xf32>
    %311 = arith.mulf %302, %286 : vector<2x16xf32>
    %312 = arith.addf %310, %311 : vector<2x16xf32>
    %313 = tpu.concatenate %283, %312 in 1 : vector<2x16xf32>, vector<2x16xf32> -> vector<2x32xf32>
    %c3_i32 = arith.constant 3 : i32
    %314 = vector.broadcast %c3_i32 : i32 to vector<2x1xi32>
    %315 = arith.cmpi sgt, %10, %314 : vector<2x1xi32>
    %316 = arith.extui %315 : vector<2x1xi1> to vector<2x1xi32>
    %317 = arith.sitofp %316 : vector<2x1xi32> to vector<2x1xf32>
    %c4_i32 = arith.constant 4 : i32
    %318 = vector.broadcast %c4_i32 : i32 to vector<2x1xi32>
    %319 = arith.cmpi sgt, %10, %318 : vector<2x1xi32>
    %320 = arith.extui %319 : vector<2x1xi1> to vector<2x1xi32>
    %321 = arith.sitofp %320 : vector<2x1xi32> to vector<2x1xf32>
    %322 = vector.broadcast %317 : vector<2x1xf32> to vector<2x16xf32>
    %323 = arith.mulf %283, %322 : vector<2x16xf32>
    %c0_55 = arith.constant 0 : index
    %c5 = arith.constant 5 : index
    %c0_56 = arith.constant 0 : index
    %324 = vector.load %arg12[%c0_55, %c5, %c0_56] : memref<2x12x32xf32, #tpu.memory_space<vmem>>, vector<2x1x16xf32>
    %325 = vector.shape_cast %324 : vector<2x1x16xf32> to vector<2x16xf32>
    %326 = vector.shape_cast %323 : vector<2x16xf32> to vector<2x1x16xf32>
    tpu.vector_store %arg12[%c0_55, %c5, %c0_56], %326 {strides = array<i32>} : memref<2x12x32xf32, #tpu.memory_space<vmem>>, vector<2x1x16xf32>,
    %327 = vector.broadcast %321 : vector<2x1xf32> to vector<2x16xf32>
    %328 = arith.mulf %312, %327 : vector<2x16xf32>
    %c0_57 = arith.constant 0 : index
    %c6 = arith.constant 6 : index
    %c16_58 = arith.constant 16 : index
    %329 = vector.load %arg12[%c0_57, %c6, %c16_58] : memref<2x12x32xf32, #tpu.memory_space<vmem>>, vector<2x1x16xf32>
    %330 = vector.shape_cast %329 : vector<2x1x16xf32> to vector<2x16xf32>
    %331 = vector.shape_cast %328 : vector<2x16xf32> to vector<2x1x16xf32>
    tpu.vector_store %arg12[%c0_57, %c6, %c16_58], %331 {strides = array<i32>} : memref<2x12x32xf32, #tpu.memory_space<vmem>>, vector<2x1x16xf32>,
    %cst_59 = arith.constant dense<0.000000e+00> : vector<2x96xf32>
    %332 = tpu.matmul %313, %8, %cst_59 {dimension_numbers = #tpu.dot_dimension_numbers<[1], [0], [0], [1], [0, 0, 1, 1], [], []>} : vector<2x32xf32>, vector<32x96xf32>, vector<2x96xf32> -> vector<2x96xf32>
    %333 = vector.broadcast %9 : vector<1x96xf32> to vector<2x96xf32>
    %334 = arith.addf %332, %333 : vector<2x96xf32>
    %335 = vector.extract_strided_slice %7 {offsets = [8, 0], sizes = [2, 48], strides = [1, 1]} : vector<16x96xf32> to vector<2x48xf32>
    %336 = vector.extract_strided_slice %334 {offsets = [0, 0], sizes = [2, 48], strides = [1, 1]} : vector<2x96xf32> to vector<2x48xf32>
    %337 = vector.extract_strided_slice %313 {offsets = [0, 0], sizes = [2, 16], strides = [1, 1]} : vector<2x32xf32> to vector<2x16xf32>
    %338 = vector.extract_strided_slice %335 {offsets = [0, 0], sizes = [2, 16], strides = [1, 1]} : vector<2x48xf32> to vector<2x16xf32>
    %339 = vector.extract_strided_slice %336 {offsets = [0, 0], sizes = [2, 16], strides = [1, 1]} : vector<2x48xf32> to vector<2x16xf32>
    %340 = arith.addf %338, %339 : vector<2x16xf32>
    %341 = arith.negf %340 : vector<2x16xf32>
    %342 = math.exp %341 : vector<2x16xf32>
    %cst_60 = arith.constant 1.000000e+00 : f32
    %343 = vector.broadcast %cst_60 : f32 to vector<2x16xf32>
    %344 = arith.addf %343, %342 : vector<2x16xf32>
    %345 = arith.divf %343, %344 : vector<2x16xf32>
    %346 = vector.extract_strided_slice %335 {offsets = [0, 16], sizes = [2, 16], strides = [1, 1]} : vector<2x48xf32> to vector<2x16xf32>
    %347 = vector.extract_strided_slice %336 {offsets = [0, 16], sizes = [2, 16], strides = [1, 1]} : vector<2x48xf32> to vector<2x16xf32>
    %348 = arith.addf %346, %347 : vector<2x16xf32>
    %349 = arith.negf %348 : vector<2x16xf32>
    %350 = math.exp %349 : vector<2x16xf32>
    %cst_61 = arith.constant 1.000000e+00 : f32
    %351 = vector.broadcast %cst_61 : f32 to vector<2x16xf32>
    %352 = arith.addf %351, %350 : vector<2x16xf32>
    %353 = arith.divf %351, %352 : vector<2x16xf32>
    %354 = vector.extract_strided_slice %335 {offsets = [0, 32], sizes = [2, 16], strides = [1, 1]} : vector<2x48xf32> to vector<2x16xf32>
    %355 = vector.extract_strided_slice %336 {offsets = [0, 32], sizes = [2, 16], strides = [1, 1]} : vector<2x48xf32> to vector<2x16xf32>
    %356 = arith.mulf %345, %355 : vector<2x16xf32>
    %357 = arith.addf %354, %356 : vector<2x16xf32>
    %358 = math.tanh %357 : vector<2x16xf32>
    %cst_62 = arith.constant 1.000000e+00 : f32
    %359 = vector.broadcast %cst_62 : f32 to vector<2x16xf32>
    %360 = arith.subf %359, %353 : vector<2x16xf32>
    %361 = arith.mulf %360, %358 : vector<2x16xf32>
    %362 = arith.mulf %353, %337 : vector<2x16xf32>
    %363 = arith.addf %361, %362 : vector<2x16xf32>
    %364 = vector.extract_strided_slice %7 {offsets = [6, 48], sizes = [2, 48], strides = [1, 1]} : vector<16x96xf32> to vector<2x48xf32>
    %365 = vector.extract_strided_slice %334 {offsets = [0, 48], sizes = [2, 48], strides = [1, 1]} : vector<2x96xf32> to vector<2x48xf32>
    %366 = vector.extract_strided_slice %313 {offsets = [0, 16], sizes = [2, 16], strides = [1, 1]} : vector<2x32xf32> to vector<2x16xf32>
    %367 = vector.extract_strided_slice %364 {offsets = [0, 0], sizes = [2, 16], strides = [1, 1]} : vector<2x48xf32> to vector<2x16xf32>
    %368 = vector.extract_strided_slice %365 {offsets = [0, 0], sizes = [2, 16], strides = [1, 1]} : vector<2x48xf32> to vector<2x16xf32>
    %369 = arith.addf %367, %368 : vector<2x16xf32>
    %370 = arith.negf %369 : vector<2x16xf32>
    %371 = math.exp %370 : vector<2x16xf32>
    %cst_63 = arith.constant 1.000000e+00 : f32
    %372 = vector.broadcast %cst_63 : f32 to vector<2x16xf32>
    %373 = arith.addf %372, %371 : vector<2x16xf32>
    %374 = arith.divf %372, %373 : vector<2x16xf32>
    %375 = vector.extract_strided_slice %364 {offsets = [0, 16], sizes = [2, 16], strides = [1, 1]} : vector<2x48xf32> to vector<2x16xf32>
    %376 = vector.extract_strided_slice %365 {offsets = [0, 16], sizes = [2, 16], strides = [1, 1]} : vector<2x48xf32> to vector<2x16xf32>
    %377 = arith.addf %375, %376 : vector<2x16xf32>
    %378 = arith.negf %377 : vector<2x16xf32>
    %379 = math.exp %378 : vector<2x16xf32>
    %cst_64 = arith.constant 1.000000e+00 : f32
    %380 = vector.broadcast %cst_64 : f32 to vector<2x16xf32>
    %381 = arith.addf %380, %379 : vector<2x16xf32>
    %382 = arith.divf %380, %381 : vector<2x16xf32>
    %383 = vector.extract_strided_slice %364 {offsets = [0, 32], sizes = [2, 16], strides = [1, 1]} : vector<2x48xf32> to vector<2x16xf32>
    %384 = vector.extract_strided_slice %365 {offsets = [0, 32], sizes = [2, 16], strides = [1, 1]} : vector<2x48xf32> to vector<2x16xf32>
    %385 = arith.mulf %374, %384 : vector<2x16xf32>
    %386 = arith.addf %383, %385 : vector<2x16xf32>
    %387 = math.tanh %386 : vector<2x16xf32>
    %cst_65 = arith.constant 1.000000e+00 : f32
    %388 = vector.broadcast %cst_65 : f32 to vector<2x16xf32>
    %389 = arith.subf %388, %382 : vector<2x16xf32>
    %390 = arith.mulf %389, %387 : vector<2x16xf32>
    %391 = arith.mulf %382, %366 : vector<2x16xf32>
    %392 = arith.addf %390, %391 : vector<2x16xf32>
    %393 = tpu.concatenate %363, %392 in 1 : vector<2x16xf32>, vector<2x16xf32> -> vector<2x32xf32>
    %c4_i32_66 = arith.constant 4 : i32
    %394 = vector.broadcast %c4_i32_66 : i32 to vector<2x1xi32>
    %395 = arith.cmpi sgt, %10, %394 : vector<2x1xi32>
    %396 = arith.extui %395 : vector<2x1xi1> to vector<2x1xi32>
    %397 = arith.sitofp %396 : vector<2x1xi32> to vector<2x1xf32>
    %c3_i32_67 = arith.constant 3 : i32
    %398 = vector.broadcast %c3_i32_67 : i32 to vector<2x1xi32>
    %399 = arith.cmpi sgt, %10, %398 : vector<2x1xi32>
    %400 = arith.extui %399 : vector<2x1xi1> to vector<2x1xi32>
    %401 = arith.sitofp %400 : vector<2x1xi32> to vector<2x1xf32>
    %402 = vector.broadcast %397 : vector<2x1xf32> to vector<2x16xf32>
    %403 = arith.mulf %363, %402 : vector<2x16xf32>
    %c0_68 = arith.constant 0 : index
    %c6_69 = arith.constant 6 : index
    %c0_70 = arith.constant 0 : index
    %404 = vector.load %arg12[%c0_68, %c6_69, %c0_70] : memref<2x12x32xf32, #tpu.memory_space<vmem>>, vector<2x1x16xf32>
    %405 = vector.shape_cast %404 : vector<2x1x16xf32> to vector<2x16xf32>
    %406 = vector.shape_cast %403 : vector<2x16xf32> to vector<2x1x16xf32>
    tpu.vector_store %arg12[%c0_68, %c6_69, %c0_70], %406 {strides = array<i32>} : memref<2x12x32xf32, #tpu.memory_space<vmem>>, vector<2x1x16xf32>,
    %407 = vector.broadcast %401 : vector<2x1xf32> to vector<2x16xf32>
    %408 = arith.mulf %392, %407 : vector<2x16xf32>
    %c0_71 = arith.constant 0 : index
    %c5_72 = arith.constant 5 : index
    %c16_73 = arith.constant 16 : index
    %409 = vector.load %arg12[%c0_71, %c5_72, %c16_73] : memref<2x12x32xf32, #tpu.memory_space<vmem>>, vector<2x1x16xf32>
    %410 = vector.shape_cast %409 : vector<2x1x16xf32> to vector<2x16xf32>
    %411 = vector.shape_cast %408 : vector<2x16xf32> to vector<2x1x16xf32>
    tpu.vector_store %arg12[%c0_71, %c5_72, %c16_73], %411 {strides = array<i32>} : memref<2x12x32xf32, #tpu.memory_space<vmem>>, vector<2x1x16xf32>,
    %cst_74 = arith.constant dense<0.000000e+00> : vector<2x96xf32>
    %412 = tpu.matmul %393, %8, %cst_74 {dimension_numbers = #tpu.dot_dimension_numbers<[1], [0], [0], [1], [0, 0, 1, 1], [], []>} : vector<2x32xf32>, vector<32x96xf32>, vector<2x96xf32> -> vector<2x96xf32>
    %413 = vector.broadcast %9 : vector<1x96xf32> to vector<2x96xf32>
    %414 = arith.addf %412, %413 : vector<2x96xf32>
    %415 = vector.extract_strided_slice %7 {offsets = [10, 0], sizes = [2, 48], strides = [1, 1]} : vector<16x96xf32> to vector<2x48xf32>
    %416 = vector.extract_strided_slice %414 {offsets = [0, 0], sizes = [2, 48], strides = [1, 1]} : vector<2x96xf32> to vector<2x48xf32>
    %417 = vector.extract_strided_slice %393 {offsets = [0, 0], sizes = [2, 16], strides = [1, 1]} : vector<2x32xf32> to vector<2x16xf32>
    %418 = vector.extract_strided_slice %415 {offsets = [0, 0], sizes = [2, 16], strides = [1, 1]} : vector<2x48xf32> to vector<2x16xf32>
    %419 = vector.extract_strided_slice %416 {offsets = [0, 0], sizes = [2, 16], strides = [1, 1]} : vector<2x48xf32> to vector<2x16xf32>
    %420 = arith.addf %418, %419 : vector<2x16xf32>
    %421 = arith.negf %420 : vector<2x16xf32>
    %422 = math.exp %421 : vector<2x16xf32>
    %cst_75 = arith.constant 1.000000e+00 : f32
    %423 = vector.broadcast %cst_75 : f32 to vector<2x16xf32>
    %424 = arith.addf %423, %422 : vector<2x16xf32>
    %425 = arith.divf %423, %424 : vector<2x16xf32>
    %426 = vector.extract_strided_slice %415 {offsets = [0, 16], sizes = [2, 16], strides = [1, 1]} : vector<2x48xf32> to vector<2x16xf32>
    %427 = vector.extract_strided_slice %416 {offsets = [0, 16], sizes = [2, 16], strides = [1, 1]} : vector<2x48xf32> to vector<2x16xf32>
    %428 = arith.addf %426, %427 : vector<2x16xf32>
    %429 = arith.negf %428 : vector<2x16xf32>
    %430 = math.exp %429 : vector<2x16xf32>
    %cst_76 = arith.constant 1.000000e+00 : f32
    %431 = vector.broadcast %cst_76 : f32 to vector<2x16xf32>
    %432 = arith.addf %431, %430 : vector<2x16xf32>
    %433 = arith.divf %431, %432 : vector<2x16xf32>
    %434 = vector.extract_strided_slice %415 {offsets = [0, 32], sizes = [2, 16], strides = [1, 1]} : vector<2x48xf32> to vector<2x16xf32>
    %435 = vector.extract_strided_slice %416 {offsets = [0, 32], sizes = [2, 16], strides = [1, 1]} : vector<2x48xf32> to vector<2x16xf32>
    %436 = arith.mulf %425, %435 : vector<2x16xf32>
    %437 = arith.addf %434, %436 : vector<2x16xf32>
    %438 = math.tanh %437 : vector<2x16xf32>
    %cst_77 = arith.constant 1.000000e+00 : f32
    %439 = vector.broadcast %cst_77 : f32 to vector<2x16xf32>
    %440 = arith.subf %439, %433 : vector<2x16xf32>
    %441 = arith.mulf %440, %438 : vector<2x16xf32>
    %442 = arith.mulf %433, %417 : vector<2x16xf32>
    %443 = arith.addf %441, %442 : vector<2x16xf32>
    %444 = vector.extract_strided_slice %7 {offsets = [4, 48], sizes = [2, 48], strides = [1, 1]} : vector<16x96xf32> to vector<2x48xf32>
    %445 = vector.extract_strided_slice %414 {offsets = [0, 48], sizes = [2, 48], strides = [1, 1]} : vector<2x96xf32> to vector<2x48xf32>
    %446 = vector.extract_strided_slice %393 {offsets = [0, 16], sizes = [2, 16], strides = [1, 1]} : vector<2x32xf32> to vector<2x16xf32>
    %447 = vector.extract_strided_slice %444 {offsets = [0, 0], sizes = [2, 16], strides = [1, 1]} : vector<2x48xf32> to vector<2x16xf32>
    %448 = vector.extract_strided_slice %445 {offsets = [0, 0], sizes = [2, 16], strides = [1, 1]} : vector<2x48xf32> to vector<2x16xf32>
    %449 = arith.addf %447, %448 : vector<2x16xf32>
    %450 = arith.negf %449 : vector<2x16xf32>
    %451 = math.exp %450 : vector<2x16xf32>
    %cst_78 = arith.constant 1.000000e+00 : f32
    %452 = vector.broadcast %cst_78 : f32 to vector<2x16xf32>
    %453 = arith.addf %452, %451 : vector<2x16xf32>
    %454 = arith.divf %452, %453 : vector<2x16xf32>
    %455 = vector.extract_strided_slice %444 {offsets = [0, 16], sizes = [2, 16], strides = [1, 1]} : vector<2x48xf32> to vector<2x16xf32>
    %456 = vector.extract_strided_slice %445 {offsets = [0, 16], sizes = [2, 16], strides = [1, 1]} : vector<2x48xf32> to vector<2x16xf32>
    %457 = arith.addf %455, %456 : vector<2x16xf32>
    %458 = arith.negf %457 : vector<2x16xf32>
    %459 = math.exp %458 : vector<2x16xf32>
    %cst_79 = arith.constant 1.000000e+00 : f32
    %460 = vector.broadcast %cst_79 : f32 to vector<2x16xf32>
    %461 = arith.addf %460, %459 : vector<2x16xf32>
    %462 = arith.divf %460, %461 : vector<2x16xf32>
    %463 = vector.extract_strided_slice %444 {offsets = [0, 32], sizes = [2, 16], strides = [1, 1]} : vector<2x48xf32> to vector<2x16xf32>
    %464 = vector.extract_strided_slice %445 {offsets = [0, 32], sizes = [2, 16], strides = [1, 1]} : vector<2x48xf32> to vector<2x16xf32>
    %465 = arith.mulf %454, %464 : vector<2x16xf32>
    %466 = arith.addf %463, %465 : vector<2x16xf32>
    %467 = math.tanh %466 : vector<2x16xf32>
    %cst_80 = arith.constant 1.000000e+00 : f32
    %468 = vector.broadcast %cst_80 : f32 to vector<2x16xf32>
    %469 = arith.subf %468, %462 : vector<2x16xf32>
    %470 = arith.mulf %469, %467 : vector<2x16xf32>
    %471 = arith.mulf %462, %446 : vector<2x16xf32>
    %472 = arith.addf %470, %471 : vector<2x16xf32>
    %473 = tpu.concatenate %443, %472 in 1 : vector<2x16xf32>, vector<2x16xf32> -> vector<2x32xf32>
    %c5_i32_81 = arith.constant 5 : i32
    %474 = vector.broadcast %c5_i32_81 : i32 to vector<2x1xi32>
    %475 = arith.cmpi sgt, %10, %474 : vector<2x1xi32>
    %476 = arith.extui %475 : vector<2x1xi1> to vector<2x1xi32>
    %477 = arith.sitofp %476 : vector<2x1xi32> to vector<2x1xf32>
    %c2_i32_82 = arith.constant 2 : i32
    %478 = vector.broadcast %c2_i32_82 : i32 to vector<2x1xi32>
    %479 = arith.cmpi sgt, %10, %478 : vector<2x1xi32>
    %480 = arith.extui %479 : vector<2x1xi1> to vector<2x1xi32>
    %481 = arith.sitofp %480 : vector<2x1xi32> to vector<2x1xf32>
    %482 = vector.broadcast %477 : vector<2x1xf32> to vector<2x16xf32>
    %483 = arith.mulf %443, %482 : vector<2x16xf32>
    %c0_83 = arith.constant 0 : index
    %c7_84 = arith.constant 7 : index
    %c0_85 = arith.constant 0 : index
    %484 = vector.load %arg12[%c0_83, %c7_84, %c0_85] : memref<2x12x32xf32, #tpu.memory_space<vmem>>, vector<2x1x16xf32>
    %485 = vector.shape_cast %484 : vector<2x1x16xf32> to vector<2x16xf32>
    %486 = vector.shape_cast %483 : vector<2x16xf32> to vector<2x1x16xf32>
    tpu.vector_store %arg12[%c0_83, %c7_84, %c0_85], %486 {strides = array<i32>} : memref<2x12x32xf32, #tpu.memory_space<vmem>>, vector<2x1x16xf32>,
    %487 = vector.broadcast %481 : vector<2x1xf32> to vector<2x16xf32>
    %488 = arith.mulf %472, %487 : vector<2x16xf32>
    %c0_86 = arith.constant 0 : index
    %c4_87 = arith.constant 4 : index
    %c16_88 = arith.constant 16 : index
    %489 = vector.load %arg12[%c0_86, %c4_87, %c16_88] : memref<2x12x32xf32, #tpu.memory_space<vmem>>, vector<2x1x16xf32>
    %490 = vector.shape_cast %489 : vector<2x1x16xf32> to vector<2x16xf32>
    %491 = vector.shape_cast %488 : vector<2x16xf32> to vector<2x1x16xf32>
    tpu.vector_store %arg12[%c0_86, %c4_87, %c16_88], %491 {strides = array<i32>} : memref<2x12x32xf32, #tpu.memory_space<vmem>>, vector<2x1x16xf32>,
    %cst_89 = arith.constant dense<0.000000e+00> : vector<2x96xf32>
    %492 = tpu.matmul %473, %8, %cst_89 {dimension_numbers = #tpu.dot_dimension_numbers<[1], [0], [0], [1], [0, 0, 1, 1], [], []>} : vector<2x32xf32>, vector<32x96xf32>, vector<2x96xf32> -> vector<2x96xf32>
    %493 = vector.broadcast %9 : vector<1x96xf32> to vector<2x96xf32>
    %494 = arith.addf %492, %493 : vector<2x96xf32>
    %495 = vector.extract_strided_slice %7 {offsets = [12, 0], sizes = [2, 48], strides = [1, 1]} : vector<16x96xf32> to vector<2x48xf32>
    %496 = vector.extract_strided_slice %494 {offsets = [0, 0], sizes = [2, 48], strides = [1, 1]} : vector<2x96xf32> to vector<2x48xf32>
    %497 = vector.extract_strided_slice %473 {offsets = [0, 0], sizes = [2, 16], strides = [1, 1]} : vector<2x32xf32> to vector<2x16xf32>
    %498 = vector.extract_strided_slice %495 {offsets = [0, 0], sizes = [2, 16], strides = [1, 1]} : vector<2x48xf32> to vector<2x16xf32>
    %499 = vector.extract_strided_slice %496 {offsets = [0, 0], sizes = [2, 16], strides = [1, 1]} : vector<2x48xf32> to vector<2x16xf32>
    %500 = arith.addf %498, %499 : vector<2x16xf32>
    %501 = arith.negf %500 : vector<2x16xf32>
    %502 = math.exp %501 : vector<2x16xf32>
    %cst_90 = arith.constant 1.000000e+00 : f32
    %503 = vector.broadcast %cst_90 : f32 to vector<2x16xf32>
    %504 = arith.addf %503, %502 : vector<2x16xf32>
    %505 = arith.divf %503, %504 : vector<2x16xf32>
    %506 = vector.extract_strided_slice %495 {offsets = [0, 16], sizes = [2, 16], strides = [1, 1]} : vector<2x48xf32> to vector<2x16xf32>
    %507 = vector.extract_strided_slice %496 {offsets = [0, 16], sizes = [2, 16], strides = [1, 1]} : vector<2x48xf32> to vector<2x16xf32>
    %508 = arith.addf %506, %507 : vector<2x16xf32>
    %509 = arith.negf %508 : vector<2x16xf32>
    %510 = math.exp %509 : vector<2x16xf32>
    %cst_91 = arith.constant 1.000000e+00 : f32
    %511 = vector.broadcast %cst_91 : f32 to vector<2x16xf32>
    %512 = arith.addf %511, %510 : vector<2x16xf32>
    %513 = arith.divf %511, %512 : vector<2x16xf32>
    %514 = vector.extract_strided_slice %495 {offsets = [0, 32], sizes = [2, 16], strides = [1, 1]} : vector<2x48xf32> to vector<2x16xf32>
    %515 = vector.extract_strided_slice %496 {offsets = [0, 32], sizes = [2, 16], strides = [1, 1]} : vector<2x48xf32> to vector<2x16xf32>
    %516 = arith.mulf %505, %515 : vector<2x16xf32>
    %517 = arith.addf %514, %516 : vector<2x16xf32>
    %518 = math.tanh %517 : vector<2x16xf32>
    %cst_92 = arith.constant 1.000000e+00 : f32
    %519 = vector.broadcast %cst_92 : f32 to vector<2x16xf32>
    %520 = arith.subf %519, %513 : vector<2x16xf32>
    %521 = arith.mulf %520, %518 : vector<2x16xf32>
    %522 = arith.mulf %513, %497 : vector<2x16xf32>
    %523 = arith.addf %521, %522 : vector<2x16xf32>
    %524 = vector.extract_strided_slice %7 {offsets = [2, 48], sizes = [2, 48], strides = [1, 1]} : vector<16x96xf32> to vector<2x48xf32>
    %525 = vector.extract_strided_slice %494 {offsets = [0, 48], sizes = [2, 48], strides = [1, 1]} : vector<2x96xf32> to vector<2x48xf32>
    %526 = vector.extract_strided_slice %473 {offsets = [0, 16], sizes = [2, 16], strides = [1, 1]} : vector<2x32xf32> to vector<2x16xf32>
    %527 = vector.extract_strided_slice %524 {offsets = [0, 0], sizes = [2, 16], strides = [1, 1]} : vector<2x48xf32> to vector<2x16xf32>
    %528 = vector.extract_strided_slice %525 {offsets = [0, 0], sizes = [2, 16], strides = [1, 1]} : vector<2x48xf32> to vector<2x16xf32>
    %529 = arith.addf %527, %528 : vector<2x16xf32>
    %530 = arith.negf %529 : vector<2x16xf32>
    %531 = math.exp %530 : vector<2x16xf32>
    %cst_93 = arith.constant 1.000000e+00 : f32
    %532 = vector.broadcast %cst_93 : f32 to vector<2x16xf32>
    %533 = arith.addf %532, %531 : vector<2x16xf32>
    %534 = arith.divf %532, %533 : vector<2x16xf32>
    %535 = vector.extract_strided_slice %524 {offsets = [0, 16], sizes = [2, 16], strides = [1, 1]} : vector<2x48xf32> to vector<2x16xf32>
    %536 = vector.extract_strided_slice %525 {offsets = [0, 16], sizes = [2, 16], strides = [1, 1]} : vector<2x48xf32> to vector<2x16xf32>
    %537 = arith.addf %535, %536 : vector<2x16xf32>
    %538 = arith.negf %537 : vector<2x16xf32>
    %539 = math.exp %538 : vector<2x16xf32>
    %cst_94 = arith.constant 1.000000e+00 : f32
    %540 = vector.broadcast %cst_94 : f32 to vector<2x16xf32>
    %541 = arith.addf %540, %539 : vector<2x16xf32>
    %542 = arith.divf %540, %541 : vector<2x16xf32>
    %543 = vector.extract_strided_slice %524 {offsets = [0, 32], sizes = [2, 16], strides = [1, 1]} : vector<2x48xf32> to vector<2x16xf32>
    %544 = vector.extract_strided_slice %525 {offsets = [0, 32], sizes = [2, 16], strides = [1, 1]} : vector<2x48xf32> to vector<2x16xf32>
    %545 = arith.mulf %534, %544 : vector<2x16xf32>
    %546 = arith.addf %543, %545 : vector<2x16xf32>
    %547 = math.tanh %546 : vector<2x16xf32>
    %cst_95 = arith.constant 1.000000e+00 : f32
    %548 = vector.broadcast %cst_95 : f32 to vector<2x16xf32>
    %549 = arith.subf %548, %542 : vector<2x16xf32>
    %550 = arith.mulf %549, %547 : vector<2x16xf32>
    %551 = arith.mulf %542, %526 : vector<2x16xf32>
    %552 = arith.addf %550, %551 : vector<2x16xf32>
    %553 = tpu.concatenate %523, %552 in 1 : vector<2x16xf32>, vector<2x16xf32> -> vector<2x32xf32>
    %c6_i32_96 = arith.constant 6 : i32
    %554 = vector.broadcast %c6_i32_96 : i32 to vector<2x1xi32>
    %555 = arith.cmpi sgt, %10, %554 : vector<2x1xi32>
    %556 = arith.extui %555 : vector<2x1xi1> to vector<2x1xi32>
    %557 = arith.sitofp %556 : vector<2x1xi32> to vector<2x1xf32>
    %c1_i32_97 = arith.constant 1 : i32
    %558 = vector.broadcast %c1_i32_97 : i32 to vector<2x1xi32>
    %559 = arith.cmpi sgt, %10, %558 : vector<2x1xi32>
    %560 = arith.extui %559 : vector<2x1xi1> to vector<2x1xi32>
    %561 = arith.sitofp %560 : vector<2x1xi32> to vector<2x1xf32>
    %562 = vector.broadcast %557 : vector<2x1xf32> to vector<2x16xf32>
    %563 = arith.mulf %523, %562 : vector<2x16xf32>
    %c0_98 = arith.constant 0 : index
    %c8_99 = arith.constant 8 : index
    %c0_100 = arith.constant 0 : index
    %564 = vector.load %arg12[%c0_98, %c8_99, %c0_100] : memref<2x12x32xf32, #tpu.memory_space<vmem>>, vector<2x1x16xf32>
    %565 = vector.shape_cast %564 : vector<2x1x16xf32> to vector<2x16xf32>
    %566 = vector.shape_cast %563 : vector<2x16xf32> to vector<2x1x16xf32>
    tpu.vector_store %arg12[%c0_98, %c8_99, %c0_100], %566 {strides = array<i32>} : memref<2x12x32xf32, #tpu.memory_space<vmem>>, vector<2x1x16xf32>,
    %567 = vector.broadcast %561 : vector<2x1xf32> to vector<2x16xf32>
    %568 = arith.mulf %552, %567 : vector<2x16xf32>
    %c0_101 = arith.constant 0 : index
    %c3_102 = arith.constant 3 : index
    %c16_103 = arith.constant 16 : index
    %569 = vector.load %arg12[%c0_101, %c3_102, %c16_103] : memref<2x12x32xf32, #tpu.memory_space<vmem>>, vector<2x1x16xf32>
    %570 = vector.shape_cast %569 : vector<2x1x16xf32> to vector<2x16xf32>
    %571 = vector.shape_cast %568 : vector<2x16xf32> to vector<2x1x16xf32>
    tpu.vector_store %arg12[%c0_101, %c3_102, %c16_103], %571 {strides = array<i32>} : memref<2x12x32xf32, #tpu.memory_space<vmem>>, vector<2x1x16xf32>,
    %cst_104 = arith.constant dense<0.000000e+00> : vector<2x96xf32>
    %572 = tpu.matmul %553, %8, %cst_104 {dimension_numbers = #tpu.dot_dimension_numbers<[1], [0], [0], [1], [0, 0, 1, 1], [], []>} : vector<2x32xf32>, vector<32x96xf32>, vector<2x96xf32> -> vector<2x96xf32>
    %573 = vector.broadcast %9 : vector<1x96xf32> to vector<2x96xf32>
    %574 = arith.addf %572, %573 : vector<2x96xf32>
    %575 = vector.extract_strided_slice %7 {offsets = [14, 0], sizes = [2, 48], strides = [1, 1]} : vector<16x96xf32> to vector<2x48xf32>
    %576 = vector.extract_strided_slice %574 {offsets = [0, 0], sizes = [2, 48], strides = [1, 1]} : vector<2x96xf32> to vector<2x48xf32>
    %577 = vector.extract_strided_slice %553 {offsets = [0, 0], sizes = [2, 16], strides = [1, 1]} : vector<2x32xf32> to vector<2x16xf32>
    %578 = vector.extract_strided_slice %575 {offsets = [0, 0], sizes = [2, 16], strides = [1, 1]} : vector<2x48xf32> to vector<2x16xf32>
    %579 = vector.extract_strided_slice %576 {offsets = [0, 0], sizes = [2, 16], strides = [1, 1]} : vector<2x48xf32> to vector<2x16xf32>
    %580 = arith.addf %578, %579 : vector<2x16xf32>
    %581 = arith.negf %580 : vector<2x16xf32>
    %582 = math.exp %581 : vector<2x16xf32>
    %cst_105 = arith.constant 1.000000e+00 : f32
    %583 = vector.broadcast %cst_105 : f32 to vector<2x16xf32>
    %584 = arith.addf %583, %582 : vector<2x16xf32>
    %585 = arith.divf %583, %584 : vector<2x16xf32>
    %586 = vector.extract_strided_slice %575 {offsets = [0, 16], sizes = [2, 16], strides = [1, 1]} : vector<2x48xf32> to vector<2x16xf32>
    %587 = vector.extract_strided_slice %576 {offsets = [0, 16], sizes = [2, 16], strides = [1, 1]} : vector<2x48xf32> to vector<2x16xf32>
    %588 = arith.addf %586, %587 : vector<2x16xf32>
    %589 = arith.negf %588 : vector<2x16xf32>
    %590 = math.exp %589 : vector<2x16xf32>
    %cst_106 = arith.constant 1.000000e+00 : f32
    %591 = vector.broadcast %cst_106 : f32 to vector<2x16xf32>
    %592 = arith.addf %591, %590 : vector<2x16xf32>
    %593 = arith.divf %591, %592 : vector<2x16xf32>
    %594 = vector.extract_strided_slice %575 {offsets = [0, 32], sizes = [2, 16], strides = [1, 1]} : vector<2x48xf32> to vector<2x16xf32>
    %595 = vector.extract_strided_slice %576 {offsets = [0, 32], sizes = [2, 16], strides = [1, 1]} : vector<2x48xf32> to vector<2x16xf32>
    %596 = arith.mulf %585, %595 : vector<2x16xf32>
    %597 = arith.addf %594, %596 : vector<2x16xf32>
    %598 = math.tanh %597 : vector<2x16xf32>
    %cst_107 = arith.constant 1.000000e+00 : f32
    %599 = vector.broadcast %cst_107 : f32 to vector<2x16xf32>
    %600 = arith.subf %599, %593 : vector<2x16xf32>
    %601 = arith.mulf %600, %598 : vector<2x16xf32>
    %602 = arith.mulf %593, %577 : vector<2x16xf32>
    %603 = arith.addf %601, %602 : vector<2x16xf32>
    %604 = vector.extract_strided_slice %7 {offsets = [0, 48], sizes = [2, 48], strides = [1, 1]} : vector<16x96xf32> to vector<2x48xf32>
    %605 = vector.extract_strided_slice %574 {offsets = [0, 48], sizes = [2, 48], strides = [1, 1]} : vector<2x96xf32> to vector<2x48xf32>
    %606 = vector.extract_strided_slice %553 {offsets = [0, 16], sizes = [2, 16], strides = [1, 1]} : vector<2x32xf32> to vector<2x16xf32>
    %607 = vector.extract_strided_slice %604 {offsets = [0, 0], sizes = [2, 16], strides = [1, 1]} : vector<2x48xf32> to vector<2x16xf32>
    %608 = vector.extract_strided_slice %605 {offsets = [0, 0], sizes = [2, 16], strides = [1, 1]} : vector<2x48xf32> to vector<2x16xf32>
    %609 = arith.addf %607, %608 : vector<2x16xf32>
    %610 = arith.negf %609 : vector<2x16xf32>
    %611 = math.exp %610 : vector<2x16xf32>
    %cst_108 = arith.constant 1.000000e+00 : f32
    %612 = vector.broadcast %cst_108 : f32 to vector<2x16xf32>
    %613 = arith.addf %612, %611 : vector<2x16xf32>
    %614 = arith.divf %612, %613 : vector<2x16xf32>
    %615 = vector.extract_strided_slice %604 {offsets = [0, 16], sizes = [2, 16], strides = [1, 1]} : vector<2x48xf32> to vector<2x16xf32>
    %616 = vector.extract_strided_slice %605 {offsets = [0, 16], sizes = [2, 16], strides = [1, 1]} : vector<2x48xf32> to vector<2x16xf32>
    %617 = arith.addf %615, %616 : vector<2x16xf32>
    %618 = arith.negf %617 : vector<2x16xf32>
    %619 = math.exp %618 : vector<2x16xf32>
    %cst_109 = arith.constant 1.000000e+00 : f32
    %620 = vector.broadcast %cst_109 : f32 to vector<2x16xf32>
    %621 = arith.addf %620, %619 : vector<2x16xf32>
    %622 = arith.divf %620, %621 : vector<2x16xf32>
    %623 = vector.extract_strided_slice %604 {offsets = [0, 32], sizes = [2, 16], strides = [1, 1]} : vector<2x48xf32> to vector<2x16xf32>
    %624 = vector.extract_strided_slice %605 {offsets = [0, 32], sizes = [2, 16], strides = [1, 1]} : vector<2x48xf32> to vector<2x16xf32>
    %625 = arith.mulf %614, %624 : vector<2x16xf32>
    %626 = arith.addf %623, %625 : vector<2x16xf32>
    %627 = math.tanh %626 : vector<2x16xf32>
    %cst_110 = arith.constant 1.000000e+00 : f32
    %628 = vector.broadcast %cst_110 : f32 to vector<2x16xf32>
    %629 = arith.subf %628, %622 : vector<2x16xf32>
    %630 = arith.mulf %629, %627 : vector<2x16xf32>
    %631 = arith.mulf %622, %606 : vector<2x16xf32>
    %632 = arith.addf %630, %631 : vector<2x16xf32>
    %c7_i32_111 = arith.constant 7 : i32
    %633 = vector.broadcast %c7_i32_111 : i32 to vector<2x1xi32>
    %634 = arith.cmpi sgt, %10, %633 : vector<2x1xi32>
    %635 = arith.extui %634 : vector<2x1xi1> to vector<2x1xi32>
    %636 = arith.sitofp %635 : vector<2x1xi32> to vector<2x1xf32>
    %c0_i32_112 = arith.constant 0 : i32
    %637 = vector.broadcast %c0_i32_112 : i32 to vector<2x1xi32>
    %638 = arith.cmpi sgt, %10, %637 : vector<2x1xi32>
    %639 = arith.extui %638 : vector<2x1xi1> to vector<2x1xi32>
    %640 = arith.sitofp %639 : vector<2x1xi32> to vector<2x1xf32>
    %641 = vector.broadcast %636 : vector<2x1xf32> to vector<2x16xf32>
    %642 = arith.mulf %603, %641 : vector<2x16xf32>
    %c0_113 = arith.constant 0 : index
    %c9_114 = arith.constant 9 : index
    %c0_115 = arith.constant 0 : index
    %643 = vector.load %arg12[%c0_113, %c9_114, %c0_115] : memref<2x12x32xf32, #tpu.memory_space<vmem>>, vector<2x1x16xf32>
    %644 = vector.shape_cast %643 : vector<2x1x16xf32> to vector<2x16xf32>
    %645 = vector.shape_cast %642 : vector<2x16xf32> to vector<2x1x16xf32>
    tpu.vector_store %arg12[%c0_113, %c9_114, %c0_115], %645 {strides = array<i32>} : memref<2x12x32xf32, #tpu.memory_space<vmem>>, vector<2x1x16xf32>,
    %646 = vector.broadcast %640 : vector<2x1xf32> to vector<2x16xf32>
    %647 = arith.mulf %632, %646 : vector<2x16xf32>
    %c0_116 = arith.constant 0 : index
    %c2_117 = arith.constant 2 : index
    %c16_118 = arith.constant 16 : index
    %648 = vector.load %arg12[%c0_116, %c2_117, %c16_118] : memref<2x12x32xf32, #tpu.memory_space<vmem>>, vector<2x1x16xf32>
    %649 = vector.shape_cast %648 : vector<2x1x16xf32> to vector<2x16xf32>
    %650 = vector.shape_cast %647 : vector<2x16xf32> to vector<2x1x16xf32>
    tpu.vector_store %arg12[%c0_116, %c2_117, %c16_118], %650 {strides = array<i32>} : memref<2x12x32xf32, #tpu.memory_space<vmem>>, vector<2x1x16xf32>,
    %c0_119 = arith.constant 0 : index
    %c1 = arith.constant 1 : index
    %c0_120 = arith.constant 0 : index
    %651 = vector.load %arg12[%c0_119, %c1, %c0_120] : memref<2x12x32xf32, #tpu.memory_space<vmem>>, vector<2x9x32xf32>
    %c0_121 = arith.constant 0 : index
    %c2_122 = arith.constant 2 : index
    %c0_123 = arith.constant 0 : index
    %652 = vector.load %arg12[%c0_121, %c2_122, %c0_123] : memref<2x12x32xf32, #tpu.memory_space<vmem>>, vector<2x9x32xf32>
    %653 = tpu.concatenate %651, %652 in 2 : vector<2x9x32xf32>, vector<2x9x32xf32> -> vector<2x9x64xf32>
    %c0_124 = arith.constant 0 : index
    %c0_125 = arith.constant 0 : index
    %654 = vector.load %arg6[%c0_124, %c0_125] : memref<64x8xf32, #tpu.memory_space<vmem>>, vector<64x8xf32>
    "tpu.trace_start"() <{level = 10 : i32, message = "blf,fo->blo"}> : () -> ()
    %cst_126 = arith.constant dense<0.000000e+00> : vector<2x9x8xf32>
    %655 = tpu.matmul %653, %654, %cst_126 {dimension_numbers = #tpu.dot_dimension_numbers<[2], [0], [0, 1], [1], [0, 0, 0, 1, 1, 1], [], []>} : vector<2x9x64xf32>, vector<64x8xf32>, vector<2x9x8xf32> -> vector<2x9x8xf32>
    "tpu.trace_stop"() : () -> ()
    %c0_127 = arith.constant 0 : index
    %c0_128 = arith.constant 0 : index
    %c0_129 = arith.constant 0 : index
    %656 = vector.load %arg7[%c0_127, %c0_128, %c0_129] : memref<1x1x8xf32, #tpu.memory_space<vmem>>, vector<1x1x8xf32>
    %657 = vector.broadcast %656 : vector<1x1x8xf32> to vector<2x9x8xf32>
    %658 = arith.addf %655, %657 : vector<2x9x8xf32>
    %cst_130 = arith.constant 0.000000e+00 : f32
    %659 = vector.broadcast %cst_130 : f32 to vector<2x9x8xf32>
    %660 = arith.maximumf %658, %659 : vector<2x9x8xf32>
    %661 = tpu.iota {dimensions = array<i32: 1>} : vector<2x9x8xi32>
    %cst_131 = arith.constant dense<0xFF800000> : vector<2x8xf32>
    %662 = vector.multi_reduction <maximumf>, %660, %cst_131 [1] : vector<2x9x8xf32> to vector<2x8xf32>
    %663 = vector.shape_cast %662 : vector<2x8xf32> to vector<2x1x8xf32>
    %664 = vector.broadcast %663 : vector<2x1x8xf32> to vector<2x9x8xf32>
    %665 = arith.cmpf oeq, %660, %664 : vector<2x9x8xf32>
    %c9_i32 = arith.constant 9 : i32
    %666 = vector.broadcast %c9_i32 : i32 to vector<2x9x8xi32>
    %667 = arith.select %665, %661, %666 : vector<2x9x8xi1>, vector<2x9x8xi32>
    %cst_132 = arith.constant dense<2147483647> : vector<2x8xi32>
    %668 = vector.multi_reduction <minsi>, %667, %cst_132 [1] : vector<2x9x8xi32> to vector<2x8xi32>
    %669 = vector.shape_cast %668 : vector<2x8xi32> to vector<2x1x8xi32>
    %670 = vector.broadcast %669 : vector<2x1x8xi32> to vector<2x9x8xi32>
    %671 = arith.cmpi eq, %661, %670 : vector<2x9x8xi32>
    %cst_133 = arith.constant 0xFF800000 : f32
    %672 = vector.broadcast %cst_133 : f32 to vector<2x9x8xf32>
    %673 = arith.select %671, %672, %660 : vector<2x9x8xi1>, vector<2x9x8xf32>
    %cst_134 = arith.constant dense<0xFF800000> : vector<2x8xf32>
    %674 = vector.multi_reduction <maximumf>, %673, %cst_134 [1] : vector<2x9x8xf32> to vector<2x8xf32>
    %c0_135 = arith.constant 0 : index
    %c0_136 = arith.constant 0 : index
    %c0_137 = arith.constant 0 : index
    %675 = vector.load %arg12[%c0_135, %c0_136, %c0_137] : memref<2x12x32xf32, #tpu.memory_space<vmem>>, vector<2x10x32xf32>
    %c0_138 = arith.constant 0 : index
    %c1_139 = arith.constant 1 : index
    %c0_140 = arith.constant 0 : index
    %676 = vector.load %arg12[%c0_138, %c1_139, %c0_140] : memref<2x12x32xf32, #tpu.memory_space<vmem>>, vector<2x10x32xf32>
    %c0_141 = arith.constant 0 : index
    %c2_142 = arith.constant 2 : index
    %c0_143 = arith.constant 0 : index
    %677 = vector.load %arg12[%c0_141, %c2_142, %c0_143] : memref<2x12x32xf32, #tpu.memory_space<vmem>>, vector<2x10x32xf32>
    %678 = tpu.concatenate %675, %676, %677 in 2 : vector<2x10x32xf32>, vector<2x10x32xf32>, vector<2x10x32xf32> -> vector<2x10x96xf32>
    %c0_144 = arith.constant 0 : index
    %c0_145 = arith.constant 0 : index
    %679 = vector.load %arg8[%c0_144, %c0_145] : memref<96x8xf32, #tpu.memory_space<vmem>>, vector<96x8xf32>
    "tpu.trace_start"() <{level = 10 : i32, message = "blf,fo->blo"}> : () -> ()
    %cst_146 = arith.constant dense<0.000000e+00> : vector<2x10x8xf32>
    %680 = tpu.matmul %678, %679, %cst_146 {dimension_numbers = #tpu.dot_dimension_numbers<[2], [0], [0, 1], [1], [0, 0, 0, 1, 1, 1], [], []>} : vector<2x10x96xf32>, vector<96x8xf32>, vector<2x10x8xf32> -> vector<2x10x8xf32>
    "tpu.trace_stop"() : () -> ()
    %c0_147 = arith.constant 0 : index
    %c0_148 = arith.constant 0 : index
    %c0_149 = arith.constant 0 : index
    %681 = vector.load %arg9[%c0_147, %c0_148, %c0_149] : memref<1x1x8xf32, #tpu.memory_space<vmem>>, vector<1x1x8xf32>
    %682 = vector.broadcast %681 : vector<1x1x8xf32> to vector<2x10x8xf32>
    %683 = arith.addf %680, %682 : vector<2x10x8xf32>
    %cst_150 = arith.constant 0.000000e+00 : f32
    %684 = vector.broadcast %cst_150 : f32 to vector<2x10x8xf32>
    %685 = arith.maximumf %683, %684 : vector<2x10x8xf32>
    %686 = tpu.iota {dimensions = array<i32: 1>} : vector<2x10x8xi32>
    %cst_151 = arith.constant dense<0xFF800000> : vector<2x8xf32>
    %687 = vector.multi_reduction <maximumf>, %685, %cst_151 [1] : vector<2x10x8xf32> to vector<2x8xf32>
    %688 = vector.shape_cast %687 : vector<2x8xf32> to vector<2x1x8xf32>
    %689 = vector.broadcast %688 : vector<2x1x8xf32> to vector<2x10x8xf32>
    %690 = arith.cmpf oeq, %685, %689 : vector<2x10x8xf32>
    %c10_i32 = arith.constant 10 : i32
    %691 = vector.broadcast %c10_i32 : i32 to vector<2x10x8xi32>
    %692 = arith.select %690, %686, %691 : vector<2x10x8xi1>, vector<2x10x8xi32>
    %cst_152 = arith.constant dense<2147483647> : vector<2x8xi32>
    %693 = vector.multi_reduction <minsi>, %692, %cst_152 [1] : vector<2x10x8xi32> to vector<2x8xi32>
    %694 = vector.shape_cast %693 : vector<2x8xi32> to vector<2x1x8xi32>
    %695 = vector.broadcast %694 : vector<2x1x8xi32> to vector<2x10x8xi32>
    %696 = arith.cmpi eq, %686, %695 : vector<2x10x8xi32>
    %cst_153 = arith.constant 0xFF800000 : f32
    %697 = vector.broadcast %cst_153 : f32 to vector<2x10x8xf32>
    %698 = arith.select %696, %697, %685 : vector<2x10x8xi1>, vector<2x10x8xf32>
    %cst_154 = arith.constant dense<0xFF800000> : vector<2x8xf32>
    %699 = vector.multi_reduction <maximumf>, %698, %cst_154 [1] : vector<2x10x8xf32> to vector<2x8xf32>
    %700 = tpu.concatenate %662, %674, %687, %699 in 1 : vector<2x8xf32>, vector<2x8xf32>, vector<2x8xf32>, vector<2x8xf32> -> vector<2x32xf32>
    %c0_155 = arith.constant 0 : index
    %c0_156 = arith.constant 0 : index
    %701 = vector.load %arg10[%c0_155, %c0_156] : memref<32x32xf32, #tpu.memory_space<vmem>>, vector<32x32xf32>
    %cst_157 = arith.constant dense<0.000000e+00> : vector<2x32xf32>
    %702 = tpu.matmul %700, %701, %cst_157 {dimension_numbers = #tpu.dot_dimension_numbers<[1], [0], [0], [1], [0, 0, 1, 1], [], []>} : vector<2x32xf32>, vector<32x32xf32>, vector<2x32xf32> -> vector<2x32xf32>
    %c0_158 = arith.constant 0 : index
    %c0_159 = arith.constant 0 : index
    %703 = vector.load %arg11[%c0_158, %c0_159] : memref<2x32xf32, #tpu.memory_space<vmem>>, vector<2x32xf32>
    tpu.vector_store %arg11[%c0_158, %c0_159], %702 {strides = array<i32>} : memref<2x32xf32, #tpu.memory_space<vmem>>, vector<2x32xf32>,
    return
  }
}

</mosaic_0001>

<bundles_post_ra>
// kernel: tpu_custom_call.1
= control target key start
LH: loop header
LB: loop body
LE: loop exit
PB: predicated region body
PF: predicated region fallthrough
CT: control target
= control target key end

     0   :  { %vm56_vm0 = vcmask 130048   ;;  %v5953_v6 = vmov 0.0|0.0   ;;  %vm4572_vm1 = vmmov 0   ;;  %v4573_v8 = vmov 0.0   ;;  %s5941_s0 = inlined_call_operand.vmem [shape: f32[16,16], index: 0, kind: input, shape index: {}]   ;;  %s5942_s1 = inlined_call_operand.vmem [shape: s32[2,1], index: 1, kind: input, shape index: {}]   ;;  %s5943_s2 = inlined_call_operand.vmem [shape: f32[16,96], index: 2, kind: input, shape index: {}]   ;;  %s5944_s3 = inlined_call_operand.vmem [shape: f32[1,96], index: 3, kind: input, shape index: {}]   ;;  %s5945_s4 = inlined_call_operand.vmem [shape: f32[32,96], index: 4, kind: input, shape index: {}]   ;;  %s5946_s5 = inlined_call_operand.vmem [shape: f32[1,96], index: 5, kind: input, shape index: {}]   ;;  %s5947_s6 = inlined_call_operand.vmem [shape: f32[64,8], index: 6, kind: input, shape index: {}]   ;;  %s5948_s7 = inlined_call_operand.vmem [shape: f32[1,1,8], index: 7, kind: input, shape index: {}]   ;;  %s5949_s8 = inlined_call_operand.vmem [shape: f32[96,8], index: 8, kind: input, shape index: {}]   ;;  %s5950_s9 = inlined_call_operand.vmem [shape: f32[1,1,8], index: 9, kind: input, shape index: {}]   ;;  %s5951_s10 = inlined_call_operand.vmem [shape: f32[32,32], index: 10, kind: input, shape index: {}]   ;;  %s5952_s11 = inlined_call_operand.hbm [shape: f32[2,32], index: 11, kind: output, shape index: {}]  }
   0x1   :  { %v47_v0 = vld [vmem:[%s5943_s2] sm:$0xff]  ;;  %v48_v1 = vld [vmem:[%s5943_s2 + $0x8] sm:$0xff]  ;;  %4331 = vmatprep.subr.bf16.mxu0 %v5953_v6  ;;  %4183 = vmatprep.mubr.msk.f32.mxu0 %vm4572_vm1, %v4573_v8 }
   0x2   :  { %v45_v2 = vld [vmem:[%s5941_s0] sm:$0xff]  ;;  %v4321_v3 = vpack.c.bf16 %v48_v1, %v47_v0  ;;  %v139_v5 = vld [vmem:[%s5945_s4 + $0x8] sm:$0xff] }
   0x3   :  { %4161 = vmatprep.mubr.msk.f32.mxu1 %vm56_vm0, %v45_v2  ;;  %v138_v4 = vld [vmem:[%s5945_s4] sm:$0xff] }
   0x4   :  { %v4668_v7 = vpack.c.bf16 %v139_v5, %v138_v4 }
   0x5   :  { %16 = vsyncpa [#allocation4], 0  ;;  %4322 = vmatprep.subr.bf16.mxu1 %v4321_v3  ;;  %v46_v9 = vld [vmem:[%s5941_s0 + $0x8] sm:$0xff]  ;;  %v140_v10 = vld [vmem:[%s5945_s4 + $0x10] sm:$0xff]  ;;  %s4574_s13 = smov 96   ;;  %vm39_vm2 = vcmask 261120  }
   0x6   :  { %4324 = vmatpush3.bf16.msra.mxu1 %v4321_v3  ;;  %v141_v11 = vld [vmem:[%s5945_s4 + $0x18] sm:$0xff]  ;;  %4333 = vmatpush3.bf16.msra.mxu0 %v4668_v7  ;;  %v4705_v15 = vld [vmem:[%s5946_s5] ss:$0 sm:$0xff]  ;;  %s4576_s5 = smov 112   ;;  %40 = vst.msk [vmem:[#allocation2] sm:$0xff] %vm39_vm2, %v4573_v8  ;;  %43 = vst.msk [vmem:[#allocation2 + $0x10] sm:$0xff] %vm39_vm2, %v4573_v8 }
   0x7   :  { %4325 = vmatprep.subr.bf16.mxu1 %v5953_v6  ;;  %4334 = vmatprep.subr.bf16.mxu0 %v5953_v6  ;;  %v4685_v12 = vpack.c.bf16 %v141_v11, %v140_v10  ;;  %v4034_v20 = vld [vmem:[%s5944_s3] ss:$0 sm:$0xff]  ;;  %s4575_s3 = smov 32   ;;  %s4577_s16 = smov 80   ;;  %vm41_vm11 = vcmask 257024   ;;  %vm385_vm12 = vcmask 254080  }
   0x8   :  { %s4578_s17 = smov 48   ;;  %s4579_s18 = smov 16   ;;  %42 = vst.msk [vmem:[#allocation2 + $0x8] sm:$0xf] %vm41_vm11, %v4573_v8  ;;  %44 = vst.msk [vmem:[#allocation2 + $0x18] sm:$0xf] %vm41_vm11, %v4573_v8 }
   0x9   :  { %4162 = vmatmul.mubr.msk.f32.vlgmr.msra.gmra.mrb[0].mxu1 %vm56_vm0, %v46_v9  ;;  %vm335_vm13 = vcmask 122880   ;;  %vm2477_vm14 = vcmask 523264   ;;  %vm3486_vm15 = vcmask 785408   ;;  %s4590_s22 = smov [#allocation3]  }
   0xa   :  { %4327 = vmatpush3.bf16.msra.mxu1 %v4668_v7  ;;  %4172 = vmatprep.mubr.msk.f32.mxu1 %vm4572_vm1, %v4573_v8  ;;  %s4026_s23 = sshll.u32 %s4590_s22, 4  ;;  %s4027_s23 = int_to_ptr.vmem [resolvable:$true] %s4026_s23 }
   0xb   :  { %4328 = vmatprep.subr.bf16.mxu1 %v5953_v6  ;;  %4336 = vmatpush3.bf16.msra.mxu0 %v4685_v12  ;;  %s4547_s24 = scalar_lea.vmem %s4027_s23, 32  ;;  %p4552_p1 = scmp.lt.s32.totalorder %s4027_s23, %s4027_s23 }
   0xc   :  { %4343 = vmatprep.subr.bf16.mxu0 %v5953_v6  ;;  %p4548_p0 = scmp.ne.s32.totalorder %s4027_s23, %s4547_s24  ;;  %p4553_p2 = scmp.lt.s32.totalorder %s4547_s24, %s4547_s24 }
   0xe   :  { %4330 = vmatpush3.bf16.msra.mxu1 %v4685_v12  ;;  %p4554_p3 = por %p4553_p2, %p4552_p1 }
   0xf   :  { %4337 = vmatprep.subr.bf16.mxu1 %v5953_v6 }
  0x10   :  { %p4555_p4 = pnand %p4554_p3, %p4548_p0 }
  0x11   :  { %4173 = vmatmul.mubr.f32.vlgmr.msra.gmra.mrb[2].mxu1 %v4573_v8 }
  0x12   :  { %4339 = vmatpush3.bf16.msra.mxu1 %v4668_v7  ;;  %4194 = vmatprep.mubr.msk.f32.mxu1 %vm4572_vm1, %v4573_v8 }
  0x13   :  { %4340 = vmatprep.subr.bf16.mxu1 %v5953_v6 }
  0x16   :  { %4342 = vmatpush3.bf16.msra.mxu1 %v4685_v12 }
  0x17   :  { %4349 = vmatprep.subr.bf16.mxu1 %v5953_v6 }
  0xdc   :  { %v4163_v13 = vpop.f32.mrb[0].mxu1 }
  0xdd   :  { %v129_v14 = vpop.f32.mrb[1].mxu1  ;;  %v4713_v21 = vadd.f32 %v4163_v13, %v4034_v20 }
  0xde   :  { %v4716_v23 = vadd.f32 %v4034_v20, %v129_v14 }
  0xe4   :  { %v219_v16 = vpop.f32.mrb[2].mxu1 }
  0xe5   :  { %v220_v17 = vadd.f32 %v4705_v15, %v219_v16  ;;  %v4174_v18 = vpop.f32.mrb[3].mxu1 }
  0xe7   :  { %v249_v19 = vrot.slane %v220_v17, 2  ;;  %v223_v24 = vadd.f32 %v220_v17, %v4716_v23 }
  0xe9   :  { %258 = vrot.lane.b32.xlu0 %v249_v19, %s4574_s13  ;;  %v251_v22 = vadd.f32 %v249_v19, %v4713_v21  ;;  %v4038_v26 = vmul.f32 -1.442695, %v223_v24 }
  0xeb   :  { %v4039_v25 = vmul.f32 -1.442695, %v251_v22 }
  0xed   :  { %231 = vrot.lane.b32.xlu0 %v220_v17, %s4574_s13  ;;  %4451 = vpow2.f32 %v4039_v25 }
  0xee   :  { %4453 = vpow2.f32 %v4038_v26 }
  0xf7   :  { %v4452_v27 = vpop.eup %4451 }
  0xf8   :  { %v255_v28 = vadd.f32 1.0, %v4452_v27  ;;  %v4454_v29 = vpop.eup %4453 }
  0xf9   :  { %v227_v30 = vadd.f32 1.0, %v4454_v29 }
  0xfa   :  { %4455 = vrcp.f32 %v255_v28 }
  0xfb   :  { %4457 = vrcp.f32 %v227_v30 }
 0x104   :  { %v4456_v31 = vpop.eup %4455 }
 0x105   :  { %v4458_v34 = vpop.eup %4457  ;;  %v268_v43 = vsub.f32 1.0, %v4456_v31  ;;  %v274_v45 = vmul.f32 0.0, %v4456_v31 }
 0x106   :  { %v241_v48 = vsub.f32 1.0, %v4458_v34  ;;  %v247_v50 = vmul.f32 0.0, %v4458_v34 }
 0x15b   :  { %v259_v32 = vpop.permute.xlu0 %258 }
 0x15c   :  { %v261_v33 = vmul.f32 %v4456_v31, %v259_v32 }
 0x15e   :  { %263 = vrot.lane.b32.xlu1 %v261_v33, %s4575_s3 }
 0x15f   :  { %v232_v35 = vpop.permute.xlu0 %231 }
 0x160   :  { %v234_v36 = vmul.f32 %v4458_v34, %v232_v35 }
 0x162   :  { %236 = vrot.lane.b32.xlu1 %v234_v36, %s4575_s3 }
 0x1d0   :  { %v264_v37 = vpop.permute.xlu1 %263 }
 0x1d1   :  { %v266_v38 = vadd.f32 %v264_v37, %v4713_v21 }
 0x1d3   :  { %4459 = vtanh.f32 %v266_v38 }
 0x1d4   :  { %v237_v39 = vpop.permute.xlu1 %236 }
 0x1d5   :  { %v239_v40 = vadd.f32 %v237_v39, %v4716_v23 }
 0x1d7   :  { %4461 = vtanh.f32 %v239_v40 }
 0x1dd   :  { %v4460_v41 = vpop.eup %4459 }
 0x1de   :  { %270 = vrot.lane.b32.xlu0 %v4460_v41, %s4576_s5 }
 0x1e1   :  { %v4462_v42 = vpop.eup %4461 }
 0x1e2   :  { %243 = vrot.lane.b32.xlu1 %v4462_v42, %s4576_s5 }
 0x250   :  { %v271_v44 = vpop.permute.xlu0 %270 }
 0x251   :  { %v273_v46 = vmul.f32 %v271_v44, %v268_v43 }
 0x253   :  { %v4729_v47 = vadd.f32 %v274_v45, %v273_v46 }
 0x254   :  { %v244_v49 = vpop.permute.xlu1 %243 }
 0x255   :  { %v246_v51 = vmul.f32 %v244_v49, %v241_v48  ;;  %v281_v52 = vrot.slane %v4729_v47, 6 }
 0x257   :  { %v4732_v53 = vadd.f32 %v247_v50, %v246_v51  ;;  %282 = vrot.lane.b32.xlu1 %v281_v52, %s4577_s16 }
 0x259   :  { %277 = vrot.lane.b32.xlu0 %v4732_v53, %s4576_s5 }
 0x2c9   :  { %v283_v54 = vpop.permute.xlu1 %282 }
 0x2cb   :  { %v278_v55 = vpop.permute.xlu0 %277 }
 0x2cc   :  { %v285_v56 = vsel %vm56_vm0, %v278_v55, %v283_v54 }
 0x2cd   :  { %4184 = vmatmul.mubr.msk.f32.vlgmr.msra.gmra.mrb[0].mxu0 %vm39_vm2, %v285_v56  ;;  %v518_v17 = vrot.slane %v285_v56, 4  ;;  %v487_v18 = vrot.slane %v285_v56, 6 }
 0x2ce   :  { %4345 = vmatpush3.bf16.msra.mxu0 %v4668_v7  ;;  %4205 = vmatprep.mubr.msk.f32.mxu0 %vm4572_vm1, %v4573_v8 }
 0x2cf   :  { %4346 = vmatprep.subr.bf16.mxu0 %v5953_v6 }
 0x2d2   :  { %4348 = vmatpush3.bf16.msra.mxu0 %v4685_v12 }
 0x2d3   :  { %4355 = vmatprep.subr.bf16.mxu0 %v5953_v6 }
 0x3a0   :  { %v457_v57 = vpop.f32.mrb[0].mxu0 }
 0x3a1   :  { %v458_v58 = vadd.f32 %v4705_v15, %v457_v57  ;;  %v4185_v59 = vpop.f32.mrb[1].mxu0 }
 0x3a3   :  { %v462_v60 = vrot.slane %v458_v58, 6  ;;  %v493_v61 = vrot.slane %v458_v58, 4 }
 0x3a5   :  { %502 = vrot.lane.b32.xlu0 %v493_v61, %s4574_s13  ;;  %471 = vrot.lane.b32.xlu1 %v462_v60, %s4574_s13  ;;  %v464_v62 = vadd.f32 %v462_v60, %v4716_v23  ;;  %v495_v63 = vadd.f32 %v493_v61, %v4713_v21 }
 0x3a7   :  { %v4043_v0 = vmul.f32 -1.442695, %v464_v62  ;;  %v4044_v1 = vmul.f32 -1.442695, %v495_v63 }
 0x3a9   :  { %4463 = vpow2.f32 %v4043_v0 }
 0x3aa   :  { %4465 = vpow2.f32 %v4044_v1 }
 0x3b3   :  { %v4464_v2 = vpop.eup %4463 }
 0x3b4   :  { %v4466_v3 = vpop.eup %4465  ;;  %v468_v4 = vadd.f32 1.0, %v4464_v2 }
 0x3b5   :  { %v499_v5 = vadd.f32 1.0, %v4466_v3 }
 0x3b6   :  { %4467 = vrcp.f32 %v468_v4 }
 0x3b7   :  { %4469 = vrcp.f32 %v499_v5 }
 0x3c0   :  { %v4468_v9 = vpop.eup %4467 }
 0x3c1   :  { %v4470_v10 = vpop.eup %4469  ;;  %v481_v34 = vsub.f32 1.0, %v4468_v9 }
 0x3c2   :  { %v512_v28 = vsub.f32 1.0, %v4470_v10 }
 0x417   :  { %v503_v11 = vpop.permute.xlu0 %502  ;;  %v472_v13 = vpop.permute.xlu1 %471 }
 0x418   :  { %v505_v14 = vmul.f32 %v4470_v10, %v503_v11  ;;  %v474_v16 = vmul.f32 %v4468_v9, %v472_v13 }
 0x41a   :  { %507 = vrot.lane.b32.xlu0 %v505_v14, %s4575_s3  ;;  %476 = vrot.lane.b32.xlu1 %v474_v16, %s4575_s3 }
 0x41e   :  { %519 = vrot.lane.b32.xlu1 %v518_v17, %s4578_s17 }
 0x422   :  { %488 = vrot.lane.b32.xlu1 %v487_v18, %s4579_s18 }
 0x48c   :  { %v508_v19 = vpop.permute.xlu0 %507  ;;  %v477_v20 = vpop.permute.xlu1 %476 }
 0x48d   :  { %v510_v22 = vadd.f32 %v508_v19, %v4713_v21  ;;  %v479_v24 = vadd.f32 %v477_v20, %v4716_v23 }
 0x48f   :  { %4471 = vtanh.f32 %v510_v22 }
 0x490   :  { %4473 = vtanh.f32 %v479_v24  ;;  %v520_v27 = vpop.permute.xlu1 %519 }
 0x491   :  { %v522_v30 = vmul.f32 %v4470_v10, %v520_v27 }
 0x494   :  { %v489_v32 = vpop.permute.xlu1 %488 }
 0x495   :  { %v491_v36 = vmul.f32 %v4468_v9, %v489_v32 }
 0x499   :  { %v4472_v25 = vpop.eup %4471 }
 0x49a   :  { %514 = vrot.lane.b32.xlu0 %v4472_v25, %s4576_s5  ;;  %v4474_v26 = vpop.eup %4473 }
 0x49e   :  { %483 = vrot.lane.b32.xlu0 %v4474_v26, %s4576_s5 }
 0x50c   :  { %v515_v29 = vpop.permute.xlu0 %514 }
 0x50d   :  { %v517_v31 = vmul.f32 %v515_v29, %v512_v28 }
 0x50f   :  { %v4758_v33 = vadd.f32 %v522_v30, %v517_v31 }
 0x510   :  { %v484_v35 = vpop.permute.xlu0 %483 }
 0x511   :  { %v486_v37 = vmul.f32 %v484_v35, %v481_v34  ;;  %v529_v38 = vrot.slane %v4758_v33, 2 }
 0x513   :  { %v4761_v39 = vadd.f32 %v491_v36, %v486_v37  ;;  %530 = vrot.lane.b32.xlu1 %v529_v38, %s4577_s16 }
 0x515   :  { %525 = vrot.lane.b32.xlu0 %v4761_v39, %s4576_s5 }
 0x585   :  { %v531_v40 = vpop.permute.xlu1 %530 }
 0x587   :  { %v526_v41 = vpop.permute.xlu0 %525 }
 0x588   :  { %v533_v42 = vsel %vm56_vm0, %v526_v41, %v531_v40 }
 0x589   :  { %v636_v43 = vrot.slane %v533_v42, 2  ;;  %v735_v1 = vrot.slane %v533_v42, 6 }
 0x58b   :  { %4195 = vmatmul.mubr.msk.f32.vlgmr.msra.gmra.mrb[4].mxu1 %vm39_vm2, %v636_v43 }
 0x58c   :  { %4351 = vmatpush3.bf16.msra.mxu1 %v4668_v7  ;;  %4216 = vmatprep.mubr.msk.f32.mxu1 %vm4572_vm1, %v4573_v8 }
 0x58d   :  { %4352 = vmatprep.subr.bf16.mxu1 %v5953_v6 }
 0x590   :  { %4354 = vmatpush3.bf16.msra.mxu1 %v4685_v12 }
 0x591   :  { %4361 = vmatprep.subr.bf16.mxu1 %v5953_v6 }
 0x65e   :  { %v705_v44 = vpop.f32.mrb[4].mxu1 }
 0x65f   :  { %v706_v45 = vadd.f32 %v4705_v15, %v705_v44  ;;  %v4196_v46 = vpop.f32.mrb[5].mxu1 }
 0x661   :  { %v710_v48 = vrot.slane %v706_v45, 4  ;;  %v741_v49 = vrot.slane %v706_v45, 6 }
 0x663   :  { %750 = vrot.lane.b32.xlu0 %v741_v49, %s4574_s13  ;;  %719 = vrot.lane.b32.xlu1 %v710_v48, %s4574_s13  ;;  %v712_v50 = vadd.f32 %v710_v48, %v4716_v23  ;;  %v743_v51 = vadd.f32 %v741_v49, %v4713_v21 }
 0x665   :  { %v4048_v52 = vmul.f32 -1.442695, %v712_v50  ;;  %v4049_v54 = vmul.f32 -1.442695, %v743_v51 }
 0x667   :  { %4475 = vpow2.f32 %v4048_v52 }
 0x668   :  { %4477 = vpow2.f32 %v4049_v54 }
 0x671   :  { %v4476_v55 = vpop.eup %4475 }
 0x672   :  { %v4478_v56 = vpop.eup %4477  ;;  %v716_v57 = vadd.f32 1.0, %v4476_v55 }
 0x673   :  { %v747_v58 = vadd.f32 1.0, %v4478_v56 }
 0x674   :  { %4479 = vrcp.f32 %v716_v57 }
 0x675   :  { %4481 = vrcp.f32 %v747_v58 }
 0x67e   :  { %v4480_v59 = vpop.eup %4479 }
 0x67f   :  { %v4482_v60 = vpop.eup %4481  ;;  %v729_v20 = vsub.f32 1.0, %v4480_v59 }
 0x680   :  { %v760_v13 = vsub.f32 1.0, %v4482_v60 }
 0x6d5   :  { %v751_v61 = vpop.permute.xlu0 %750  ;;  %v720_v62 = vpop.permute.xlu1 %719 }
 0x6d6   :  { %v753_v63 = vmul.f32 %v4482_v60, %v751_v61  ;;  %v722_v0 = vmul.f32 %v4480_v59, %v720_v62 }
 0x6d8   :  { %755 = vrot.lane.b32.xlu0 %v753_v63, %s4575_s3  ;;  %724 = vrot.lane.b32.xlu1 %v722_v0, %s4575_s3 }
 0x6dc   :  { %766 = vrot.lane.b32.xlu1 %v533_v42, %s4578_s17 }
 0x6e0   :  { %736 = vrot.lane.b32.xlu1 %v735_v1, %s4579_s18 }
 0x74a   :  { %v756_v2 = vpop.permute.xlu0 %755  ;;  %v725_v3 = vpop.permute.xlu1 %724 }
 0x74b   :  { %v758_v4 = vadd.f32 %v756_v2, %v4713_v21  ;;  %v727_v5 = vadd.f32 %v725_v3, %v4716_v23 }
 0x74d   :  { %4483 = vtanh.f32 %v758_v4 }
 0x74e   :  { %4485 = vtanh.f32 %v727_v5  ;;  %v767_v11 = vpop.permute.xlu1 %766 }
 0x74f   :  { %v769_v16 = vmul.f32 %v4482_v60, %v767_v11 }
 0x752   :  { %v737_v18 = vpop.permute.xlu1 %736 }
 0x753   :  { %v739_v24 = vmul.f32 %v4480_v59, %v737_v18 }
 0x757   :  { %v4484_v9 = vpop.eup %4483 }
 0x758   :  { %762 = vrot.lane.b32.xlu0 %v4484_v9, %s4576_s5  ;;  %v4486_v10 = vpop.eup %4485 }
 0x75c   :  { %731 = vrot.lane.b32.xlu0 %v4486_v10, %s4576_s5 }
 0x7ca   :  { %v763_v14 = vpop.permute.xlu0 %762 }
 0x7cb   :  { %v765_v17 = vmul.f32 %v763_v14, %v760_v13 }
 0x7cd   :  { %v4787_v19 = vadd.f32 %v769_v16, %v765_v17 }
 0x7ce   :  { %v732_v22 = vpop.permute.xlu0 %731 }
 0x7cf   :  { %v734_v25 = vmul.f32 %v732_v22, %v729_v20  ;;  %v776_v26 = vrot.slane %v4787_v19, 6 }
 0x7d1   :  { %v4790_v27 = vadd.f32 %v739_v24, %v734_v25  ;;  %777 = vrot.lane.b32.xlu1 %v776_v26, %s4577_s16 }
 0x7d3   :  { %772 = vrot.lane.b32.xlu0 %v4790_v27, %s4576_s5 }
 0x843   :  { %v778_v28 = vpop.permute.xlu1 %777 }
 0x845   :  { %v773_v29 = vpop.permute.xlu0 %772 }
 0x846   :  { %v780_v30 = vsel %vm56_vm0, %v773_v29, %v778_v28 }
 0x847   :  { %v883_v31 = vrot.slane %v780_v30, 4  ;;  %v982_v54 = vrot.slane %v780_v30, 6 }
 0x849   :  { %4206 = vmatmul.mubr.msk.f32.vlgmr.msra.gmra.mrb[2].mxu0 %vm39_vm2, %v883_v31 }
 0x84a   :  { %4357 = vmatpush3.bf16.msra.mxu0 %v4668_v7  ;;  %4227 = vmatprep.mubr.msk.f32.mxu0 %vm4572_vm1, %v4573_v8 }
 0x84b   :  { %4358 = vmatprep.subr.bf16.mxu0 %v5953_v6 }
 0x84e   :  { %4360 = vmatpush3.bf16.msra.mxu0 %v4685_v12 }
 0x84f   :  { %4367 = vmatprep.subr.bf16.mxu0 %v5953_v6 }
 0x91c   :  { %v952_v32 = vpop.f32.mrb[2].mxu0 }
 0x91d   :  { %v953_v34 = vadd.f32 %v4705_v15, %v952_v32  ;;  %v4207_v35 = vpop.f32.mrb[3].mxu0 }
 0x91f   :  { %995 = vrot.lane.b32.xlu0 %v953_v34, %s4574_s13  ;;  %v957_v36 = vrot.slane %v953_v34, 2  ;;  %v988_v37 = vadd.f32 %v953_v34, %v4713_v21 }
 0x921   :  { %966 = vrot.lane.b32.xlu1 %v957_v36, %s4574_s13  ;;  %v959_v38 = vadd.f32 %v957_v36, %v4716_v23  ;;  %v4054_v40 = vmul.f32 -1.442695, %v988_v37 }
 0x923   :  { %v4053_v41 = vmul.f32 -1.442695, %v959_v38  ;;  %4487 = vpow2.f32 %v4054_v40 }
 0x925   :  { %4489 = vpow2.f32 %v4053_v41 }
 0x92d   :  { %v4488_v42 = vpop.eup %4487 }
 0x92e   :  { %v992_v44 = vadd.f32 1.0, %v4488_v42 }
 0x92f   :  { %v4490_v43 = vpop.eup %4489 }
 0x930   :  { %v963_v45 = vadd.f32 1.0, %v4490_v43  ;;  %4491 = vrcp.f32 %v992_v44 }
 0x932   :  { %4493 = vrcp.f32 %v963_v45 }
 0x93a   :  { %v4492_v46 = vpop.eup %4491 }
 0x93b   :  { %v1005_v62 = vsub.f32 1.0, %v4492_v46 }
 0x93c   :  { %v4494_v50 = vpop.eup %4493 }
 0x93d   :  { %v976_v4 = vsub.f32 1.0, %v4494_v50 }
 0x991   :  { %v996_v48 = vpop.permute.xlu0 %995 }
 0x992   :  { %v998_v49 = vmul.f32 %v4492_v46, %v996_v48 }
 0x993   :  { %v967_v51 = vpop.permute.xlu1 %966 }
 0x994   :  { %v969_v52 = vmul.f32 %v4494_v50, %v967_v51  ;;  %1000 = vrot.lane.b32.xlu0 %v998_v49, %s4575_s3 }
 0x996   :  { %971 = vrot.lane.b32.xlu1 %v969_v52, %s4575_s3 }
 0x99a   :  { %1011 = vrot.lane.b32.xlu1 %v883_v31, %s4578_s17 }
 0x99e   :  { %983 = vrot.lane.b32.xlu1 %v982_v54, %s4579_s18 }
 0xa06   :  { %v1001_v55 = vpop.permute.xlu0 %1000 }
 0xa07   :  { %v1003_v56 = vadd.f32 %v1001_v55, %v4713_v21 }
 0xa08   :  { %v972_v57 = vpop.permute.xlu1 %971 }
 0xa09   :  { %4495 = vtanh.f32 %v1003_v56  ;;  %v974_v58 = vadd.f32 %v972_v57, %v4716_v23 }
 0xa0b   :  { %4497 = vtanh.f32 %v974_v58 }
 0xa0c   :  { %v1012_v61 = vpop.permute.xlu1 %1011 }
 0xa0d   :  { %v1014_v0 = vmul.f32 %v4492_v46, %v1012_v61 }
 0xa10   :  { %v984_v2 = vpop.permute.xlu1 %983 }
 0xa11   :  { %v986_v9 = vmul.f32 %v4494_v50, %v984_v2 }
 0xa13   :  { %v4496_v59 = vpop.eup %4495 }
 0xa14   :  { %1007 = vrot.lane.b32.xlu0 %v4496_v59, %s4576_s5 }
 0xa15   :  { %v4498_v60 = vpop.eup %4497 }
 0xa18   :  { %978 = vrot.lane.b32.xlu0 %v4498_v60, %s4576_s5 }
 0xa86   :  { %v1008_v63 = vpop.permute.xlu0 %1007 }
 0xa87   :  { %v1010_v1 = vmul.f32 %v1008_v63, %v1005_v62 }
 0xa89   :  { %v4816_v3 = vadd.f32 %v1014_v0, %v1010_v1 }
 0xa8a   :  { %v979_v5 = vpop.permute.xlu0 %978 }
 0xa8b   :  { %v981_v10 = vmul.f32 %v979_v5, %v976_v4  ;;  %v1021_v11 = vrot.slane %v4816_v3, 2 }
 0xa8d   :  { %v4819_v13 = vadd.f32 %v986_v9, %v981_v10  ;;  %1022 = vrot.lane.b32.xlu1 %v1021_v11, %s4577_s16 }
 0xa8f   :  { %1017 = vrot.lane.b32.xlu0 %v4819_v13, %s4576_s5 }
 0xaff   :  { %v1023_v14 = vpop.permute.xlu1 %1022 }
 0xb01   :  { %v1018_v16 = vpop.permute.xlu0 %1017 }
 0xb02   :  { %v1025_v17 = vsel %vm56_vm0, %v1018_v16, %v1023_v14 }
 0xb03   :  { %v1127_v18 = vrot.slane %v1025_v17, 6 }
 0xb05   :  { %4217 = vmatmul.mubr.msk.f32.vlgmr.msra.gmra.mrb[6].mxu1 %vm39_vm2, %v1127_v18 }
 0xb06   :  { %4363 = vmatpush3.bf16.msra.mxu1 %v4668_v7  ;;  %4238 = vmatprep.mubr.msk.f32.mxu1 %vm4572_vm1, %v4573_v8 }
 0xb07   :  { %4364 = vmatprep.subr.bf16.mxu1 %v5953_v6 }
 0xb0a   :  { %4366 = vmatpush3.bf16.msra.mxu1 %v4685_v12 }
 0xb0b   :  { %4373 = vmatprep.subr.bf16.mxu1 %v5953_v6 }
 0xbd8   :  { %v1196_v20 = vpop.f32.mrb[6].mxu1 }
 0xbd9   :  { %v1197_v22 = vadd.f32 %v4705_v15, %v1196_v20  ;;  %v4218_v24 = vpop.f32.mrb[7].mxu1 }
 0xbdb   :  { %1208 = vrot.lane.b32.xlu1 %v1197_v22, %s4574_s13  ;;  %v1229_v25 = vrot.slane %v1197_v22, 2  ;;  %v1200_v26 = vadd.f32 %v1197_v22, %v4713_v21 }
 0xbdd   :  { %1238 = vrot.lane.b32.xlu0 %v1229_v25, %s4574_s13  ;;  %v1231_v28 = vadd.f32 %v1229_v25, %v4716_v23  ;;  %v4058_v29 = vmul.f32 -1.442695, %v1200_v26 }
 0xbdf   :  { %v4059_v30 = vmul.f32 -1.442695, %v1231_v28  ;;  %4499 = vpow2.f32 %v4058_v29 }
 0xbe1   :  { %4501 = vpow2.f32 %v4059_v30 }
 0xbe9   :  { %v4500_v31 = vpop.eup %4499 }
 0xbea   :  { %v1204_v34 = vadd.f32 1.0, %v4500_v31 }
 0xbeb   :  { %v4502_v32 = vpop.eup %4501 }
 0xbec   :  { %v1235_v35 = vadd.f32 1.0, %v4502_v32  ;;  %4503 = vrcp.f32 %v1204_v34 }
 0xbee   :  { %4505 = vrcp.f32 %v1235_v35 }
 0xbf6   :  { %v4504_v36 = vpop.eup %4503 }
 0xbf7   :  { %v1218_v58 = vsub.f32 1.0, %v4504_v36 }
 0xbf8   :  { %v4506_v40 = vpop.eup %4505 }
 0xbf9   :  { %v1248_v51 = vsub.f32 1.0, %v4506_v40 }
 0xc4d   :  { %v1209_v37 = vpop.permute.xlu1 %1208 }
 0xc4e   :  { %v1211_v38 = vmul.f32 %v4504_v36, %v1209_v37 }
 0xc4f   :  { %v1239_v41 = vpop.permute.xlu0 %1238 }
 0xc50   :  { %v1241_v42 = vmul.f32 %v4506_v40, %v1239_v41  ;;  %1213 = vrot.lane.b32.xlu1 %v1211_v38, %s4575_s3 }
 0xc52   :  { %1243 = vrot.lane.b32.xlu0 %v1241_v42, %s4575_s3 }
 0xc54   :  { %1254 = vrot.lane.b32.xlu1 %v1025_v17, %s4578_s17 }
 0xc58   :  { %1224 = vrot.lane.b32.xlu1 %v1127_v18, %s4579_s18 }
 0xcc2   :  { %v1214_v43 = vpop.permute.xlu1 %1213 }
 0xcc3   :  { %v1216_v46 = vadd.f32 %v1214_v43, %v4713_v21 }
 0xcc4   :  { %v1244_v44 = vpop.permute.xlu0 %1243 }
 0xcc5   :  { %v1246_v45 = vadd.f32 %v1244_v44, %v4716_v23 }
 0xcc6   :  { %v1255_v50 = vpop.permute.xlu1 %1254 }
 0xcc7   :  { %4507 = vtanh.f32 %v1246_v45  ;;  %v1257_v54 = vmul.f32 %v4506_v40, %v1255_v50 }
 0xcc8   :  { %4509 = vtanh.f32 %v1216_v46 }
 0xcca   :  { %v1225_v56 = vpop.permute.xlu1 %1224 }
 0xccb   :  { %v1227_v60 = vmul.f32 %v4504_v36, %v1225_v56 }
 0xcd1   :  { %v4508_v48 = vpop.eup %4507 }
 0xcd2   :  { %1250 = vrot.lane.b32.xlu0 %v4508_v48, %s4576_s5  ;;  %v4510_v49 = vpop.eup %4509 }
 0xcd6   :  { %1220 = vrot.lane.b32.xlu0 %v4510_v49, %s4576_s5 }
 0xd44   :  { %v1251_v52 = vpop.permute.xlu0 %1250 }
 0xd45   :  { %v1253_v55 = vmul.f32 %v1251_v52, %v1248_v51 }
 0xd47   :  { %v4845_v57 = vadd.f32 %v1257_v54, %v1253_v55 }
 0xd48   :  { %v1221_v59 = vpop.permute.xlu0 %1220 }
 0xd49   :  { %v1223_v61 = vmul.f32 %v1221_v59, %v1218_v58  ;;  %v1264_v62 = vrot.slane %v4845_v57, 6 }
 0xd4b   :  { %v4848_v63 = vadd.f32 %v1227_v60, %v1223_v61  ;;  %1265 = vrot.lane.b32.xlu1 %v1264_v62, %s4577_s16 }
 0xd4d   :  { %1260 = vrot.lane.b32.xlu0 %v4848_v63, %s4576_s5 }
 0xdbd   :  { %v1266_v0 = vpop.permute.xlu1 %1265 }
 0xdbf   :  { %v1261_v1 = vpop.permute.xlu0 %1260 }
 0xdc0   :  { %v1268_v2 = vsel %vm56_vm0, %v1261_v1, %v1266_v0 }
 0xdc1   :  { %4228 = vmatmul.mubr.msk.f32.vlgmr.msra.gmra.mrb[4].mxu0 %vm39_vm2, %v1268_v2  ;;  %v1482_v31 = vrot.slane %v1268_v2, 4  ;;  %v1451_v32 = vrot.slane %v1268_v2, 6 }
 0xdc2   :  { %4369 = vmatpush3.bf16.msra.mxu0 %v4668_v7  ;;  %4249 = vmatprep.mubr.msk.f32.mxu0 %vm4572_vm1, %v4573_v8 }
 0xdc3   :  { %4370 = vmatprep.subr.bf16.mxu0 %v5953_v6 }
 0xdc6   :  { %4372 = vmatpush3.bf16.msra.mxu0 %v4685_v12 }
 0xdc7   :  { %4385 = vmatprep.subr.bf16.mxu0 %v5953_v6 }
 0xe94   :  { %v1421_v4 = vpop.f32.mrb[4].mxu0 }
 0xe95   :  { %v1422_v5 = vadd.f32 %v4705_v15, %v1421_v4  ;;  %v4229_v9 = vpop.f32.mrb[5].mxu0 }
 0xe97   :  { %v1426_v10 = vrot.slane %v1422_v5, 6  ;;  %v1457_v11 = vrot.slane %v1422_v5, 4 }
 0xe99   :  { %1466 = vrot.lane.b32.xlu0 %v1457_v11, %s4574_s13  ;;  %1435 = vrot.lane.b32.xlu1 %v1426_v10, %s4574_s13  ;;  %v1428_v7 = vadd.f32 %v1426_v10, %v4713_v21  ;;  %v1459_v14 = vadd.f32 %v1457_v11, %v4716_v23 }
 0xe9b   :  { %v4061_v16 = vmul.f32 -1.442695, %v1428_v7  ;;  %v4062_v17 = vmul.f32 -1.442695, %v1459_v14 }
 0xe9d   :  { %4511 = vpow2.f32 %v4061_v16 }
 0xe9e   :  { %4513 = vpow2.f32 %v4062_v17 }
 0xea7   :  { %v4512_v12 = vpop.eup %4511 }
 0xea8   :  { %v4514_v18 = vpop.eup %4513  ;;  %v1432_v20 = vadd.f32 1.0, %v4512_v12 }
 0xea9   :  { %v1463_v22 = vadd.f32 1.0, %v4514_v18 }
 0xeaa   :  { %4515 = vrcp.f32 %v1432_v20 }
 0xeab   :  { %4517 = vrcp.f32 %v1463_v22 }
 0xeb4   :  { %v4516_v24 = vpop.eup %4515 }
 0xeb5   :  { %v4518_v25 = vpop.eup %4517  ;;  %v1445_v49 = vsub.f32 1.0, %v4516_v24 }
 0xeb6   :  { %v1476_v42 = vsub.f32 1.0, %v4518_v25 }
 0xf0b   :  { %v1467_v26 = vpop.permute.xlu0 %1466  ;;  %v1436_v28 = vpop.permute.xlu1 %1435 }
 0xf0c   :  { %v1469_v29 = vmul.f32 %v4518_v25, %v1467_v26  ;;  %v1438_v30 = vmul.f32 %v4516_v24, %v1436_v28 }
 0xf0e   :  { %1471 = vrot.lane.b32.xlu0 %v1469_v29, %s4575_s3  ;;  %1440 = vrot.lane.b32.xlu1 %v1438_v30, %s4575_s3 }
 0xf12   :  { %1483 = vrot.lane.b32.xlu1 %v1482_v31, %s4578_s17 }
 0xf16   :  { %1452 = vrot.lane.b32.xlu1 %v1451_v32, %s4579_s18 }
 0xf80   :  { %v1472_v34 = vpop.permute.xlu0 %1471  ;;  %v1441_v35 = vpop.permute.xlu1 %1440 }
 0xf81   :  { %v1474_v36 = vadd.f32 %v1472_v34, %v4716_v23  ;;  %v1443_v37 = vadd.f32 %v1441_v35, %v4713_v21 }
 0xf83   :  { %4519 = vtanh.f32 %v1474_v36 }
 0xf84   :  { %4521 = vtanh.f32 %v1443_v37  ;;  %v1484_v41 = vpop.permute.xlu1 %1483 }
 0xf85   :  { %v1486_v44 = vmul.f32 %v4518_v25, %v1484_v41 }
 0xf88   :  { %v1453_v46 = vpop.permute.xlu1 %1452 }
 0xf89   :  { %v1455_v51 = vmul.f32 %v4516_v24, %v1453_v46 }
 0xf8d   :  { %v4520_v38 = vpop.eup %4519 }
 0xf8e   :  { %1478 = vrot.lane.b32.xlu0 %v4520_v38, %s4576_s5  ;;  %v4522_v40 = vpop.eup %4521 }
 0xf92   :  { %1447 = vrot.lane.b32.xlu0 %v4522_v40, %s4576_s5 }
0x1000   :  { %v1479_v43 = vpop.permute.xlu0 %1478 }
0x1001   :  { %v1481_v45 = vmul.f32 %v1479_v43, %v1476_v42 }
0x1003   :  { %v4874_v48 = vadd.f32 %v1486_v44, %v1481_v45 }
0x1004   :  { %v1448_v50 = vpop.permute.xlu0 %1447 }
0x1005   :  { %v1450_v52 = vmul.f32 %v1448_v50, %v1445_v49  ;;  %v1493_v54 = vrot.slane %v4874_v48, 2 }
0x1007   :  { %v4877_v55 = vadd.f32 %v1455_v51, %v1450_v52  ;;  %1494 = vrot.lane.b32.xlu1 %v1493_v54, %s4577_s16 }
0x1009   :  { %1489 = vrot.lane.b32.xlu0 %v4877_v55, %s4576_s5 }
0x1079   :  { %v1495_v56 = vpop.permute.xlu1 %1494 }
0x107b   :  { %v1490_v58 = vpop.permute.xlu0 %1489 }
0x107c   :  { %v1497_v59 = vsel %vm56_vm0, %v1490_v58, %v1495_v56  ;;  %v4580_v56 = vmov 0  }
0x107d   :  { %v1582_v60 = vrot.slane %v1497_v59, 2  ;;  %v1681_v25 = vrot.slane %v1497_v59, 6  ;;  %4435 = vset.pattern.permute.xlu1 %v4580_v56  ;;  %4429 = vset.pattern.permute.xlu0 %v4580_v56 }
0x107f   :  { %4239 = vmatmul.mubr.msk.f32.vlgmr.msra.gmra.mrb[8].mxu1 %vm39_vm2, %v1582_v60 }
0x1080   :  { %4268 = vmatprep.mubr.msk.f32.mxu1 %vm4572_vm1, %v4573_v8 }
0x1152   :  { %v1651_v61 = vpop.f32.mrb[8].mxu1 }
0x1153   :  { %v1652_v62 = vadd.f32 %v4705_v15, %v1651_v61  ;;  %v4240_v0 = vpop.f32.mrb[9].mxu1 }
0x1155   :  { %v1656_v1 = vrot.slane %v1652_v62, 4  ;;  %v1687_v2 = vrot.slane %v1652_v62, 6 }
0x1157   :  { %1696 = vrot.lane.b32.xlu0 %v1687_v2, %s4574_s13  ;;  %1665 = vrot.lane.b32.xlu1 %v1656_v1, %s4574_s13  ;;  %v1658_v4 = vadd.f32 %v1656_v1, %v4713_v21  ;;  %v1689_v5 = vadd.f32 %v1687_v2, %v4716_v23 }
0x1159   :  { %v4064_v9 = vmul.f32 -1.442695, %v1658_v4  ;;  %v4065_v10 = vmul.f32 -1.442695, %v1689_v5 }
0x115b   :  { %4523 = vpow2.f32 %v4064_v9 }
0x115c   :  { %4525 = vpow2.f32 %v4065_v10 }
0x1165   :  { %v4524_v11 = vpop.eup %4523 }
0x1166   :  { %v4526_v7 = vpop.eup %4525  ;;  %v1662_v14 = vadd.f32 1.0, %v4524_v11 }
0x1167   :  { %v1693_v16 = vadd.f32 1.0, %v4526_v7 }
0x1168   :  { %4527 = vrcp.f32 %v1662_v14 }
0x1169   :  { %4529 = vrcp.f32 %v1693_v16 }
0x1172   :  { %v4528_v17 = vpop.eup %4527 }
0x1173   :  { %v4530_v12 = vpop.eup %4529  ;;  %v1675_v42 = vsub.f32 1.0, %v4528_v17 }
0x1174   :  { %v1706_v35 = vsub.f32 1.0, %v4530_v12 }
0x11c9   :  { %v1697_v18 = vpop.permute.xlu0 %1696  ;;  %v1666_v20 = vpop.permute.xlu1 %1665 }
0x11ca   :  { %v1699_v22 = vmul.f32 %v4530_v12, %v1697_v18  ;;  %v1668_v24 = vmul.f32 %v4528_v17, %v1666_v20 }
0x11cc   :  { %1701 = vrot.lane.b32.xlu0 %v1699_v22, %s4575_s3  ;;  %1670 = vrot.lane.b32.xlu1 %v1668_v24, %s4575_s3 }
0x11d0   :  { %1712 = vrot.lane.b32.xlu1 %v1497_v59, %s4578_s17 }
0x11d4   :  { %1682 = vrot.lane.b32.xlu1 %v1681_v25, %s4579_s18 }
0x123e   :  { %v1702_v26 = vpop.permute.xlu0 %1701  ;;  %v1671_v28 = vpop.permute.xlu1 %1670 }
0x123f   :  { %v1704_v29 = vadd.f32 %v1702_v26, %v4716_v23  ;;  %v1673_v30 = vadd.f32 %v1671_v28, %v4713_v21 }
0x1241   :  { %4531 = vtanh.f32 %v1704_v29 }
0x1242   :  { %4533 = vtanh.f32 %v1673_v30  ;;  %v1713_v34 = vpop.permute.xlu1 %1712 }
0x1243   :  { %v1715_v37 = vmul.f32 %v4530_v12, %v1713_v34 }
0x1246   :  { %v1683_v40 = vpop.permute.xlu1 %1682 }
0x1247   :  { %v1685_v44 = vmul.f32 %v4528_v17, %v1683_v40 }
0x124b   :  { %v4532_v31 = vpop.eup %4531 }
0x124c   :  { %1708 = vrot.lane.b32.xlu0 %v4532_v31, %s4576_s5  ;;  %v4534_v32 = vpop.eup %4533 }
0x1250   :  { %1677 = vrot.lane.b32.xlu0 %v4534_v32, %s4576_s5 }
0x12be   :  { %v1709_v36 = vpop.permute.xlu0 %1708 }
0x12bf   :  { %v1711_v38 = vmul.f32 %v1709_v36, %v1706_v35 }
0x12c1   :  { %v4899_v41 = vadd.f32 %v1715_v37, %v1711_v38 }
0x12c2   :  { %v1678_v43 = vpop.permute.xlu0 %1677 }
0x12c3   :  { %v1680_v45 = vmul.f32 %v1678_v43, %v1675_v42  ;;  %v1722_v46 = vrot.slane %v4899_v41, 6 }
0x12c5   :  { %v4902_v49 = vadd.f32 %v1685_v44, %v1680_v45  ;;  %1723 = vrot.lane.b32.xlu1 %v1722_v46, %s4577_s16 }
0x12c7   :  { %1718 = vrot.lane.b32.xlu0 %v4902_v49, %s4576_s5 }
0x1337   :  { %v1724_v50 = vpop.permute.xlu1 %1723 }
0x1339   :  { %v1719_v51 = vpop.permute.xlu0 %1718 }
0x133a   :  { %v1726_v52 = vsel %vm56_vm0, %v1719_v51, %v1724_v50  ;;  %v4581_v50 = vmov 1966171168  }
0x133b   :  { %v1811_v54 = vrot.slane %v1726_v52, 4  ;;  %v1910_v35 = vrot.slane %v1726_v52, 6  ;;  %v300_v51 = vunpack.c.l.s4 %v4581_v50  ;;  %v302_v52 = vlaneseq }
0x133d   :  { %4250 = vmatmul.mubr.msk.f32.vlgmr.msra.gmra.mrb[6].mxu0 %vm39_vm2, %v1811_v54 }
0x133e   :  { %4301 = vmatprep.mubr.msk.f32.mxu0 %vm4572_vm1, %v4573_v8 }
0x1410   :  { %v1880_v58 = vpop.f32.mrb[6].mxu0 }
0x1411   :  { %v1881_v59 = vadd.f32 %v4705_v15, %v1880_v58  ;;  %v4251_v60 = vpop.f32.mrb[7].mxu0  ;;  %v143_v15 = vld [vmem:[%s5942_s1] sm:$0x3] }
0x1412   :  { %vm534_vm3 = vcmp.gt.s32.totalorder %v143_v15, 1  ;;  %vm537_vm4 = vcmp.gt.s32.totalorder %v143_v15, 6  ;;  %vm289_vm5 = vcmp.gt.s32.totalorder %v143_v15, 7  ;;  %vm1026_vm6 = vcmp.gt.s32.totalorder %v143_v15, 3 }
0x1413   :  { %1923 = vrot.lane.b32.xlu1 %v1881_v59, %s4574_s13  ;;  %v1885_v61 = vrot.slane %v1881_v59, 2  ;;  %v1916_v62 = vadd.f32 %v1881_v59, %v4716_v23  ;;  %v4045_v14 = vsel %vm534_vm3, 1.0, %v4573_v8  ;;  %v4046_v16 = vsel %vm537_vm4, 1.0, %v4573_v8 }
0x1414   :  { %vm781_vm7 = vcmp.gt.s32.totalorder %v143_v15, 2  ;;  %vm784_vm8 = vcmp.gt.s32.totalorder %v143_v15, 5  ;;  %v4041_v20 = vsel %vm289_vm5, 1.0, %v4573_v8  ;;  %v4055_v22 = vsel %vm1026_vm6, 1.0, %v4573_v8 }
0x1415   :  { %1894 = vrot.lane.b32.xlu0 %v1885_v61, %s4574_s13  ;;  %v1887_v0 = vadd.f32 %v1885_v61, %v4713_v21  ;;  %v4068_v1 = vmul.f32 -1.442695, %v1916_v62  ;;  %v4436_v25 = vpack.i.bf16 %v4046_v16, %v4045_v14  ;;  %vm286_vm9 = vcmp.gt.s32.totalorder %v143_v15, 0 }
0x1416   :  { %vm1029_vm10 = vcmp.gt.s32.totalorder %v143_v15, 4  ;;  %v4050_v26 = vsel %vm781_vm7, 1.0, %v4573_v8  ;;  %v4051_v28 = vsel %vm784_vm8, 1.0, %v4573_v8  ;;  %v4430_v29 = vpack.i.bf16 %v4055_v22, %v4041_v20 }
0x1417   :  { %v4067_v2 = vmul.f32 -1.442695, %v1887_v0  ;;  %4535 = vpow2.f32 %v4068_v1  ;;  %v4040_v30 = vsel %vm286_vm9, 1.0, %v4573_v8  ;;  %v4056_v31 = vsel %vm1029_vm10, 1.0, %v4573_v8 }
0x1418   :  { %v4441_v32 = vpack.i.bf16 %v4051_v28, %v4050_v26  ;;  %v4446_v34 = vpack.i.bf16 %v4056_v31, %v4040_v30  ;;  %v301_v60 = vunpack.c.0.s8 %v300_v51  ;;  %v4945_v61 = vshrl.u32 %v302_v52, 7 }
0x1419   :  { %4537 = vpow2.f32 %v4067_v2  ;;  %vm2874_vm3 = vcmask 64512   ;;  %vm3701_vm4 = vcmask 58368  }
0x141a   :  { %5979 = vst [vmem:[#allocation6_spill] sm:$0xff] %v4945_v61 }
0x1421   :  { %v4536_v4 = vpop.eup %4535 }
0x1422   :  { %v1920_v9 = vadd.f32 1.0, %v4536_v4 }
0x1423   :  { %v4538_v5 = vpop.eup %4537 }
0x1424   :  { %v1891_v10 = vadd.f32 1.0, %v4538_v5  ;;  %4539 = vrcp.f32 %v1920_v9 }
0x1426   :  { %4541 = vrcp.f32 %v1891_v10  ;;  %v4952_v10 = vsub.s32 %v301_v60, %v4945_v61 }
0x142e   :  { %v4919_v11 = vpop.eup %4539 }
0x1430   :  { %v4924_v12 = vpop.eup %4541 }
0x1485   :  { %v1924_v7 = vpop.permute.xlu1 %1923 }
0x1486   :  { %v1926_v17 = vmul.f32 %v4919_v11, %v1924_v7 }
0x1487   :  { %v1895_v18 = vpop.permute.xlu0 %1894 }
0x1488   :  { %v1897_v24 = vmul.f32 %v4924_v12, %v1895_v18  ;;  %1928 = vrot.lane.b32.xlu1 %v1926_v17, %s4575_s3 }
0x148a   :  { %1899 = vrot.lane.b32.xlu0 %v1897_v24, %s4575_s3 }
0x148c   :  { %4437 = vperm.xlu1 %4435, %v4436_v25  }
0x148e   :  { %4431 = vperm.xlu0 %4429, %v4430_v29  }
0x1490   :  { %4442 = vperm.xlu1 %4435, %v4441_v32  }
0x1492   :  { %4447 = vperm.xlu0 %4429, %v4446_v34  }
0x1496   :  { %1911 = vrot.lane.b32.xlu0 %v1910_v35, %s4579_s18 }
0x149a   :  { %1939 = vrot.lane.b32.xlu0 %v1811_v54, %s4578_s17  ;;  %s4582_s17 = smov 64  }
0x14fa   :  { %v1929_v36 = vpop.permute.xlu1 %1928 }
0x14fb   :  { %v1931_v40 = vadd.f32 %v1929_v36, %v4716_v23 }
0x14fc   :  { %v1900_v37 = vpop.permute.xlu0 %1899 }
0x14fd   :  { %v1902_v38 = vadd.f32 %v1900_v37, %v4713_v21 }
0x14ff   :  { %4543 = vtanh.f32 %v1902_v38 }
0x1500   :  { %4545 = vtanh.f32 %v1931_v40 }
0x1509   :  { %v4544_v42 = vpop.eup %4543 }
0x150a   :  { %1906 = vrot.lane.b32.xlu1 %v4544_v42, %s4576_s5  ;;  %v4546_v45 = vpop.eup %4545 }
0x150b   :  { %v4438_v43 = vpop.permute.xlu1 %4437 }
0x150c   :  { %v4440_v44 = vunpack.i.h.bf16 %v4438_v43  ;;  %v4439_v54 = vunpack.i.l.bf16 %v4438_v43 }
0x150d   :  { %v4432_v46 = vpop.permute.xlu0 %4431 }
0x150e   :  { %v4433_v56 = vunpack.i.l.bf16 %v4432_v46  ;;  %1935 = vrot.lane.b32.xlu1 %v4546_v45, %s4576_s5  ;;  %v4941_v21 = vrot.slane %v4440_v44, 4  ;;  %v4434_v62 = vunpack.i.h.bf16 %v4432_v46  ;;  %v544_v0 = vrot.slane %v4439_v54, 6 }
0x150f   :  { %v4443_v58 = vpop.permute.xlu1 %4442 }
0x1510   :  { %v4943_v23 = vrot.slane %v4433_v56, 2  ;;  %v4445_v59 = vunpack.i.h.bf16 %v4443_v58  ;;  %v4444_v2 = vunpack.i.l.bf16 %v4443_v58  ;;  %v594_v4 = vmul.f32 %v4941_v21, %v4758_v33 }
0x1511   :  { %v1036_v15 = vrot.slane %v4434_v62, 2  ;;  %v546_v7 = vmul.f32 %v544_v0, %v4761_v39  ;;  %v1768_v52 = vmul.f32 %v4899_v41, %v544_v0 }
0x1512   :  { %v344_v1 = vmul.f32 %v4943_v23, %v4729_v47  ;;  %v838_v5 = vrot.slane %v4445_v59, 6  ;;  %v791_v14 = vrot.slane %v4444_v2, 4  ;;  %v596_v16 = vcombine.high %v594_v4, %v594_v4  ;;  %v4959_v47 = vpop.permute.xlu0 %4447 }
0x1513   :  { %v1038_v20 = vmul.f32 %v1036_v15, %v4819_v13  ;;  %v4963_v33 = vrot.slane %v546_v7, %v4952_v10  ;;  %v1309_v22 = vmul.f32 %v4845_v57, %v1036_v15  ;;  %v4449_v39 = vunpack.i.l.bf16 %v4959_v47 }
0x1514   :  { %v346_v9 = vcombine.high %v344_v1, %v344_v1  ;;  %v840_v18 = vmul.f32 %v838_v5, %v4787_v19  ;;  %v793_v24 = vmul.f32 %v791_v14, %v4790_v27  ;;  %v4969_v25 = vrot.slane %v596_v16, %v4952_v10 }
0x1515   :  { %v4450_v19 = vunpack.i.h.bf16 %v4959_v47  ;;  %v297_v28 = vmul.f32 %v4449_v39, %v4732_v53  ;;  %v1040_v57 = vcombine.high %v1038_v20, %v1038_v20  ;;  %v4981_v27 = vsub.s32 0, %v4945_v61 }
0x1516   :  { %v4956_v17 = vrot.slane %v346_v9, %v4952_v10  ;;  %v4972_v26 = vrot.slane %v840_v18, %v4952_v10  ;;  %v1311_v30 = vcombine.high %v1309_v22, %v1309_v22  ;;  %v795_v31 = vcombine.high %v793_v24, %v793_v24 }
0x1517   :  { %v4984_v32 = vrot.slane %v297_v28, %v4952_v10  ;;  %v562_v34 = vrot.slane %v4963_v33, %v4952_v10  ;;  %v1086_v35 = vmul.f32 %v4450_v19, %v4816_v3  ;;  %v611_v53 = vrot.slane %v4969_v25, %v4952_v10 }
0x1518   :  { %v361_v13 = vrot.slane %v4956_v17, %v4952_v10  ;;  %v856_v37 = vrot.slane %v4972_v26, %v4952_v10  ;;  %v4997_v40 = vrot.slane %v1040_v57, %v4952_v10  ;;  %v5001_v42 = vrot.slane %v1311_v30, %v4952_v10 }
0x1519   :  { %v313_v38 = vrot.slane %v4984_v32, %v4952_v10  ;;  %v5004_v3 = vrot.slane %v795_v31, %v4952_v10  ;;  %v570_v44 = vcombine.high %v562_v34, %v562_v34  ;;  %v1540_v45 = vmul.f32 %v4874_v48, %v791_v14 }
0x151a   :  { %v369_v29 = vcombine.high %v361_v13, %v361_v13  ;;  %v5009_v46 = vrot.slane %v1086_v35, %v4952_v10  ;;  %v622_v50 = vrot.slane %v611_v53, %v4981_v27  ;;  %v864_v51 = vcombine.high %v856_v37, %v856_v37 }
0x151b   :  { %v324_v43 = vrot.slane %v313_v38, %v4981_v27  ;;  %v1498_v56 = vmul.f32 %v4877_v55, %v838_v5  ;;  %v1269_v54 = vmul.f32 %v4450_v19, %v4848_v63  ;;  %v575_v58 = vrot.slane %v570_v44, %v4981_v27 }
0x151c   :  { %v374_v36 = vrot.slane %v369_v29, %v4981_v27  ;;  %v810_v48 = vrot.slane %v5004_v3, %v4952_v10  ;;  %v1055_v59 = vrot.slane %v4997_v40, %v4952_v10  ;;  %v1542_v60 = vcombine.high %v1540_v45, %v1540_v45 }
0x151d   :  { %329 = vrot.lane.b32.xlu1 %v324_v43, %s4576_s5  ;;  %v869_v62 = vrot.slane %v864_v51, %v4981_v27  ;;  %v1102_v41 = vrot.slane %v5009_v46, %v4952_v10  ;;  %v1326_v55 = vrot.slane %v5001_v42, %v4952_v10  ;;  %v1727_v63 = vmul.f32 %v4902_v49, %v4941_v21 }
0x151e   :  { %379 = vrot.lane.b32.xlu0 %v374_v36, %s4577_s16  ;;  %v5032_v0 = vrot.slane %v1498_v56, %v4952_v10  ;;  %v5035_v1 = vrot.slane %v1269_v54, %v4952_v10  ;;  %v821_v2 = vrot.slane %v810_v48, %v4981_v27  ;;  %v1063_v4 = vcombine.high %v1055_v59, %v1055_v59 }
0x151f   :  { %v5039_v5 = vrot.slane %v1768_v52, %v4952_v10  ;;  %v5042_v9 = vrot.slane %v1542_v60, %v4952_v10  ;;  %v1113_v15 = vrot.slane %v1102_v41, %v4981_v27  ;;  %v1334_v49 = vcombine.high %v1326_v55, %v1326_v55 }
0x1520   :  { %v1729_v21 = vcombine.high %v1727_v63, %v1727_v63  ;;  %v1068_v7 = vrot.slane %v1063_v4, %v4981_v27  ;;  %v1285_v14 = vrot.slane %v5035_v1, %v4952_v10  ;;  %v1514_v16 = vrot.slane %v5032_v0, %v4952_v10 }
0x1521   :  { %580 = vrot.lane.b32.xlu1 %v575_v58, %s4576_s5  ;;  %v1339_v18 = vrot.slane %v1334_v49, %v4981_v27  ;;  %v1557_v20 = vrot.slane %v5042_v9, %v4952_v10  ;;  %v1784_v22 = vrot.slane %v5039_v5, %v4952_v10  ;;  %v354_v24 = vcombine.high %v4956_v17, %v4956_v17 }
0x1522   :  { %627 = vrot.lane.b32.xlu0 %v622_v50, %s4577_s16  ;;  %v5064_v19 = vrot.slane %v1729_v21, %v4952_v10  ;;  %v1296_v13 = vrot.slane %v1285_v14, %v4981_v27  ;;  %v1522_v28 = vcombine.high %v1514_v16, %v1514_v16  ;;  %v555_v17 = vcombine.high %v4963_v33, %v4963_v33 }
0x1523   :  { %v1568_v57 = vrot.slane %v1557_v20, %v4981_v27  ;;  %v1792_v29 = vcombine.high %v1784_v22, %v1784_v22  ;;  %v368_v30 = vrot.slane %v354_v24, %v4952_v10  ;;  %v306_v31 = vcombine.high %v4984_v32, %v4984_v32 }
0x1524   :  { %v1527_v34 = vrot.slane %v1522_v28, %v4981_v27  ;;  %v1744_v35 = vrot.slane %v5064_v19, %v4952_v10  ;;  %v849_v36 = vcombine.high %v4972_v26, %v4972_v26  ;;  %v604_v38 = vcombine.high %v4969_v25, %v4969_v25 }
0x1525   :  { %826 = vrot.lane.b32.xlu1 %v821_v2, %s4576_s5  ;;  %v1797_v53 = vrot.slane %v1792_v29, %v4981_v27  ;;  %v370_v37 = vcombine.high %v368_v30, %v368_v30  ;;  %v320_v32 = vrot.slane %v306_v31, %v4952_v10  ;;  %v569_v43 = vrot.slane %v555_v17, %v4952_v10 }
0x1526   :  { %874 = vrot.lane.b32.xlu0 %v869_v62, %s4577_s16  ;;  %v1755_v33 = vrot.slane %v1744_v35, %v4981_v27  ;;  %v618_v26 = vrot.slane %v604_v38, %v4952_v10  ;;  %v863_v45 = vrot.slane %v849_v36, %v4952_v10  ;;  %v1048_v25 = vcombine.high %v4997_v40, %v4997_v40 }
0x1527   :  { %v378_v44 = vrot.slane %v370_v37, %v4981_v27  ;;  %v803_v50 = vcombine.high %v5004_v3, %v5004_v3  ;;  %v328_v51 = vrot.slane %v320_v32, %v4981_v27  ;;  %v571_v52 = vcombine.high %v569_v43, %v569_v43 }
0x1528   :  { %v1319_v56 = vcombine.high %v5001_v42, %v5001_v42  ;;  %v1095_v54 = vcombine.high %v5009_v46, %v5009_v46  ;;  %v626_v58 = vrot.slane %v618_v26, %v4981_v27  ;;  %v865_v48 = vcombine.high %v863_v45, %v863_v45 }
0x1529   :  { %1073 = vrot.lane.b32.xlu1 %v1068_v7, %s4576_s5  ;;  %v579_v40 = vrot.slane %v571_v52, %v4981_v27  ;;  %v817_v3 = vrot.slane %v803_v50, %v4952_v10  ;;  %v1062_v59 = vrot.slane %v1048_v25, %v4952_v10  ;;  %v1507_v46 = vcombine.high %v5032_v0, %v5032_v0 }
0x152a   :  { %1118 = vrot.lane.b32.xlu0 %v1113_v15, %s4577_s16  ;;  %v873_v60 = vrot.slane %v865_v48, %v4981_v27  ;;  %v1109_v42 = vrot.slane %v1095_v54, %v4952_v10  ;;  %v1333_v62 = vrot.slane %v1319_v56, %v4952_v10  ;;  %v1278_v41 = vcombine.high %v5035_v1, %v5035_v1 }
0x152b   :  { %v825_v55 = vrot.slane %v817_v3, %v4981_v27  ;;  %v1064_v63 = vcombine.high %v1062_v59, %v1062_v59  ;;  %v1777_v2 = vcombine.high %v5039_v5, %v5039_v5  ;;  %v1550_v4 = vcombine.high %v5042_v9, %v5042_v9 }
0x152c   :  { %v1117_v15 = vrot.slane %v1109_v42, %v4981_v27  ;;  %v1335_v49 = vcombine.high %v1333_v62, %v1333_v62  ;;  %v1292_v1 = vrot.slane %v1278_v41, %v4952_v10  ;;  %v1521_v21 = vrot.slane %v1507_v46, %v4952_v10 }
0x152d   :  { %1301 = vrot.lane.b32.xlu1 %v1296_v13, %s4576_s5  ;;  %v1072_v0 = vrot.slane %v1064_v63, %v4981_v27  ;;  %v1564_v5 = vrot.slane %v1550_v4, %v4952_v10  ;;  %v1791_v14 = vrot.slane %v1777_v2, %v4952_v10  ;;  %v1737_v9 = vcombine.high %v5064_v19, %v5064_v19 }
0x152e   :  { %1344 = vrot.lane.b32.xlu0 %v1339_v18, %s4577_s16  ;;  %v1343_v7 = vrot.slane %v1335_v49, %v4981_v27  ;;  %v1300_v16 = vrot.slane %v1292_v1, %v4981_v27  ;;  %v1523_v18 = vcombine.high %v1521_v21, %v1521_v21  ;;  %v1904_v29 = vsub.f32 1.0, %v4924_v12 }
0x152f   :  { %v1572_v20 = vrot.slane %v1564_v5, %v4981_v27  ;;  %v1793_v22 = vcombine.high %v1791_v14, %v1791_v14  ;;  %v1751_v13 = vrot.slane %v1737_v9, %v4952_v10  ;;  %v1933_v36 = vsub.f32 1.0, %v4919_v11 }
0x1530   :  { %v1531_v24 = vrot.slane %v1523_v18, %v4981_v27 }
0x1531   :  { %1532 = vrot.lane.b32.xlu1 %v1527_v34, %s4576_s5  ;;  %v1801_v28 = vrot.slane %v1793_v22, %v4981_v27  ;;  %v1759_v19 = vrot.slane %v1751_v13, %v4981_v27 }
0x1532   :  { %1573 = vrot.lane.b32.xlu0 %v1568_v57, %s4577_s16  ;;  %v1912_v57 = vpop.permute.xlu0 %1911 }
0x1533   :  { %v1914_v17 = vmul.f32 %v4924_v12, %v1912_v57 }
0x1535   :  { %1760 = vrot.lane.b32.xlu1 %v1755_v33, %s4576_s5 }
0x1536   :  { %1802 = vrot.lane.b32.xlu0 %v1797_v53, %s4577_s16  ;;  %v1940_v34 = vpop.permute.xlu0 %1939 }
0x1537   :  { %v1942_v37 = vmul.f32 %v4919_v11, %v1940_v34  ;;  %v2032_v34 = vld [vmem:[#allocation2 + $0xa] sm:$0x1] }
0x1539   :  { %331 = vrot.lane.b32.xlu1 %v328_v51, %s4576_s5 }
0x153a   :  { %381 = vrot.lane.b32.xlu0 %v378_v44, %s4577_s16 }
0x153d   :  { %582 = vrot.lane.b32.xlu1 %v579_v40, %s4576_s5 }
0x153e   :  { %629 = vrot.lane.b32.xlu0 %v626_v58, %s4577_s16 }
0x1541   :  { %828 = vrot.lane.b32.xlu1 %v825_v55, %s4576_s5 }
0x1542   :  { %876 = vrot.lane.b32.xlu0 %v873_v60, %s4577_s16 }
0x1545   :  { %1075 = vrot.lane.b32.xlu1 %v1072_v0, %s4576_s5 }
0x1546   :  { %1120 = vrot.lane.b32.xlu0 %v1117_v15, %s4577_s16 }
0x1549   :  { %1303 = vrot.lane.b32.xlu1 %v1300_v16, %s4576_s5 }
0x154a   :  { %1346 = vrot.lane.b32.xlu0 %v1343_v7, %s4577_s16 }
0x154d   :  { %1534 = vrot.lane.b32.xlu1 %v1531_v24, %s4576_s5 }
0x154e   :  { %1575 = vrot.lane.b32.xlu0 %v1572_v20, %s4577_s16 }
0x1551   :  { %1762 = vrot.lane.b32.xlu1 %v1759_v19, %s4576_s5 }
0x1552   :  { %1804 = vrot.lane.b32.xlu0 %v1801_v28, %s4577_s16 }
0x157c   :  { %v1907_v30 = vpop.permute.xlu1 %1906 }
0x157d   :  { %v1909_v31 = vmul.f32 %v1907_v30, %v1904_v29 }
0x157f   :  { %v1915_v35 = vadd.f32 %v1914_v17, %v1909_v31  ;;  %v3312_v17 = vld [vmem:[%s5949_s8] sm:$0xff]  ;;  %v3313_v31 = vld [vmem:[%s5949_s8 + $0x8] sm:$0xff] }
0x1580   :  { %v1936_v53 = vpop.permute.xlu1 %1935 }
0x1581   :  { %v1944_v38 = vmul.f32 %v1915_v35, %v4943_v23  ;;  %v1938_v33 = vmul.f32 %v1936_v53, %v1933_v36  ;;  %v4386_v35 = vpack.c.bf16 %v3313_v31, %v3312_v17  ;;  %v2055_v53 = vld [vmem:[%s5947_s6] sm:$0xff] }
0x1583   :  { %v1946_v32 = vcombine.high %v1944_v38, %v1944_v38  ;;  %v1943_v43 = vadd.f32 %v1942_v37, %v1938_v33  ;;  %4387 = vmatpush3.bf16.msra.mxu0 %v4386_v35  ;;  %v2056_v37 = vld [vmem:[%s5947_s6 + $0x8] sm:$0xff]  ;;  %v2034_v38 = vld [vmem:[#allocation2 + $0x1a] sm:$0x1] }
0x1584   :  { %v4374_v33 = vpack.c.bf16 %v2056_v37, %v2055_v53  ;;  %4388 = vmatprep.subr.bf16.mxu0 %v5953_v6 }
0x1585   :  { %v1953_v44 = vrot.slane %v1946_v32, %v4952_v10  ;;  %v1987_v26 = vmul.f32 %v4449_v39, %v1943_v43  ;;  %v3314_v32 = vld [vmem:[%s5949_s8 + $0x10] sm:$0xff]  ;;  %v3315_v43 = vld [vmem:[%s5949_s8 + $0x18] sm:$0xff] }
0x1586   :  { %4375 = vmatpush3.bf16.msra.mxu1 %v4374_v33 }
0x1587   :  { %v1954_v45 = vcombine.high %v1953_v44, %v1953_v44  ;;  %v1961_v12 = vrot.slane %v1953_v44, %v4952_v10  ;;  %v1995_v25 = vrot.slane %v1987_v26, %v4952_v10  ;;  %v4389_v44 = vpack.c.bf16 %v3315_v43, %v3314_v32  ;;  %v2057_v26 = vld [vmem:[%s5947_s6 + $0x10] sm:$0xff]  ;;  %4376 = vmatprep.subr.bf16.mxu1 %v5953_v6 }
0x1589   :  { %v1996_v50 = vcombine.high %v1995_v25, %v1995_v25  ;;  %v2003_v51 = vrot.slane %v1995_v25, %v4952_v10  ;;  %v1969_v52 = vcombine.high %v1961_v12, %v1961_v12  ;;  %v1968_v11 = vrot.slane %v1954_v45, %v4952_v10  ;;  %v2058_v45 = vld [vmem:[%s5947_s6 + $0x18] sm:$0xff]  ;;  %v3316_v12 = vld [vmem:[%s5949_s8 + $0x20] sm:$0xff]  ;;  %4390 = vmatpush3.bf16.msra.mxu0 %v4389_v44 }
0x158a   :  { %4391 = vmatprep.subr.bf16.mxu0 %v5953_v6 }
0x158b   :  { %v1974_v23 = vrot.slane %v1969_v52, %v4981_v27  ;;  %v2014_v56 = vrot.slane %v2003_v51, %v4981_v27  ;;  %v1970_v54 = vcombine.high %v1968_v11, %v1968_v11  ;;  %v2010_v58 = vrot.slane %v1996_v50, %v4952_v10  ;;  %v3317_v51 = vld [vmem:[%s5949_s8 + $0x28] sm:$0xff] }
0x158c   :  { %v4377_v50 = vpack.c.bf16 %v2058_v45, %v2057_v26  ;;  %v4392_v52 = vpack.c.bf16 %v3317_v51, %v3316_v12 }
0x158d   :  { %1979 = vrot.lane.b32.xlu1 %v1974_v23, %s4576_s5  ;;  %2019 = vrot.lane.b32.xlu0 %v2014_v56, %s4577_s16  ;;  %v1978_v47 = vrot.slane %v1970_v54, %v4981_v27  ;;  %v2018_v39 = vrot.slane %v2010_v58, %v4981_v27  ;;  %v2059_v56 = vld [vmem:[%s5947_s6 + $0x20] sm:$0xff]  ;;  %v2060_v54 = vld [vmem:[%s5947_s6 + $0x28] sm:$0xff] }
0x158e   :  { %4378 = vmatpush3.bf16.msra.mxu1 %v4377_v50  ;;  %4393 = vmatpush3.bf16.msra.mxu0 %v4392_v52  ;;  %v3318_v58 = vld [vmem:[%s5949_s8 + $0x30] sm:$0xff] }
0x158f   :  { %v330_v40 = vpop.permute.xlu1 %329  ;;  %4379 = vmatprep.subr.bf16.mxu1 %v5953_v6  ;;  %4394 = vmatprep.subr.bf16.mxu0 %v5953_v6 }
0x1590   :  { %v380_v48 = vpop.permute.xlu0 %379  ;;  %336 = vst.msk [vmem:[#allocation2 + $0x2] sm:$0x1] %vm335_vm13, %v330_v40  ;;  %v2062_v40 = vld [vmem:[%s5947_s6 + $0x38] sm:$0xff] }
0x1591   :  { %1981 = vrot.lane.b32.xlu1 %v1978_v47, %s4576_s5  ;;  %2021 = vrot.lane.b32.xlu0 %v2018_v39, %s4577_s16  ;;  %386 = vst.msk [vmem:[#allocation2 + $0x9] sm:$0x1] %vm385_vm12, %v380_v48  ;;  %v4380_v47 = vpack.c.bf16 %v2060_v54, %v2059_v56  ;;  %v3319_v39 = vld [vmem:[%s5949_s8 + $0x38] sm:$0xff]  ;;  %v2061_v48 = vld [vmem:[%s5947_s6 + $0x30] sm:$0xff] }
0x1593   :  { %v581_v59 = vpop.permute.xlu1 %580  ;;  %4381 = vmatpush3.bf16.msra.mxu1 %v4380_v47 }
0x1594   :  { %v628_v3 = vpop.permute.xlu0 %627  ;;  %586 = vst.msk [vmem:[#allocation2 + $0x3] sm:$0x1] %vm335_vm13, %v581_v59  ;;  %v3320_v59 = vld [vmem:[%s5949_s8 + $0x40] sm:$0xff]  ;;  %4382 = vmatprep.subr.bf16.mxu1 %v5953_v6 }
0x1595   :  { %633 = vst.msk [vmem:[#allocation2 + $0x8] sm:$0x1] %vm385_vm12, %v628_v3  ;;  %v4395_v3 = vpack.c.bf16 %v3319_v39, %v3318_v58 }
0x1597   :  { %v827_v42 = vpop.permute.xlu1 %826  ;;  %4396 = vmatpush3.bf16.msra.mxu0 %v4395_v3 }
0x1598   :  { %v875_v60 = vpop.permute.xlu0 %874  ;;  %832 = vst.msk [vmem:[#allocation2 + $0x4] sm:$0x1] %vm335_vm13, %v827_v42  ;;  %v3269_v42 = vld [vmem:[#allocation2 + $0xa] sm:$0x3]  ;;  %4397 = vmatprep.subr.bf16.mxu0 %v5953_v6 }
0x1599   :  { %880 = vst.msk [vmem:[#allocation2 + $0x7] sm:$0x1] %vm385_vm12, %v875_v60  ;;  %v3321_v60 = vld [vmem:[%s5949_s8 + $0x48] sm:$0xff] }
0x159b   :  { %v1074_v46 = vpop.permute.xlu1 %1073 }
0x159c   :  { %v1119_v62 = vpop.permute.xlu0 %1118  ;;  %1079 = vst.msk [vmem:[#allocation2 + $0x5] sm:$0x1] %vm335_vm13, %v1074_v46  ;;  %v4398_v46 = vpack.c.bf16 %v3321_v60, %v3320_v59 }
0x159d   :  { %1124 = vst.msk [vmem:[#allocation2 + $0x6] sm:$0x1] %vm385_vm12, %v1119_v62  ;;  %v4383_v62 = vpack.c.bf16 %v2062_v40, %v2061_v48 }
0x159e   :  { %4399 = vmatpush3.bf16.msra.mxu0 %v4398_v46 }
0x159f   :  { %v1302_v55 = vpop.permute.xlu1 %1301  ;;  %4384 = vmatpush3.bf16.msra.mxu1 %v4383_v62  ;;  %4400 = vmatprep.subr.bf16.mxu0 %v5953_v6 }
0x15a0   :  { %v1345_v41 = vpop.permute.xlu0 %1344  ;;  %1307 = vst.msk [vmem:[#allocation2 + $0x6] sm:$0x1] %vm335_vm13, %v1302_v55  ;;  %v3322_v55 = vld [vmem:[%s5949_s8 + $0x50] sm:$0xff]  ;;  %4403 = vmatprep.subr.bf16.mxu1 %v5953_v6 }
0x15a1   :  { %1350 = vst.msk [vmem:[#allocation2 + $0x5] sm:$0x1] %vm385_vm12, %v1345_v41 }
0x15a3   :  { %v1533_v2 = vpop.permute.xlu1 %1532 }
0x15a4   :  { %v1574_v63 = vpop.permute.xlu0 %1573  ;;  %1538 = vst.msk [vmem:[#allocation2 + $0x7] sm:$0x1] %vm335_vm13, %v1533_v2  ;;  %v3271_v2 = vld [vmem:[#allocation2 + $0x1a] sm:$0x3] }
0x15a5   :  { %1579 = vst.msk [vmem:[#allocation2 + $0x4] sm:$0x1] %vm385_vm12, %v1574_v63  ;;  %v3323_v63 = vld [vmem:[%s5949_s8 + $0x58] sm:$0xff] }
0x15a7   :  { %v1761_v15 = vpop.permute.xlu1 %1760 }
0x15a8   :  { %v1803_v4 = vpop.permute.xlu0 %1802  ;;  %1766 = vst.msk [vmem:[#allocation2 + $0x8] sm:$0x1] %vm335_vm13, %v1761_v15 }
0x15a9   :  { %1808 = vst.msk [vmem:[#allocation2 + $0x3] sm:$0x1] %vm385_vm12, %v1803_v4  ;;  %v4401_v4 = vpack.c.bf16 %v3323_v63, %v3322_v55 }
0x15ab   :  { %v332_v0 = vpop.permute.xlu1 %331  ;;  %4402 = vmatpush3.bf16.msra.mxu0 %v4401_v4 }
0x15ac   :  { %v382_v49 = vpop.permute.xlu0 %381  ;;  %337 = vst.msk [vmem:[#allocation2 + $0x12] sm:$0x1] %vm335_vm13, %v332_v0 }
0x15ad   :  { %387 = vst.msk [vmem:[#allocation2 + $0x19] sm:$0x1] %vm385_vm12, %v382_v49 }
0x15af   :  { %v583_v21 = vpop.permute.xlu1 %582 }
0x15b0   :  { %v630_v1 = vpop.permute.xlu0 %629  ;;  %587 = vst.msk [vmem:[#allocation2 + $0x13] sm:$0x1] %vm335_vm13, %v583_v21  ;;  %v4583_v21 = vmov 1983009808  }
0x15b1   :  { %634 = vst.msk [vmem:[#allocation2 + $0x18] sm:$0x1] %vm385_vm12, %v630_v1 }
0x15b3   :  { %v829_v5 = vpop.permute.xlu1 %828 }
0x15b4   :  { %v877_v7 = vpop.permute.xlu0 %876  ;;  %833 = vst.msk [vmem:[#allocation2 + $0x14] sm:$0x1] %vm335_vm13, %v829_v5 }
0x15b5   :  { %881 = vst.msk [vmem:[#allocation2 + $0x17] sm:$0x1] %vm385_vm12, %v877_v7  ;;  %v3336_v7 = vunpack.c.l.s4 %v4583_v21 }
0x15b7   :  { %v1076_v9 = vpop.permute.xlu1 %1075  ;;  %v3337_v17 = vunpack.c.0.s8 %v3336_v7 }
0x15b8   :  { %v1121_v14 = vpop.permute.xlu0 %1120  ;;  %1080 = vst.msk [vmem:[#allocation2 + $0x15] sm:$0x1] %vm335_vm13, %v1076_v9 }
0x15b9   :  { %1125 = vst.msk [vmem:[#allocation2 + $0x16] sm:$0x1] %vm385_vm12, %v1121_v14  ;;  %v5304_v62 = vsub.s32 %v3337_v17, %v4945_v61 }
0x15bb   :  { %v1304_v18 = vpop.permute.xlu1 %1303 }
0x15bc   :  { %v1347_v16 = vpop.permute.xlu0 %1346  ;;  %1308 = vst.msk [vmem:[#allocation2 + $0x16] sm:$0x1] %vm335_vm13, %v1304_v18 }
0x15bd   :  { %1351 = vst.msk [vmem:[#allocation2 + $0x15] sm:$0x1] %vm385_vm12, %v1347_v16 }
0x15bf   :  { %v1535_v22 = vpop.permute.xlu1 %1534 }
0x15c0   :  { %v1576_v20 = vpop.permute.xlu0 %1575  ;;  %1539 = vst.msk [vmem:[#allocation2 + $0x17] sm:$0x1] %vm335_vm13, %v1535_v22 }
0x15c1   :  { %1580 = vst.msk [vmem:[#allocation2 + $0x14] sm:$0x1] %vm385_vm12, %v1576_v20 }
0x15c3   :  { %v1763_v13 = vpop.permute.xlu1 %1762 }
0x15c4   :  { %v1805_v24 = vpop.permute.xlu0 %1804  ;;  %1767 = vst.msk [vmem:[#allocation2 + $0x18] sm:$0x1] %vm335_vm13, %v1763_v13 }
0x15c5   :  { %1809 = vst.msk [vmem:[#allocation2 + $0x13] sm:$0x1] %vm385_vm12, %v1805_v24 }
0x15ff   :  { %v1980_v28 = vpop.permute.xlu1 %1979  ;;  %v2020_v19 = vpop.permute.xlu0 %2019 }
0x1600   :  { %1985 = vst.msk [vmem:[#allocation2 + $0x9] sm:$0x1] %vm335_vm13, %v1980_v28 }
0x1601   :  { %2025 = vst.msk [vmem:[#allocation2 + $0x2] sm:$0x1] %vm385_vm12, %v2020_v19 }
0x1603   :  { %v1982_v57 = vpop.permute.xlu1 %1981  ;;  %v2022_v29 = vpop.permute.xlu0 %2021 }
0x1604   :  { %1986 = vst.msk [vmem:[#allocation2 + $0x19] sm:$0x1] %vm335_vm13, %v1982_v57 }
0x1605   :  { %2026 = vst.msk [vmem:[#allocation2 + $0x12] sm:$0x1] %vm385_vm12, %v2022_v29 }
0x1607   :  { %v3265_v23 = vld [vmem:[#allocation2 + $0x9] sm:$0x3] }
0x1608   :  { %v2031_v30 = vld [vmem:[#allocation2 + $0x2] sm:$0xff] }
0x1609   :  { %2039 = vrot.lane.b32.xlu1 %v2031_v30, %s4575_s3  ;;  %v3264_v25 = vld [vmem:[#allocation2 + $0x1] sm:$0xff]  ;;  %v2028_v16 = vld [vmem:[#allocation2 + $0x9] sm:$0x1] }
0x160b   :  { %v3267_v41 = vld [vmem:[#allocation2 + $0x19] sm:$0x3] }
0x160c   :  { %v2033_v36 = vld [vmem:[#allocation2 + $0x12] sm:$0xff] }
0x160d   :  { %2043 = vrot.lane.b32.xlu0 %v2033_v36, %s4575_s3  ;;  %2041 = vrot.lane.b32.xlu1 %v2032_v34, %s4575_s3  ;;  %v3266_v11 = vld [vmem:[#allocation2 + $0x11] sm:$0xff]  ;;  %v2030_v53 = vld [vmem:[#allocation2 + $0x19] sm:$0x1] }
0x1611   :  { %2045 = vrot.lane.b32.xlu0 %v2034_v38, %s4575_s3  ;;  %3276 = vrot.lane.b32.xlu1 %v3264_v25, %s4575_s3 }
0x1615   :  { %3292 = vrot.lane.b32.xlu0 %v2031_v30, %s4582_s17  ;;  %3280 = vrot.lane.b32.xlu1 %v3266_v11, %s4575_s3 }
0x1619   :  { %3296 = vrot.lane.b32.xlu0 %v2033_v36, %s4582_s17  ;;  %3278 = vrot.lane.b32.xlu1 %v3265_v23, %s4575_s3 }
0x161d   :  { %3294 = vrot.lane.b32.xlu0 %v3269_v42, %s4582_s17  ;;  %3282 = vrot.lane.b32.xlu1 %v3267_v41, %s4575_s3 }
0x1621   :  { %3298 = vrot.lane.b32.xlu0 %v3271_v2, %s4582_s17  ;;  %v3260_v2 = vld [vmem:[#allocation2] sm:$0xff] }
0x167b   :  { %v2040_v15 = vpop.permute.xlu1 %2039 }
0x167c   :  { %v2051_v49 = vsel %vm39_vm2, %v3264_v25, %v2040_v15 }
0x167d   :  { %v2073_v0 = vcombine.high %v2051_v49, %v2051_v49  ;;  %v2080_v1 = vrot.slane %v2051_v49, %v4952_v10 }
0x167f   :  { %v2087_v5 = vrot.slane %v2073_v0, %v4952_v10  ;;  %v2088_v14 = vcombine.high %v2080_v1, %v2080_v1  ;;  %v2044_v9 = vpop.permute.xlu0 %2043  ;;  %v2042_v18 = vpop.permute.xlu1 %2041  ;;  %v2096_v13 = vrot.slane %v2080_v1, %v4952_v10  ;;  %v3262_v0 = vld [vmem:[#allocation2 + $0x10] sm:$0xff] }
0x1680   :  { %v2053_v20 = vsel %vm39_vm2, %v3266_v11, %v2044_v9  ;;  %v2052_v22 = vsel %vm39_vm2, %v2028_v16, %v2042_v18 }
0x1681   :  { %v2089_v24 = vcombine.high %v2087_v5, %v2087_v5  ;;  %v2110_v28 = vrot.slane %v2088_v14, %v4952_v10  ;;  %v2136_v19 = vcombine.high %v2053_v20, %v2053_v20  ;;  %v2103_v57 = vrot.slane %v2087_v5, %v4952_v10 }
0x1682   :  { %v2143_v29 = vrot.slane %v2053_v20, %v4952_v10  ;;  %v2128_v30 = vrot.slane %v2052_v22, %v4952_v10 }
0x1683   :  { %v2117_v31 = vrot.slane %v2089_v24, %v4952_v10  ;;  %v2248_v34 = vcombine.low %v2096_v13, %v2110_v28  ;;  %v4070_v35 = vcombine.high %v2096_v13, %v2110_v28  ;;  %v2150_v36 = vrot.slane %v2136_v19, %v4952_v10  ;;  %v2046_v37 = vpop.permute.xlu0 %2045  ;;  %v3277_v38 = vpop.permute.xlu1 %3276 }
0x1684   :  { %v2151_v33 = vcombine.high %v2143_v29, %v2143_v29  ;;  %v2159_v32 = vrot.slane %v2143_v29, %v4952_v10  ;;  %v2135_v43 = vrot.slane %v2128_v30, %v4952_v10  ;;  %v2054_v44 = vsel %vm39_vm2, %v2030_v53, %v2046_v37 }
0x1685   :  { %v2250_v26 = vcombine.low %v2103_v57, %v2117_v31  ;;  %v4071_v45 = vcombine.high %v2103_v57, %v2117_v31  ;;  %v2258_v12 = vrot.slane %v2248_v34, %v4952_v10  ;;  %v2265_v25 = vrot.slane %v4070_v35, %v4952_v10  ;;  %v3261_v57 = vld [vmem:[#allocation2 + $0x8] sm:$0x3] }
0x1686   :  { %v2152_v50 = vcombine.high %v2150_v36, %v2150_v36  ;;  %v2166_v51 = vrot.slane %v2150_v36, %v4952_v10  ;;  %v2173_v52 = vrot.slane %v2151_v33, %v4952_v10  ;;  %v2181_v11 = vcombine.high %v2159_v32, %v2159_v32 }
0x1687   :  { %v2272_v23 = vrot.slane %v2250_v26, %v4952_v10  ;;  %v2279_v56 = vrot.slane %v4071_v45, %v4952_v10  ;;  %v2280_v54 = vcombine.low %v2258_v12, %v2265_v25  ;;  %v2297_v58 = vcombine.low %v2135_v43, %v2159_v32  ;;  %v3293_v47 = vpop.permute.xlu0 %3292  ;;  %v3281_v39 = vpop.permute.xlu1 %3280  ;;  %v3263_v26 = vld [vmem:[#allocation2 + $0x18] sm:$0x3] }
0x1688   :  { %v2180_v48 = vrot.slane %v2152_v50, %v4952_v10  ;;  %v2182_v40 = vcombine.high %v2166_v51, %v2166_v51  ;;  %v2183_v3 = vcombine.high %v2173_v52, %v2173_v52  ;;  %v2298_v59 = vcombine.low %v2173_v52, %v2181_v11 }
0x1689   :  { %v2281_v60 = vcombine.low %v2272_v23, %v2279_v56  ;;  %v2191_v42 = vrot.slane %v2054_v44, %v4952_v10  ;;  %v2288_v46 = vrot.slane %v2280_v54, %v4952_v10  ;;  %v2307_v4 = vrot.slane %v2297_v58, %v4952_v10 }
0x168a   :  { %v2299_v41 = vcombine.low %v2183_v3, %v2166_v51  ;;  %v2300_v55 = vcombine.low %v2180_v48, %v2182_v40  ;;  %v2314_v63 = vrot.slane %v2298_v59, %v4952_v10  ;;  %v2184_v15 = vcombine.high %v2180_v48, %v2180_v48 }
0x168b   :  { %v3304_v49 = vsel %vm39_vm2, %v3260_v2, %v3277_v38  ;;  %v3297_v1 = vpop.permute.xlu0 %3296  ;;  %v3279_v21 = vpop.permute.xlu1 %3278  ;;  %v2295_v7 = vrot.slane %v2281_v60, %v4952_v10  ;;  %v3306_v16 = vsel %vm39_vm2, %v3262_v0, %v3281_v39  ;;  %v2198_v18 = vrot.slane %v2191_v42, %v4952_v10 }
0x168c   :  { %v2321_v5 = vrot.slane %v2299_v41, %v4952_v10  ;;  %v2328_v14 = vrot.slane %v2300_v55, %v4952_v10  ;;  %v3308_v9 = vsel %vm2477_vm14, %v3304_v49, %v3293_v47  ;;  %v3310_v24 = vsel %vm2477_vm14, %v3306_v16, %v3297_v1  ;;  %v4069_v55 = vld [vmem:[%s5948_s7] ss:$0 sm:$0xff] }
0x168d   :  { %v3334_v20 = vcombine.high %v3308_v9, %v3308_v9  ;;  %v3341_v22 = vrot.slane %v3308_v9, %v5304_v62  ;;  %v2329_v13 = vcombine.low %v2307_v4, %v2314_v63  ;;  %v3358_v28 = vcombine.high %v3310_v24, %v3310_v24 }
0x168e   :  { %v3365_v19 = vrot.slane %v3310_v24, %v5304_v62  ;;  %v2296_v29 = vcombine.low %v2288_v46, %v2295_v7  ;;  %v3305_v31 = vsel %vm39_vm2, %v3261_v57, %v3279_v21  ;;  %v2330_v35 = vcombine.low %v2321_v5, %v2328_v14  ;;  %v4077_v21 = vld [vmem:[%s5950_s9] ss:$0 sm:$0xff] }
0x168f   :  { %v3348_v30 = vrot.slane %v3334_v20, %v5304_v62  ;;  %v3349_v17 = vcombine.high %v3341_v22, %v3341_v22  ;;  %v3295_v34 = vpop.permute.xlu0 %3294  ;;  %v2346_v36 = vcombine.low %v2184_v15, %v2198_v18  ;;  %v3372_v53 = vrot.slane %v3358_v28, %v5304_v62  ;;  %v3283_v33 = vpop.permute.xlu1 %3282 }
0x1690   :  { %v3373_v37 = vcombine.high %v3365_v19, %v3365_v19  ;;  %v3309_v38 = vsel %vm2477_vm14, %v3305_v31, %v3295_v34  ;;  %4269 = vmatmul.mubr.msk.f32.vlgmr.msra.gmra.mrb[10].mxu1 %vm2477_vm14, %v2296_v29  ;;  %v2337_v45 = vrot.slane %v2329_v13, %v4952_v10  ;;  %v2344_v12 = vrot.slane %v2330_v35, %v4952_v10 }
0x1691   :  { %v3350_v32 = vcombine.high %v3348_v30, %v3348_v30  ;;  %v3399_v43 = vcombine.low %v3341_v22, %v3349_v17  ;;  %v3357_v44 = vrot.slane %v3309_v38, %v5304_v62  ;;  %4271 = vmatprep.mubr.msk.f32.mxu1 %vm4572_vm1, %v4573_v8  ;;  %v3307_v52 = vsel %vm39_vm2, %v3263_v26, %v3283_v33 }
0x1692   :  { %v3417_v50 = vcombine.low %v3373_v37, %v3372_v53  ;;  %v2353_v23 = vrot.slane %v2346_v36, %v4952_v10  ;;  %v2345_v54 = vcombine.low %v2337_v45, %v2344_v12  ;;  %v3374_v60 = vcombine.high %v3372_v53, %v3372_v53 }
0x1693   :  { %v3400_v25 = vcombine.low %v3348_v30, %v3350_v32  ;;  %v3416_v51 = vcombine.low %v3357_v44, %v3365_v19  ;;  %v3299_v11 = vpop.permute.xlu0 %3298  ;;  %v3407_v58 = vrot.slane %v3399_v43, %v5304_v62  ;;  %v2199_v63 = vcombine.high %v4069_v55, %v4069_v55 }
0x1694   :  { %v3311_v56 = vsel %vm2477_vm14, %v3307_v52, %v3299_v11  ;;  %4272 = vmatmul.mubr.msk.f32.gmra.mrb[12].mxu1 %vm2477_vm14, %v2345_v54  ;;  %v3431_v40 = vrot.slane %v3417_v50, %v5304_v62  ;;  %v2360_v59 = vrot.slane %v2353_v23, %v4952_v10  ;;  %v2206_v2 = vrot.slane %v4069_v55, %v4952_v10 }
0x1695   :  { %v3414_v47 = vrot.slane %v3400_v25, %v5304_v62  ;;  %v3424_v39 = vrot.slane %v3416_v51, %v5304_v62  ;;  %v3381_v3 = vrot.slane %v3311_v56, %v5304_v62  ;;  %4274 = vmatprep.mubr.msk.f32.mxu1 %vm4572_vm1, %v4573_v8  ;;  %v2213_v4 = vrot.slane %v2199_v63, %v4952_v10 }
0x1696   :  { %v2214_v15 = vcombine.high %v2206_v2, %v2206_v2  ;;  %v2222_v0 = vrot.slane %v2206_v2, %v4952_v10  ;;  %v3382_v16 = vcombine.high %v4077_v21, %v4077_v21  ;;  %v3389_v29 = vrot.slane %v4077_v21, %v5304_v62 }
0x1697   :  { %v3415_v48 = vcombine.low %v3407_v58, %v3414_v47  ;;  %v3432_v42 = vcombine.low %v3424_v39, %v3431_v40  ;;  %v3433_v46 = vcombine.low %v3374_v60, %v3381_v3  ;;  %v2215_v49 = vcombine.high %v2213_v4, %v2213_v4 }
0x1698   :  { %4275 = vmatmul.mubr.msk.f32.gmra.mrb[14].mxu1 %vm2477_vm14, %v2360_v59  ;;  %v2229_v1 = vrot.slane %v2213_v4, %v4952_v10  ;;  %v2244_v5 = vcombine.high %v2222_v0, %v2222_v0  ;;  %v2410_v13 = vcombine.low %v2222_v0, %v2222_v0  ;;  %v3396_v30 = vrot.slane %v3382_v16, %v5304_v62 }
0x1699   :  { %4302 = vmatmul.mubr.msk.f32.vlgmr.msra.gmra.mrb[8].mxu0 %vm3486_vm15, %v3415_v48  ;;  %4318 = vmatprep.mubr.msk.f32.mxu1 %vm4572_vm1, %v4573_v8  ;;  %v3440_v41 = vrot.slane %v3433_v46, %v5304_v62  ;;  %v2243_v7 = vrot.slane %v2215_v49, %v4952_v10  ;;  %v3397_v33 = vcombine.high %v3389_v29, %v3389_v29  ;;  %v5392_v46 = vadd.s32 8, %v4945_v61 }
0x169a   :  { %4304 = vmatprep.mubr.msk.f32.mxu0 %vm4572_vm1, %v4573_v8  ;;  %v2245_v14 = vcombine.high %v2229_v1, %v2229_v1  ;;  %v2420_v36 = vrot.slane %v2410_v13, %v4952_v10  ;;  %v3398_v32 = vcombine.high %v3396_v30, %v3396_v30  ;;  %v3458_v52 = vcombine.low %v3389_v29, %v3389_v29 }
0x169b   :  { %v2363_v22 = vcombine.low %v2229_v1, %v2243_v7  ;;  %v4073_v24 = vcombine.high %v2229_v1, %v2243_v7  ;;  %v2247_v43 = vcombine.high %v2243_v7, %v2243_v7  ;;  %v3441_v25 = vcombine.low %v3389_v29, %v3397_v33  ;;  %5980 = vst [vmem:[#allocation7_spill] sm:$0xff] %v5392_v46 }
0x169c   :  { %v2413_v57 = vcombine.low %v2243_v7, %v2245_v14  ;;  %v3442_v50 = vcombine.low %v3396_v30, %v3398_v32  ;;  %v3459_v11 = vcombine.low %v3397_v33, %v3396_v30  ;;  %v5386_v40 = vrot.slane %v3458_v52, %v5304_v62 }
0x169d   :  { %4305 = vmatmul.mubr.msk.f32.gmra.mrb[10].mxu0 %vm3486_vm15, %v3432_v42  ;;  %v2385_v34 = vrot.slane %v2363_v22, %v4952_v10  ;;  %v2392_v35 = vrot.slane %v4073_v24, %v4952_v10  ;;  %v2459_v51 = vcombine.low %v2247_v43, %v2222_v0  ;;  %v5379_v47 = vrot.slane %v3441_v25, %v5304_v62 }
0x169e   :  { %4307 = vmatprep.mubr.msk.f32.mxu0 %vm4572_vm1, %v4573_v8  ;;  %v2236_v8 = vrot.slane %v2214_v15, %v4952_v10  ;;  %v2441_v38 = vrot.slane %v2413_v57, %v4952_v10  ;;  %v5382_v39 = vrot.slane %v3442_v50, %v5304_v62  ;;  %v5389_v3 = vrot.slane %v3459_v11, %v5304_v62 }
0x169f   :  { %v2394_v26 = vcombine.low %v2385_v34, %v2392_v35  ;;  %v2466_v48 = vrot.slane %v2459_v51, %v4952_v10  ;;  %v3475_v59 = vcombine.low %v3398_v32, %v3389_v29  ;;  %v3034_v63 = vsub.s32 1, %v4945_v61 }
0x16a0   :  { %v2246_v9 = vcombine.high %v2236_v8, %v2236_v8  ;;  %v2361_v18 = vcombine.low %v2222_v0, %v2236_v8  ;;  %v4072_v20 = vcombine.high %v2222_v0, %v2236_v8  ;;  %v2411_v28 = vcombine.low %v2236_v8, %v2244_v5 }
0x16a1   :  { %4308 = vmatmul.mubr.msk.f32.gmra.mrb[12].mxu0 %vm3486_vm15, %v3440_v41  ;;  %v2408_v56 = vrot.slane %v2394_v26, %v4952_v10  ;;  %v4584_v41 = vmov 269488144   ;;  %v3038_v2 = vsub.s32 2, %v4945_v61  ;;  %v3457_v4 = vcombine.low %v5379_v47, %v5382_v39 }
0x16a2   :  { %v2412_v19 = vcombine.low %v2246_v9, %v2229_v1  ;;  %v2371_v17 = vrot.slane %v2361_v18, %v4952_v10  ;;  %v2378_v31 = vrot.slane %v4072_v20, %v4952_v10  ;;  %v2427_v53 = vrot.slane %v2411_v28, %v4952_v10 }
0x16a3   :  { %v3774_v55 = vunpack.c.l.s4 %v4584_v41  ;;  %v5399_v15 = vrot.slane %v2466_v48, %v4952_v10  ;;  %v5403_v0 = vrot.slane %v4945_v61, %v4981_v27  ;;  %v3042_v1 = vsub.s32 3, %v4945_v61 }
0x16a4   :  { %v2434_v37 = vrot.slane %v2412_v19, %v4952_v10  ;;  %v2393_v44 = vcombine.low %v2371_v17, %v2378_v31  ;;  %v2442_v45 = vcombine.low %v2420_v36, %v2427_v53  ;;  %v3474_v8 = vcombine.low %v5386_v40, %v5389_v3 }
0x16a5   :  { %v5409_v21 = vrot.slane %v3475_v59, %v5304_v62  ;;  %v5413_v14 = vrot.slane %v5392_v46, %v4981_v27  ;;  %v3046_v9 = vsub.s32 4, %v4945_v61  ;;  %v3050_v16 = vsub.s32 5, %v4945_v61 }
0x16a6   :  { %v2443_v12 = vcombine.low %v2434_v37, %v2441_v38  ;;  %v2401_v23 = vrot.slane %v2393_v44, %v4952_v10  ;;  %v2450_v54 = vrot.slane %v2442_v45, %v4952_v10  ;;  %v3054_v18 = vsub.s32 6, %v4945_v61 }
0x16a7   :  { %v3775_v20 = vunpack.c.0.s8 %v3774_v55  ;;  %v5420_v13 = vrot.slane %v4945_v61, %v3034_v63  ;;  %v5423_v28 = vrot.slane %v4945_v61, %v3038_v2  ;;  %v5426_v19 = vrot.slane %v4945_v61, %v3042_v1 }
0x16a8   :  { %v2457_v58 = vrot.slane %v2443_v12, %v4952_v10  ;;  %v2409_v60 = vcombine.low %v2401_v23, %v2408_v56  ;;  %v4585_v57 = vmov 842150450   ;;  %v4586_v30 = vmov 1414812756  }
0x16a9   :  { %v5429_v29 = vunpack.c.l.s4 %v4585_v57  ;;  %v5431_v17 = vunpack.c.l.s4 %v4586_v30  ;;  %v5438_v53 = vrot.slane %v4945_v61, %v3046_v9  ;;  %v5441_v37 = vrot.slane %v4945_v61, %v3050_v16 }
0x16aa   :  { %v2458_v42 = vcombine.low %v2450_v54, %v2457_v58  ;;  %v5444_v38 = vrot.slane %v4945_v61, %v3054_v18  ;;  %v5447_v33 = vsub.s32 %v3775_v20, %v4945_v61  ;;  %v4587_v51 = vmov 1987475062  }
0x16ab   :  { %v3782_v50 = vunpack.c.0.s8 %v5429_v29  ;;  %v5459_v52 = vunpack.c.l.s4 %v4587_v51  ;;  %vm2876_vm1 = vcmask 57344   ;;  %vm3918_vm14 = vcmask 1041409  }
0x16ad   :  { %v5988_v29 = vunpack.c.0.s8 %v5459_v52 }
0x1763   :  { %v2550_v49 = vpop.f32.mrb[10].mxu1 }
0x1764   :  { %v2551_v7 = vadd.f32 %v2550_v49, %v2409_v60  ;;  %v4270_v5 = vpop.f32.mrb[11].mxu1 }
0x1766   :  { %v2567_v22 = vcombine.high %v2551_v7, %v2551_v7  ;;  %v2574_v24 = vrot.slane %v2551_v7, %v4952_v10 }
0x1767   :  { %v2555_v36 = vpop.f32.mrb[12].mxu1 }
0x1768   :  { %v2581_v31 = vrot.slane %v2567_v22, %v4952_v10  ;;  %v2582_v34 = vcombine.high %v2574_v24, %v2574_v24  ;;  %v5435_v35 = vrot.slane %v2574_v24, %v4952_v10  ;;  %v4273_v45 = vpop.f32.mrb[13].mxu1  ;;  %v2556_v25 = vadd.f32 %v2555_v36, %v2458_v42 }
0x176a   :  { %v2583_v32 = vcombine.high %v2581_v31, %v2581_v31  ;;  %v5450_v43 = vrot.slane %v2581_v31, %v4952_v10  ;;  %v5453_v44 = vrot.slane %v2582_v34, %v4952_v10  ;;  %v2612_v26 = vcombine.high %v5435_v35, %v5435_v35 }
0x176b   :  { %v5961_v12 = vmax.f32 %v5435_v35, 0.0  ;;  %v2616_v60 = vcombine.high %v2556_v25, %v2556_v25  ;;  %v2623_v42 = vrot.slane %v2556_v25, %v4952_v10  ;;  %v2560_v55 = vpop.f32.mrb[14].mxu1 }
0x176c   :  { %v5462_v11 = vrot.slane %v2583_v32, %v4952_v10  ;;  %v2613_v23 = vcombine.high %v5450_v43, %v5450_v43  ;;  %v2614_v56 = vcombine.high %v5453_v44, %v5453_v44  ;;  %v5959_v54 = vmax.f32 %v5453_v44, 0.0  ;;  %v3559_v58 = vpop.f32.mrb[8].mxu0  ;;  %v4276_v7 = vpop.f32.mrb[15].mxu1 }
0x176d   :  { %v5469_v48 = vmax.f32 %v2612_v26, 0.0  ;;  %v5958_v59 = vmax.f32 %v5450_v43, 0.0  ;;  %v4303_v41 = vpop.f32.mrb[9].mxu0  ;;  %v2630_v9 = vrot.slane %v2616_v60, %v4952_v10  ;;  %v2631_v16 = vcombine.high %v2623_v42, %v2623_v42 }
0x176e   :  { %v2615_v63 = vcombine.high %v5462_v11, %v5462_v11  ;;  %v5475_v2 = vmax.f32 %v2614_v56, 0.0  ;;  %v5957_v49 = vmax.f32 %v5462_v11, 0.0  ;;  %v5478_v1 = vmax.f32 %v2613_v23, 0.0 }
0x176f   :  { %v2744_v5 = vcombine.low %v5961_v12, %v5959_v54  ;;  %v5486_v18 = vrot.slane %v2623_v42, %v4952_v10  ;;  %v3560_v57 = vadd.f32 %v3559_v58, %v3457_v4  ;;  %v2632_v34 = vcombine.high %v2630_v9, %v2630_v9 }
0x1770   :  { %v5488_v20 = vmax.f32 %v2615_v63, 0.0  ;;  %v2745_v22 = vcombine.low %v5469_v48, %v5475_v2  ;;  %v2746_v24 = vcombine.low %v5958_v59, %v5957_v49  ;;  %v3564_v30 = vpop.f32.mrb[10].mxu0  ;;  %v5501_v36 = vrot.slane %v2630_v9, %v4952_v10 }
0x1771   :  { %v2754_v31 = vrot.slane %v2744_v5, %v4952_v10  ;;  %v5504_v32 = vrot.slane %v2631_v16, %v4952_v10  ;;  %v4306_v26 = vpop.f32.mrb[11].mxu0  ;;  %v2661_v47 = vcombine.high %v5486_v18, %v5486_v18  ;;  %v5513_v39 = vrot.slane %v2632_v34, %v4952_v10 }
0x1772   :  { %v2747_v45 = vcombine.low %v5478_v1, %v5488_v20  ;;  %v2761_v25 = vrot.slane %v2745_v22, %v4952_v10  ;;  %v2768_v51 = vrot.slane %v2746_v24, %v4952_v10  ;;  %v2662_v4 = vcombine.high %v5501_v36, %v5501_v36 }
0x1773   :  { %v2663_v23 = vcombine.high %v5504_v32, %v5504_v32  ;;  %v5960_v56 = vmax.f32 %v5486_v18, 0.0  ;;  %v5955_v42 = vmax.f32 %v5504_v32, 0.0  ;;  %v5522_v41 = vmax.f32 %v2661_v47, 0.0 }
0x1774   :  { %v2775_v58 = vrot.slane %v2747_v45, %v4952_v10  ;;  %v2776_v60 = vcombine.low %v2754_v31, %v2761_v25  ;;  %v3569_v63 = vpop.f32.mrb[12].mxu0  ;;  %v5954_v5 = vmax.f32 %v5501_v36, 0.0  ;;  %v5956_v9 = vmax.f32 %v5513_v39, 0.0 }
0x1775   :  { %v5524_v7 = vmax.f32 %v2663_v23, 0.0  ;;  %v5528_v16 = vmax.f32 %v2662_v4, 0.0  ;;  %v4309_v22 = vpop.f32.mrb[13].mxu0  ;;  %v2799_v34 = vrot.slane %v5960_v56, %v4952_v10  ;;  %v2807_v31 = vcombine.low %v5955_v42, %v5522_v41 }
0x1776   :  { %v2777_v24 = vcombine.low %v2768_v51, %v2775_v58  ;;  %v3576_v25 = vcombine.high %v3560_v57, %v3560_v57  ;;  %v5541_v47 = vrot.slane %v3560_v57, %v5304_v62  ;;  %v2784_v4 = vrot.slane %v2776_v60, %v4952_v10 }
0x1777   :  { %v2808_v45 = vcombine.low %v5524_v7, %v5954_v5  ;;  %v5547_v58 = vrot.slane %v2799_v34, %v4952_v10  ;;  %v2561_v22 = vadd.f32 %v2560_v55, %v5399_v15  ;;  %v2809_v6 = vcombine.low %v5956_v9, %v5528_v16 }
0x1778   :  { %v2791_v23 = vrot.slane %v2777_v24, %v4952_v10  ;;  %v2817_v5 = vrot.slane %v2807_v31, %v4952_v10  ;;  %v5555_v57 = vrot.slane %v3576_v25, %v5304_v62  ;;  %v3591_v42 = vcombine.high %v5541_v47, %v5541_v47 }
0x1779   :  { %5981 = vst [vmem:[#allocation8_spill] sm:$0xff] %v5547_v58  ;;  %v2824_v24 = vrot.slane %v2808_v45, %v4952_v10  ;;  %v2664_v34 = vcombine.high %v5513_v39, %v5513_v39  ;;  %v2671_v15 = vrot.slane %v2561_v22, %v4952_v10  ;;  %v2877_v55 = vsel %vm2876_vm1, %v5547_v58, -inf }
0x177a   :  { %v5559_v60 = vcombine.low %v2784_v4, %v2791_v23  ;;  %v3592_v31 = vcombine.high %v5555_v57, %v5555_v57  ;;  %v5963_v25 = vmax.f32 %v5541_v47, 0.0  ;;  %v5570_v9 = vmax.f32 %v3591_v42, 0.0 }
0x177b   :  { %v2672_v23 = vcombine.high %v2671_v15, %v2671_v15  ;;  %v2679_v45 = vrot.slane %v2671_v15, %v4952_v10  ;;  %v5575_v49 = vmax.f32 %v2664_v34, 0.0  ;;  %v5962_v59 = vmax.f32 %v5555_v57, 0.0 }
0x177c   :  { %5982 = vst [vmem:[#allocation9_spill] sm:$0xff] %v5559_v60  ;;  %v2875_v4 = vsel %vm2874_vm3, %v5559_v60, -inf  ;;  %v5578_v54 = vmax.f32 %v3592_v31, 0.0  ;;  %v3648_v56 = vcombine.low %v5963_v25, %v5570_v9  ;;  %v2839_v42 = vcombine.low %v2817_v5, %v2824_v24 }
0x177d   :  { %v2878_v22 = vmax.f32 %v2875_v4, %v2877_v55  ;;  %v5584_v12 = vrot.slane %v2672_v23, %v4952_v10  ;;  %v5586_v27 = vmax.f32 %v2679_v45, 0.0  ;;  %v3565_v34 = vadd.f32 %v3564_v30, %v3474_v8 }
0x177e   :  { %v3649_v55 = vcombine.low %v5962_v59, %v5578_v54  ;;  %v2831_v31 = vrot.slane %v2809_v6, %v4952_v10  ;;  %v3570_v4 = vadd.f32 %v3569_v63, %v5409_v21  ;;  %v3656_v3 = vrot.slane %v3648_v56, %v5304_v62 }
0x177f   :  { %v2879_v15 = vrot.slane %v2878_v22, 4  ;;  %v5964_v5 = vmax.f32 %v5584_v12, 0.0  ;;  %v2810_v24 = vcombine.low %v5575_v49, %v5586_v27  ;;  %v3593_v23 = vcombine.high %v3565_v34, %v3565_v34 }
0x1780   :  { %v5600_v45 = vrot.slane %v3565_v34, %v5304_v62  ;;  %v3663_v8 = vrot.slane %v3649_v55, %v5304_v62  ;;  %v5605_v30 = vrot.slane %v3570_v4, %v5304_v62  ;;  %v5987_v60 = vunpack.c.0.s8 %v5431_v17 }
0x1781   :  { %v2880_v40 = vmax.f32 %v2878_v22, %v2879_v15  ;;  %v2838_v6 = vrot.slane %v2810_v24, %v4952_v10  ;;  %v2862_v21 = vrot.slane %v5964_v5, %v4952_v10  ;;  %v5612_v63 = vrot.slane %v3593_v23, %v5304_v62 }
0x1782   :  { %v3608_v34 = vcombine.high %v5600_v45, %v5600_v45  ;;  %v5616_v15 = vcombine.low %v3656_v3, %v3663_v8  ;;  %v5965_v56 = vmax.f32 %v5600_v45, 0.0  ;;  %v3617_v55 = vcombine.high %v5605_v30, %v5605_v30 }
0x1783   :  { %v2881_v22 = vrot.slane %v2880_v40, 2  ;;  %v2840_v4 = vcombine.low %v2831_v31, %v2838_v6  ;;  %v5622_v24 = vrot.slane %v2862_v21, %v4952_v10  ;;  %v3609_v59 = vcombine.high %v5612_v63, %v5612_v63 }
0x1784   :  { %5983 = vst [vmem:[#allocation10_spill] sm:$0xff] %v5616_v15  ;;  %v5626_v23 = vmax.f32 %v3608_v34, 0.0  ;;  %v5967_v5 = vmax.f32 %v5612_v63, 0.0  ;;  %v5632_v3 = vrot.slane %v5965_v56, %v5304_v62  ;;  %v3700_v8 = vsel %vm2874_vm3, %v5616_v15, -inf }
0x1785   :  { %5984 = vst [vmem:[#allocation11_spill] sm:$0xff] %v5622_v24  ;;  %v2882_v25 = vmax.f32 %v2880_v40, %v2881_v22  ;;  %v2847_v31 = vrot.slane %v2839_v42, %v4952_v10  ;;  %v2854_v6 = vrot.slane %v2840_v4, %v4952_v10  ;;  %v5638_v21 = vmax.f32 %v3609_v59, 0.0 }
0x1786   :  { %5985 = vst [vmem:[#allocation12_spill] sm:$0xff] %v5632_v3  ;;  %v5970_v34 = vmax.f32 %v5605_v30, 0.0  ;;  %v3672_v40 = vcombine.low %v5626_v23, %v5967_v5  ;;  %v3702_v22 = vsel %vm3701_vm4, %v5632_v3, -inf  ;;  %v3785_v56 = vsub.s32 %v3782_v50, %v4945_v61 }
0x1787   :  { %v2883_v51 = vrot.slane %v2882_v25, 1  ;;  %v5649_v26 = vcombine.low %v2847_v31, %v2854_v6  ;;  %v3703_v42 = vmax.f32 %v3700_v8, %v3702_v22  ;;  %v5651_v4 = vmax.f32 %v3617_v55, 0.0 }
0x1788   :  { %v3673_v59 = vcombine.low %v5638_v21, %v5970_v34  ;;  %v2886_v5 = vsel %vm2876_vm1, %v5622_v24, -inf  ;;  %v3792_v3 = vsub.s32 %v5987_v60, %v4945_v61  ;;  %v3799_v50 = vsub.s32 %v5988_v29, %v4945_v61 }
0x1789   :  { %5986 = vst [vmem:[#allocation13_spill] sm:$0xff] %v5649_v26  ;;  %v5656_v58 = vmax.f32 %v2882_v25, %v2883_v51  ;;  %v2885_v55 = vsel %vm2874_vm3, %v5649_v26, -inf  ;;  %v3680_v8 = vrot.slane %v3672_v40, %v5304_v62  ;;  %v3704_v31 = vrot.slane %v3703_v42, 4 }
0x178a   :  { %v3687_v51 = vrot.slane %v3673_v59, %v5304_v62  ;;  %v2887_v6 = vmax.f32 %v2885_v55, %v2886_v5  ;;  %v5989_v60 = vsub.s32 7, %v4945_v61  ;;  %v5681_v29 = vrot.slane %v4945_v61, %v5447_v33 }
0x178b   :  { %v2903_v25 = vrot.slane %v5656_v58, %v4952_v10  ;;  %v2896_v17 = vcombine.high %v5656_v58, %v5656_v58  ;;  %v3705_v22 = vmax.f32 %v3703_v42, %v3704_v31  ;;  %v5687_v59 = vrot.slane %v5651_v4, %v5304_v62 }
0x178c   :  { %v5677_v52 = vrot.slane %v4945_v61, %v5989_v60  ;;  %v5683_v40 = vcombine.low %v3680_v8, %v3687_v51  ;;  %v2888_v34 = vrot.slane %v2887_v6, 4  ;;  %v5692_v60 = vrot.slane %v4945_v61, %v3785_v56 }
0x178d   :  { %5990 = vst [vmem:[#allocation14_spill] sm:$0xff] %v5687_v59  ;;  %v2911_v5 = vcombine.high %v2903_v25, %v2903_v25  ;;  %v2919_v55 = vrot.slane %v2903_v25, %v4952_v10  ;;  %v2910_v15 = vrot.slane %v2896_v17, %v4952_v10  ;;  %v5695_v42 = vrot.slane %v4945_v61, %v3792_v3 }
0x178e   :  { %v5698_v31 = vrot.slane %v4945_v61, %v3799_v50  ;;  %v5702_v8 = vrot.slane %v5392_v46, %v5447_v33  ;;  %v5991_v25 = vmax.f32 %v5435_v35, 0.0  ;;  %v5994_v56 = vmax.f32 %v5486_v18, 0.0 }
0x178f   :  { %v2933_v51 = vrot.slane %v2911_v5, %v4952_v10  ;;  %v2941_v26 = vcombine.high %v2919_v55, %v2919_v55  ;;  %v2889_v50 = vmax.f32 %v2887_v6, %v2888_v34  ;;  %v2912_v24 = vcombine.high %v2910_v15, %v2910_v15 }
0x1790   :  { %vm5707_vm5 = vcmp.eq.f32.partialorder %v5991_v25, %v2919_v55  ;;  %vm5713_vm6 = vcmp.eq.f32.partialorder %v5994_v56, %v2919_v55  ;;  %v3706_v61 = vrot.slane %v3705_v22, 2  ;;  %v3711_v33 = vsel %vm3701_vm4, %v5687_v59, -inf }
0x1791   :  { %v2943_v5 = vcombine.high %v2933_v51, %v2933_v51  ;;  %v5997_v46 = vmax.f32 %v5453_v44, 0.0  ;;  %vm3012_vm8 = vcmp.eq.f32.partialorder %v5469_v48, %v2941_v26  ;;  %v3710_v35 = vsel %vm2874_vm3, %v5683_v40, -inf }
0x1792   :  { %v3064_v18 = vsel %vm5707_vm5, %v5403_v0, 9  ;;  %v2890_v6 = vrot.slane %v2889_v50, 2  ;;  %v2926_v55 = vrot.slane %v2910_v15, %v4952_v10  ;;  %v3066_v25 = vsel %vm3012_vm8, %v5423_v28, 9 }
0x1793   :  { %vm3011_vm7 = vcmp.eq.f32.partialorder %v5997_v46, %v2933_v51  ;;  %vm3013_vm9 = vcmp.eq.f32.partialorder %v5475_v2, %v2943_v5  ;;  %v2940_v46 = vrot.slane %v2912_v24, %v4952_v10  ;;  %v5998_v56 = vmax.f32 %v5450_v43, 0.0 }
0x1794   :  { %v3065_v34 = vsel %vm3011_vm7, %v5420_v13, 9  ;;  %v3067_v48 = vsel %vm3013_vm9, %v5426_v19, 9  ;;  %v2891_v26 = vmax.f32 %v2889_v50, %v2890_v6  ;;  %v2942_v51 = vcombine.high %v2926_v55, %v2926_v55 }
0x1795   :  { %v3082_v44 = vcombine.low %v3064_v18, %v3065_v34  ;;  %vm3014_vm10 = vcmp.eq.f32.partialorder %v5998_v56, %v2926_v55  ;;  %v3072_v17 = vsel %vm5713_vm6, %v5413_v14, 9  ;;  %v3083_v59 = vcombine.low %v3066_v25, %v3067_v48 }
0x1796   :  { %v2944_v2 = vcombine.high %v2940_v46, %v2940_v46  ;;  %v2892_v5 = vrot.slane %v2891_v26, 1  ;;  %v5999_v18 = vmax.f32 %v5462_v11, 0.0  ;;  %vm3016_vm12 = vcmp.eq.f32.partialorder %v5478_v1, %v2942_v51 }
0x1797   :  { %v3092_v15 = vrot.slane %v3082_v44, %v4952_v10  ;;  %v3068_v24 = vsel %vm3014_vm10, %v5438_v53, 9  ;;  %v3099_v50 = vrot.slane %v3083_v59, %v4952_v10  ;;  %v3070_v3 = vsel %vm3016_vm12, %v5444_v38, 9 }
0x1798   :  { %vm3015_vm11 = vcmp.eq.f32.partialorder %v5999_v18, %v2940_v46  ;;  %vm3017_vm13 = vcmp.eq.f32.partialorder %v5488_v20, %v2944_v2  ;;  %v2893_v34 = vmax.f32 %v2891_v26, %v2892_v5  ;;  %v3707_v25 = vmax.f32 %v3705_v22, %v3706_v61 }
0x1799   :  { %v3069_v43 = vsel %vm3015_vm11, %v5441_v37, 9  ;;  %v3071_v6 = vsel %vm3017_vm13, %v5677_v52, 9  ;;  %v3114_v44 = vcombine.low %v3092_v15, %v3099_v50  ;;  %v3137_v11 = vrot.slane %v3072_v17, %v4952_v10 }
0x179a   :  { %v3084_v55 = vcombine.low %v3068_v24, %v3069_v43  ;;  %v3085_v46 = vcombine.low %v3070_v3, %v3071_v6  ;;  %v3712_v1 = vmax.f32 %v3710_v35, %v3711_v33  ;;  %v2945_v48 = vcombine.high %v2893_v34, %v2893_v34 }
0x179b   :  { %v2952_v51 = vrot.slane %v2893_v34, %v4952_v10  ;;  %v3708_v59 = vrot.slane %v3707_v25, 1  ;;  %v5754_v26 = vsel %vm3918_vm14, %v2893_v34, %v5656_v58  ;;  %v3144_v35 = vrot.slane %v3137_v11, %v4952_v10 }
0x179c   :  { %v3106_v20 = vrot.slane %v3084_v55, %v4952_v10  ;;  %v3113_v56 = vrot.slane %v3085_v46, %v4952_v10  ;;  %v3713_v2 = vrot.slane %v3712_v1, 4  ;;  %v2959_v61 = vrot.slane %v2945_v48, %v4952_v10 }
0x179d   :  { %v2960_v22 = vcombine.high %v2952_v51, %v2952_v51  ;;  %v2968_v17 = vrot.slane %v2952_v51, %v4952_v10  ;;  %v5758_v33 = vmax.f32 %v3707_v25, %v3708_v59  ;;  %v3122_v5 = vrot.slane %v3114_v44, %v4952_v10 }
0x179e   :  { %v3115_v15 = vcombine.low %v3106_v20, %v3113_v56  ;;  %v5762_v18 = vmax.f32 %v3712_v1, %v3713_v2  ;;  %v2961_v24 = vcombine.high %v2959_v61, %v2959_v61  ;;  %v2975_v50 = vrot.slane %v2959_v61, %v4952_v10 }
0x179f   :  { %v2982_v58 = vrot.slane %v2960_v22, %v4952_v10  ;;  %v2990_v43 = vcombine.high %v2968_v17, %v2968_v17  ;;  %v6000_v3 = vmax.f32 %v5504_v32, 0.0  ;;  %v6003_v6 = vmax.f32 %v5584_v12, 0.0 }
0x17a0   :  { %v3129_v25 = vrot.slane %v3115_v15, %v4952_v10  ;;  %v3721_v44 = vcombine.high %v5758_v33, %v5758_v33  ;;  %v2989_v11 = vrot.slane %v2961_v24, %v4952_v10  ;;  %v2991_v46 = vcombine.high %v2975_v50, %v2975_v50 }
0x17a1   :  { %vm5768_vm15 = vcmp.eq.f32.partialorder %v6000_v3, %v2968_v17  ;;  %vm5774_vm5 = vcmp.eq.f32.partialorder %v6003_v6, %v2968_v17  ;;  %v2992_v1 = vcombine.high %v2982_v58, %v2982_v58  ;;  %vm3020_vm6 = vcmp.eq.f32.partialorder %v5522_v41, %v2982_v58 }
0x17a2   :  { %vm5784_vm7 = vcmp.eq.f32.partialorder %v5524_v7, %v2990_v43  ;;  %v6008_v12 = vmax.f32 %v5513_v39, 0.0  ;;  %v3073_v51 = vsel %vm5768_vm15, %v5403_v0, 9  ;;  %v3074_v59 = vsel %vm3020_vm6, %v5420_v13, 9 }
0x17a3   :  { %v2993_v20 = vcombine.high %v2989_v11, %v2989_v11  ;;  %v6011_v41 = vmax.f32 %v5501_v36, 0.0  ;;  %vm3024_vm10 = vcmp.eq.f32.partialorder %v5528_v16, %v2989_v11  ;;  %vm3025_vm11 = vcmp.eq.f32.partialorder %v5575_v49, %v2991_v46  ;;  %v3942_v11 = vld [vmem:[%s5951_s10 + $0x8] sm:$0xff] }
0x17a4   :  { %vm5790_vm8 = vcmp.eq.f32.partialorder %v6008_v12, %v2975_v50  ;;  %v3075_v39 = vsel %vm5784_vm7, %v5423_v28, 9  ;;  %v3078_v13 = vsel %vm3024_vm10, %v5441_v37, 9  ;;  %v3079_v36 = vsel %vm3025_vm11, %v5444_v38, 9 }
0x17a5   :  { %vm3022_vm9 = vcmp.eq.f32.partialorder %v6011_v41, %v2992_v1  ;;  %v3077_v0 = vsel %vm5790_vm8, %v5438_v53, 9  ;;  %vm3026_vm12 = vcmp.eq.f32.partialorder %v5586_v27, %v2993_v20  ;;  %v3081_v49 = vsel %vm5774_vm5, %v5413_v14, 9 }
0x17a6   :  { %v3076_v7 = vsel %vm3022_vm9, %v5426_v19, 9  ;;  %v3130_v16 = vcombine.low %v3122_v5, %v3129_v25  ;;  %v3080_v56 = vsel %vm3026_vm12, %v5677_v52, 9  ;;  %v3145_v28 = vcombine.low %v3073_v51, %v3074_v59 }
0x17a7   :  { %v3146_v2 = vcombine.low %v3075_v39, %v3076_v7  ;;  %v3147_v19 = vcombine.low %v3077_v0, %v3078_v13  ;;  %v3209_v61 = vsel %vm2876_vm1, %v3144_v35, 2147483647  ;;  %v3148_v22 = vcombine.low %v3079_v36, %v3080_v56 }
0x17a8   :  { %v3208_v53 = vsel %vm2874_vm3, %v3130_v16, 2147483647  ;;  %v3728_v27 = vrot.slane %v5758_v33, %v5304_v62  ;;  %v3155_v37 = vrot.slane %v3145_v28, %v4952_v10  ;;  %v3200_v14 = vrot.slane %v3081_v49, %v4952_v10 }
0x17a9   :  { %v3162_v38 = vrot.slane %v3146_v2, %v4952_v10  ;;  %vm3210_vm13 = vcmp.lt.s32.totalorder %v3208_v53, %v3209_v61  ;;  %v3169_v52 = vrot.slane %v3147_v19, %v4952_v10  ;;  %v3176_v17 = vrot.slane %v3148_v22, %v4952_v10 }
0x17aa   :  { %v3735_v15 = vrot.slane %v3721_v44, %v5304_v62  ;;  %v3736_v35 = vcombine.high %v3728_v27, %v3728_v27  ;;  %v6012_v24 = vmax.f32 %v5541_v47, 0.0  ;;  %v6015_v58 = vmax.f32 %v5600_v45, 0.0  ;;  %v3941_v45 = vld [vmem:[%s5951_s10] sm:$0xff] }
0x17ab   :  { %v3177_v5 = vcombine.low %v3155_v37, %v3162_v38  ;;  %v3715_v3 = vrot.slane %v5762_v18, 2  ;;  %v3178_v34 = vcombine.low %v3169_v52, %v3176_v17  ;;  %v3207_v47 = vrot.slane %v3200_v14, %v4952_v10 }
0x17ac   :  { %vm5828_vm15 = vcmp.eq.f32.partialorder %v6012_v24, %v3728_v27  ;;  %vm5834_vm5 = vcmp.eq.f32.partialorder %v6015_v58, %v3728_v27  ;;  %v3737_v6 = vcombine.high %v3735_v15, %v3735_v15  ;;  %vm3764_vm6 = vcmp.eq.f32.partialorder %v5570_v9, %v3736_v35 }
0x17ad   :  { %v3185_v55 = vrot.slane %v3177_v5, %v4952_v10  ;;  %v6018_v25 = vmax.f32 %v5555_v57, 0.0  ;;  %v3809_v44 = vsel %vm3764_vm6, %v5692_v60, 10  ;;  %v3192_v46 = vrot.slane %v3178_v34, %v4952_v10  ;;  %v3943_v10 = vld [vmem:[%s5951_s10 + $0x10] sm:$0xff] }
0x17ae   :  { %vm3766_vm8 = vcmp.eq.f32.partialorder %v5578_v54, %v3737_v6  ;;  %v3808_v9 = vsel %vm5828_vm15, %v5681_v29, 10  ;;  %v3812_v57 = vsel %vm5834_vm5, %v5702_v8, 10  ;;  %v3716_v48 = vmax.f32 %v5762_v18, %v3715_v3  ;;  %v3944_v54 = vld [vmem:[%s5951_s10 + $0x18] sm:$0xff]  ;;  %s4588_s10 = smov 8  }
0x17af   :  { %vm3765_vm7 = vcmp.eq.f32.partialorder %v6018_v25, %v3735_v15  ;;  %v3811_v32 = vsel %vm3766_vm8, %v5698_v31, 10  ;;  %v3818_v12 = vcombine.low %v3808_v9, %v3809_v44  ;;  %v3193_v51 = vcombine.low %v3185_v55, %v3192_v46  ;;  %v6023_v46 = vld [vmem:[#allocation7_spill] sm:$0xff] }
0x17b0   :  { %v3810_v1 = vsel %vm3765_vm7, %v5695_v42, 10  ;;  %v3211_v20 = vsel %vm3210_vm13, %v3208_v53, %v3209_v61  ;;  %v4404_v41 = vpack.c.bf16 %v3942_v11, %v3941_v45  ;;  %v3222_v39 = vsel %vm2876_vm1, %v3207_v47, 2147483647  ;;  %v6022_v11 = vld [vmem:[#allocation6_spill] sm:$0xff] }
0x17b1   :  { %v3819_v59 = vcombine.low %v3810_v1, %v3811_v32  ;;  %v3841_v7 = vrot.slane %v3812_v57, %v5304_v62  ;;  %v3717_v0 = vrot.slane %v3716_v48, 1  ;;  %v3212_v13 = vrot.slane %v3211_v20, 4  ;;  %v6024_v57 = vld [vmem:[#allocation11_spill] sm:$0xff] }
0x17b2   :  { %v3221_v18 = vsel %vm2874_vm3, %v3193_v51, 2147483647  ;;  %v3826_v36 = vrot.slane %v3818_v12, %v5304_v62  ;;  %4405 = vmatpush3.bf16.msra.mxu1 %v4404_v41  ;;  %v4407_v16 = vpack.c.bf16 %v3944_v54, %v3943_v10  ;;  %v6019_v28 = vmov 0.0|0.0  }
0x17b3   :  { %v3833_v49 = vrot.slane %v3819_v59, %v5304_v62  ;;  %vm3223_vm9 = vcmp.lt.s32.totalorder %v3221_v18, %v3222_v39  ;;  %v3718_v56 = vmax.f32 %v3716_v48, %v3717_v0  ;;  %vm3213_vm10 = vcmp.lt.s32.totalorder %v3211_v20, %v3212_v13  ;;  %4406 = vmatprep.subr.bf16.mxu1 %v6019_v28  ;;  %v6025_v48 = vld [vmem:[#allocation13_spill] sm:$0xff] }
0x17b4   :  { %v3224_v2 = vsel %vm3223_vm9, %v3221_v18, %v3222_v39  ;;  %v3214_v61 = vsel %vm3213_vm10, %v3211_v20, %v3212_v13  ;;  %v3867_v14 = vsel %vm3701_vm4, %v3841_v7, 2147483647  ;;  %v6020_v58 = vmax.f32 %v5612_v63, 0.0  ;;  %v6026_v7 = vld [vmem:[#allocation10_spill] sm:$0xff]  ;;  %v6027_v13 = vld [vmem:[#allocation12_spill] sm:$0xff] }
0x17b5   :  { %v3834_v19 = vcombine.low %v3826_v36, %v3833_v49  ;;  %v3225_v22 = vrot.slane %v3224_v2, 4  ;;  %v3738_v53 = vcombine.high %v3718_v56, %v3718_v56  ;;  %v3745_v27 = vrot.slane %v3718_v56, %v5304_v62 }
0x17b6   :  { %v3927_v37 = vsel %vm3918_vm14, %v3718_v56, %v5758_v33  ;;  %v3215_v52 = vrot.slane %v3214_v61, 2  ;;  %4408 = vmatpush3.bf16.msra.mxu1 %v4407_v16  ;;  %v6028_v56 = vld [vmem:[#allocation9_spill] sm:$0xff] }
0x17b7   :  { %v3866_v38 = vsel %vm2874_vm3, %v3834_v19, 2147483647  ;;  %3928 = vrot.lane.b32.xlu0 %v3927_v37, %s4579_s18  ;;  %vm3226_vm11 = vcmp.lt.s32.totalorder %v3224_v2, %v3225_v22  ;;  %v3752_v17 = vrot.slane %v3738_v53, %v5304_v62  ;;  %v3753_v15 = vcombine.high %v3745_v27, %v3745_v27  ;;  %v6029_v19 = vld [vmem:[#allocation8_spill] sm:$0xff]  ;;  %s4589_s18 = smov 24  }
0x17b8   :  { %vm3868_vm12 = vcmp.lt.s32.totalorder %v3866_v38, %v3867_v14  ;;  %v3227_v35 = vsel %vm3226_vm11, %v3224_v2, %v3225_v22  ;;  %vm3768_vm13 = vcmp.eq.f32.partialorder %v5626_v23, %v3745_v27  ;;  %vm3772_vm15 = vcmp.eq.f32.partialorder %v5651_v4, %v3745_v27 }
0x17b9   :  { %v3869_v5 = vsel %vm3868_vm12, %v3866_v38, %v3867_v14  ;;  %v3228_v33 = vrot.slane %v3227_v35, 2  ;;  %v3754_v50 = vcombine.high %v3752_v17, %v3752_v17  ;;  %vm3769_vm5 = vcmp.eq.f32.partialorder %v6020_v58, %v3753_v15 }
0x17ba   :  { %v3870_v24 = vrot.slane %v3869_v5, 4  ;;  %vm3770_vm6 = vcmp.eq.f32.partialorder %v5638_v21, %v3752_v17  ;;  %v3813_v43 = vsel %vm3768_vm13, %v5681_v29, 10  ;;  %v3814_v3 = vsel %vm3769_vm5, %v5692_v60, 10 }
0x17bb   :  { %v3817_v34 = vsel %vm3772_vm15, %v5702_v8, 10  ;;  %vm3229_vm7 = vcmp.lt.s32.totalorder %v3227_v35, %v3228_v33  ;;  %v6021_v23 = vmax.f32 %v5605_v30, 0.0  ;;  %v3815_v4 = vsel %vm3770_vm6, %v5695_v42, 10 }
0x17bc   :  { %vm3871_vm8 = vcmp.lt.s32.totalorder %v3869_v5, %v3870_v24  ;;  %v3230_v6 = vsel %vm3229_vm7, %v3227_v35, %v3228_v33  ;;  %v3842_v47 = vcombine.low %v3813_v43, %v3814_v3  ;;  %v3865_v29 = vrot.slane %v3817_v34, %v5304_v62 }
0x17bd   :  { %vm3771_vm9 = vcmp.eq.f32.partialorder %v6021_v23, %v3754_v50  ;;  %v3872_v55 = vsel %vm3871_vm8, %v3869_v5, %v3870_v24  ;;  %v3231_v25 = vrot.slane %v3230_v6, 1  ;;  %vm3216_vm10 = vcmp.lt.s32.totalorder %v3214_v61, %v3215_v52 }
0x17be   :  { %v3816_v63 = vsel %vm3771_vm9, %v5698_v31, 10  ;;  %v3873_v21 = vrot.slane %v3872_v55, 2  ;;  %v3850_v60 = vrot.slane %v3842_v47, %v5304_v62  ;;  %v3217_v42 = vsel %vm3216_vm10, %v3214_v61, %v3215_v52 }
0x17bf   :  { %v3843_v44 = vcombine.low %v3815_v4, %v3816_v63  ;;  %vm3232_vm11 = vcmp.lt.s32.totalorder %v3230_v6, %v3231_v25  ;;  %v3880_v32 = vsel %vm3701_vm4, %v3865_v29, 2147483647  ;;  %v3218_v12 = vrot.slane %v3217_v42, 1 }
0x17c0   :  { %vm3874_vm12 = vcmp.lt.s32.totalorder %v3872_v55, %v3873_v21  ;;  %v3233_v8 = vsel %vm3232_vm11, %v3230_v6, %v3231_v25  ;;  %v6030_v6 = vld [vmem:[#allocation14_spill] sm:$0xff] }
0x17c1   :  { %v3857_v30 = vrot.slane %v3843_v44, %v5304_v62  ;;  %v3875_v45 = vsel %vm3874_vm12, %v3872_v55, %v3873_v21  ;;  %vm3236_vm13 = vcmp.eq.s32.totalorder %v6022_v11, %v3233_v8  ;;  %vm3237_vm15 = vcmp.eq.s32.totalorder %v6023_v46, %v3233_v8 }
0x17c2   :  { %v3876_v31 = vrot.slane %v3875_v45, 1  ;;  %v3241_v1 = vsel %vm3237_vm15, -inf, %v6024_v57  ;;  %v3240_v10 = vsel %vm3236_vm13, -inf, %v6025_v48  ;;  %vm3219_vm7 = vcmp.lt.s32.totalorder %v3217_v42, %v3218_v12 }
0x17c3   :  { %v3858_v9 = vcombine.low %v3850_v60, %v3857_v30  ;;  %v3252_v54 = vsel %vm2876_vm1, %v3241_v1, -inf  ;;  %v3251_v51 = vsel %vm2874_vm3, %v3240_v10, -inf  ;;  %v3220_v39 = vsel %vm3219_vm7, %v3217_v42, %v3218_v12 }
0x17c4   :  { %vm3877_vm5 = vcmp.lt.s32.totalorder %v3875_v45, %v3876_v31  ;;  %v3253_v20 = vmax.f32 %v3251_v51, %v3252_v54  ;;  %vm3234_vm10 = vcmp.eq.s32.totalorder %v6022_v11, %v3220_v39  ;;  %vm3235_vm11 = vcmp.eq.s32.totalorder %v6023_v46, %v3220_v39 }
0x17c5   :  { %v3879_v62 = vsel %vm2874_vm3, %v3858_v9, 2147483647  ;;  %v3878_v59 = vsel %vm3877_vm5, %v3875_v45, %v3876_v31  ;;  %v3238_v28 = vsel %vm3234_vm10, -inf, %v6028_v56  ;;  %v3239_v61 = vsel %vm3235_vm11, -inf, %v6029_v19 }
0x17c6   :  { %vm3881_vm6 = vcmp.lt.s32.totalorder %v3879_v62, %v3880_v32  ;;  %vm3892_vm8 = vcmp.eq.s32.totalorder %v6022_v11, %v3878_v59  ;;  %vm3893_vm9 = vcmp.eq.s32.totalorder %v6023_v46, %v3878_v59  ;;  %v3242_v22 = vsel %vm2874_vm3, %v3238_v28, -inf }
0x17c7   :  { %v3882_v41 = vsel %vm3881_vm6, %v3879_v62, %v3880_v32  ;;  %v3896_v0 = vsel %vm3892_vm8, -inf, %v6026_v7  ;;  %v3897_v18 = vsel %vm3893_vm9, -inf, %v6027_v13  ;;  %v3243_v27 = vsel %vm2876_vm1, %v3239_v61, -inf }
0x17c8   :  { %v3883_v36 = vrot.slane %v3882_v41, 4  ;;  %v3900_v49 = vsel %vm2874_vm3, %v3896_v0, -inf  ;;  %v3901_v16 = vsel %vm3701_vm4, %v3897_v18, -inf  ;;  %v3254_v37 = vrot.slane %v3253_v20, 4 }
0x17c9   :  { %v3902_v2 = vmax.f32 %v3900_v49, %v3901_v16  ;;  %v3244_v14 = vmax.f32 %v3242_v22, %v3243_v27  ;;  %vm4018_vm6 = vcmask 254976  }
0x17ca   :  { %vm3884_vm12 = vcmp.lt.s32.totalorder %v3882_v41, %v3883_v36  ;;  %v3255_v52 = vmax.f32 %v3253_v20, %v3254_v37 }
0x17cb   :  { %v3885_v53 = vsel %vm3884_vm12, %v3882_v41, %v3883_v36  ;;  %v3245_v17 = vrot.slane %v3244_v14, 4  ;;  %v3903_v15 = vrot.slane %v3902_v2, 4 }
0x17cc   :  { %v3886_v38 = vrot.slane %v3885_v53, 2  ;;  %v3256_v5 = vrot.slane %v3255_v52, 2 }
0x17cd   :  { %v3246_v24 = vmax.f32 %v3244_v14, %v3245_v17  ;;  %v3904_v34 = vmax.f32 %v3902_v2, %v3903_v15 }
0x17ce   :  { %vm3887_vm13 = vcmp.lt.s32.totalorder %v3885_v53, %v3886_v38  ;;  %v3257_v50 = vmax.f32 %v3255_v52, %v3256_v5 }
0x17cf   :  { %v3888_v35 = vsel %vm3887_vm13, %v3885_v53, %v3886_v38  ;;  %v3247_v58 = vrot.slane %v3246_v24, 2  ;;  %v3905_v29 = vrot.slane %v3904_v34, 2 }
0x17d0   :  { %v3889_v33 = vrot.slane %v3888_v35, 1  ;;  %v3258_v3 = vrot.slane %v3257_v50, 1 }
0x17d1   :  { %v3248_v23 = vmax.f32 %v3246_v24, %v3247_v58  ;;  %v3906_v45 = vmax.f32 %v3904_v34, %v3905_v29 }
0x17d2   :  { %vm3890_vm15 = vcmp.lt.s32.totalorder %v3888_v35, %v3889_v33  ;;  %v3259_v21 = vmax.f32 %v3257_v50, %v3258_v3 }
0x17d3   :  { %v3891_v43 = vsel %vm3890_vm15, %v3888_v35, %v3889_v33  ;;  %v3249_v25 = vrot.slane %v3248_v23, 1 }
0x17d4   :  { %vm3894_vm5 = vcmp.eq.s32.totalorder %v6022_v11, %v3891_v43  ;;  %vm3895_vm1 = vcmp.eq.s32.totalorder %v6023_v46, %v3891_v43 }
0x17d5   :  { %v3898_v4 = vsel %vm3894_vm5, -inf, %v5683_v40  ;;  %v3899_v55 = vsel %vm3895_vm1, -inf, %v6030_v6  ;;  %v3250_v60 = vmax.f32 %v3248_v23, %v3249_v25  ;;  %v3907_v40 = vrot.slane %v3906_v45, 1 }
0x17d6   :  { %v3909_v63 = vsel %vm2874_vm3, %v3898_v4, -inf  ;;  %v3910_v47 = vsel %vm3701_vm4, %v3899_v55, -inf  ;;  %vm3939_vm4 = vcmask 195584  }
0x17d7   :  { %v3911_v44 = vmax.f32 %v3909_v63, %v3910_v47  ;;  %v3923_v8 = vsel %vm3918_vm14, %v3259_v21, %v3250_v60  ;;  %v3908_v9 = vmax.f32 %v3906_v45, %v3907_v40 }
0x17d8   :  { %3924 = vrot.lane.b32.xlu1 %v3923_v8, %s4588_s10 }
0x17d9   :  { %v3912_v30 = vrot.slane %v3911_v44, 4 }
0x17db   :  { %v3913_v42 = vmax.f32 %v3911_v44, %v3912_v30 }
0x17dd   :  { %v3914_v11 = vrot.slane %v3913_v42, 2 }
0x17df   :  { %v3915_v46 = vmax.f32 %v3913_v42, %v3914_v11 }
0x17e1   :  { %v3916_v31 = vrot.slane %v3915_v46, 1 }
0x17e3   :  { %v3917_v57 = vmax.f32 %v3915_v46, %v3916_v31 }
0x17e5   :  { %v3933_v1 = vsel %vm3918_vm14, %v3917_v57, %v3908_v9 }
0x17e6   :  { %3934 = vrot.lane.b32.xlu1 %v3933_v1, %s4589_s18 }
0x1829   :  { %v3929_v48 = vpop.permute.xlu0 %3928 }
0x184a   :  { %v3925_v32 = vpop.permute.xlu1 %3924 }
0x184b   :  { %v3937_v12 = vsel %vm2874_vm3, %v5754_v26, %v3925_v32 }
0x184c   :  { %v3938_v10 = vsel %vm56_vm0, %v3937_v12, %v3929_v48 }
0x1858   :  { %v3935_v54 = vpop.permute.xlu1 %3934 }
0x1859   :  { %v3940_v62 = vsel %vm3939_vm4, %v3938_v10, %v3935_v54 }
0x185a   :  { %4319 = vmatmul.mubr.msk.f32.vlgmr.msra.gmra.mrb[16].mxu1 %vm39_vm2, %v3940_v62 }
0x192d   :  { %v4014_v51 = vpop.f32.mrb[16].mxu1 }
0x192e   :  { %4019 = vst.msk [vmem:[#allocation3] sm:$0x3] %vm4018_vm6, %v4014_v51  ;;  %v4320_v59 = vpop.f32.mrb[17].mxu1 }
0x192f   :  { %4558 = shalt.err (!%p4555_p4)
}
0x1930   :  { %s4559_s2 = scalar_lea.hbm %s5952_s11, 32 }
0x1931   :  { %p4560_p5 = scmp.ne.s32.totalorder %s5952_s11, %s4559_s2  ;;  %p4563_p6 = scmp.lt.u32.totalorder %s4559_s2, %s5952_s11 }
0x1933   :  { %p4565_p7 = pnand %p4563_p6, %p4560_p5 }
0x1935   :  { %4568 = shalt.err (!%p4565_p7)
}
0x1936   :  { %4029 = dma.vmem_to_hbm [thread:$0]  %s4027_s23, 32, %s5952_s11, [#allocation4]  }
0x1937   :  { %4569 = dma.done.wait [#allocation4], 32  }
0x1938   :  { %4570 = vsyncadd [#allocation4], 4294967264 }
0x1939   :  { %4033 = vsyncpa [#allocation4], 1 }

</bundles_post_ra>
